<compile_context>
chip_gen: v7x
topology: tpu7x:2x2x1
jax: 0.10.0
libtpu: 0.0.40
codegen_flags: <defaults>
</compile_context>

<pallas_src>
import functools

import jax
import jax.numpy as jnp
from jax.experimental import pallas as pl
from jax.experimental.pallas import tpu as pltpu


def _kernel_lane_merged(x_ref, o_ref, *, nt, p):
    """One grid step = one (batch b, z-tile zt).  Lane-merged output layout.

    x_ref: (1, 1, nt*nt*p**3, C)  rows ordered (yt, xt, pz, py, px), minor = C.
    o_ref: (1, C, p*H*W)          output window out[b, :, zt*p:(zt+1)*p, :, :]
                                  flattened over (pz, y, x); lane index
                                  m = pz*H*W + (yt*p+py)*W + xt*p + px.
    """
    p3 = p * p * p
    W = nt * p
    HW = W * W
    # One block-wide XLU transpose, in the input dtype (no MXU, no casts).
    # Lanes of t_all keep the (yt, xt, pz, py, px) order.
    t_all = x_ref[0, 0, :, :].T                       # (C, nt^2 * p^3)
    for r in range(nt * nt):                          # r = yt*nt + xt
        yt, xt = divmod(r, nt)
        base_col = r * p3
        base_lane = yt * p * W + xt * p
        for zp in range(p):
            for yp in range(p):
                col = base_col + (zp * p + yp) * p
                lane = zp * HW + base_lane + yp * W
                # (C, p) slab: all channels x the p inner-x positions.
                o_ref[0, :, lane:lane + p] = t_all[:, col:col + p]


def _kernel_split_p(x_ref, o_ref, *, nt, p):
    """Fallback layout (p*H*W not 128-aligned, i.e. tiny spatial dims).

    o_ref: (1, C, 1, p, H*W) -- same output window, with pz kept as its own
    (sublane-padded) axis so every block dim is full-extent.
    """
    p3 = p * p * p
    W = nt * p
    t_all = x_ref[0, 0, :, :].T                       # (C, nt^2 * p^3)
    for r in range(nt * nt):
        yt, xt = divmod(r, nt)
        base_col = r * p3
        base_lane = yt * p * W + xt * p
        for zp in range(p):
            for yp in range(p):
                col = base_col + (zp * p + yp) * p
                lane = base_lane + yp * W
                o_ref[0, :, 0, zp, lane:lane + p] = t_all[:, col:col + p]


def _xla_reference(x, patch_size, original_shape):
    """Pure-JAX port of the PyTorch forward (also the small-problem fallback)."""
    B, N, _ = x.shape
    nt = int(round(N ** (1.0 / 3.0)))
    p = patch_size
    patches = x.reshape(B, nt, nt, nt, p, p, p, -1)
    patches = jnp.transpose(patches, (0, 7, 1, 4, 2, 5, 3, 6))
    return patches.reshape(-1, *original_shape)


def inverse_patcher_3d(x, patch_size, original_shape, *, xla_fallback_bytes=64 * 1024):
    """x: [B, N, F], N = nt**3, F = patch_size**3 * C.  Returns [B, *original_shape]."""
    B, N, F = x.shape
    C, D, H, W = original_shape
    p = int(patch_size)
    # torch uses truncating int(exp(log(N)/3)); shapes are static so we derive
    # nt host-side (round + assert; diverges from torch only where torch would
    # silently mis-shape).
    nt = int(round(N ** (1.0 / 3.0)))
    assert nt ** 3 == N, "num_patches must be a perfect cube"
    p3 = p * p * p
    # TODO(synk): non-cubic original_shape would need independent nt_z/nt_y/nt_x.
    assert F == p3 * C and D == H == W == nt * p, "shape mismatch with original_shape"

    itemsize = jnp.dtype(x.dtype).itemsize
    total_bytes = x.size * itemsize

    # Tiny problems: ~0.35 us/step grid overhead + launch dominate a zero-flop
    # copy; XLA's fused transpose is as fast and avoids per-shape compiles.
    if total_bytes < xla_fallback_bytes:
        return _xla_reference(x, p, original_shape)

    # Padded per-block VMEM footprint (double-buffered in + out).  Input block
    # pads its C-minor dim to 128 lanes; output pads C (or p) to the sublane
    # multiple.  Gate on a v7x-safe budget instead of blindly raising limits.
    sub = 8 * max(1, 4 // itemsize)                   # 8 (f32) / 16 (bf16) / 32 (int8)
    rup = lambda a, m: -(-a // m) * m
    lane_merged = ((p * H * W) % 128 == 0) or nt == 1
    in_blk = rup(nt * nt * p3, sub) * rup(C, 128) * itemsize
    if lane_merged:
        out_blk = rup(C, sub) * (p * H * W) * itemsize
    else:
        out_blk = C * rup(p, sub) * rup(H * W, 128) * itemsize
    vmem_needed = 2 * (in_blk + out_blk) + (4 << 20)  # double-buffer + slack
    if vmem_needed > (48 << 20):
        # TODO(synk): auto-split (chunk C in 128-multiples / extra yt grid axis)
        # instead of falling back; keeps v7x's 64 MiB physical VMEM safe for now.
        return _xla_reference(x, p, original_shape)

    # Metadata-only reshape: one (b, zt) slab is nt^2*p^3 contiguous rows of C.
    x3 = x.reshape(B, nt, nt * nt * p3, C)

    if lane_merged:
        kernel = functools.partial(_kernel_lane_merged, nt=nt, p=p)
        out_shape = jax.ShapeDtypeStruct((B, C, D * H * W), x.dtype)
        out_specs = pl.BlockSpec((1, C, p * H * W), lambda b, zt: (b, 0, zt))
    else:
        kernel = functools.partial(_kernel_split_p, nt=nt, p=p)
        out_shape = jax.ShapeDtypeStruct((B, C, nt, p, H * W), x.dtype)
        out_specs = pl.BlockSpec((1, C, 1, p, H * W), lambda b, zt: (b, 0, zt, 0, 0))

    # Pure copy: bytes in + bytes out, zero flops / transcendentals.
    bytes_moved = 2 * total_bytes

    out = pl.pallas_call(
        kernel,
        out_shape=out_shape,
        grid_spec=pltpu.PrefetchScalarGridSpec(
            num_scalar_prefetch=0,
            grid=(B, nt),  # one step = one (batch, z_tile) slab
            in_specs=[
                pl.BlockSpec((1, 1, nt * nt * p3, C), lambda b, zt: (b, zt, 0, 0)),
            ],
            out_specs=out_specs,
        ),
        compiler_params=pltpu.CompilerParams(
            dimension_semantics=("parallel", "parallel"),
            vmem_limit_bytes=int(max(32 << 20, vmem_needed)),  # <= 52 MiB by the gate above
        ),
        cost_estimate=pl.CostEstimate(
            flops=0, transcendentals=0, bytes_accessed=bytes_moved
        ),
    )(x3)

    # Metadata-only reshape back to NCDHW.
    return out.reshape(B, C, D, H, W)


if __name__ == "__main__":
    key = jax.random.PRNGKey(0)
    k0, k1 = jax.random.split(key)

    # 1) Main check: lane-merged kernel path.
    #    patch_size=2, 8x8x8 patch grid, C=4 -> D=H=W=16, p*H*W=512 (128-aligned).
    B, C, p, nt = 2, 4, 2, 8
    D = nt * p                       # 16
    N = nt ** 3                      # 512 patches
    F = p ** 3 * C                   # 32 features per patch
    original_shape = (C, D, D, D)
    x = jax.random.normal(k0, (B, N, F), dtype=jnp.float32)

    out = jax.block_until_ready(inverse_patcher_3d(x, p, original_shape))
    ref = _xla_reference(x, p, original_shape)
    assert out.shape == (B, *original_shape), (out.shape, (B, *original_shape))
    assert jnp.array_equal(out, ref), "lane-merged kernel output != reference"

    # 2) Fallback-layout kernel path (tiny spatial: p*H*W=32, not 128-aligned),
    #    kernel forced by disabling the small-problem XLA fallback.
    B2, C2, p2, nt2 = 2, 4, 2, 2
    D2 = nt2 * p2                    # 4
    x2 = jax.random.normal(k1, (B2, nt2 ** 3, p2 ** 3 * C2), dtype=jnp.float32)
    out2 = jax.block_until_ready(
        inverse_patcher_3d(x2, p2, (C2, D2, D2, D2), xla_fallback_bytes=0)
    )
    assert jnp.array_equal(out2, _xla_reference(x2, p2, (C2, D2, D2, D2))), \
        "split-p kernel output != reference"

    # 3) Tiny-problem pure-JAX fallback path (default threshold).
    out3 = jax.block_until_ready(inverse_patcher_3d(x2, p2, (C2, D2, D2, D2)))
    assert jnp.array_equal(out3, _xla_reference(x2, p2, (C2, D2, D2, D2))), \
        "XLA fallback output != reference"

    print("KERNEL_OK")
</pallas_src>

<mosaic_0001>
module attributes {stable_mosaic.version = 11 : i64} {
  func.func @_kernel_lane_merged(%arg0: i32, %arg1: i32, %arg2: memref<1x1x512x4xf32, #tpu.memory_space<vmem>>, %arg3: memref<1x4x512xf32, #tpu.memory_space<vmem>>) attributes {dimension_semantics = [#tpu.dimension_semantics<parallel>, #tpu.dimension_semantics<parallel>], iteration_bounds = array<i64: 2, 8>, scalar_prefetch = 0 : i64, scratch_operands = 0 : i64, tpu.core_type = #tpu.core_type<tc>, window_params = [{transform_indices = @transform_0, window_bounds = array<i64: 1, 1, 512, 4>}, {transform_indices = @transform_1, window_bounds = array<i64: 1, 4, 512>}]} {
    %c0 = arith.constant 0 : index
    %c0_0 = arith.constant 0 : index
    %c0_1 = arith.constant 0 : index
    %c0_2 = arith.constant 0 : index
    %0 = vector.load %arg2[%c0, %c0_0, %c0_1, %c0_2] : memref<1x1x512x4xf32, #tpu.memory_space<vmem>>, vector<1x1x512x4xf32>
    %1 = vector.shape_cast %0 : vector<1x1x512x4xf32> to vector<512x4xf32>
    %2 = tpu.transpose %1, [1, 0] : vector<512x4xf32> -> vector<4x512xf32>
    %3 = vector.extract_strided_slice %2 {offsets = [0, 0], sizes = [4, 2], strides = [1, 1]} : vector<4x512xf32> to vector<4x2xf32>
    %c0_3 = arith.constant 0 : index
    %c0_4 = arith.constant 0 : index
    %c0_5 = arith.constant 0 : index
    %4 = vector.load %arg3[%c0_3, %c0_4, %c0_5] : memref<1x4x512xf32, #tpu.memory_space<vmem>>, vector<1x4x2xf32>
    %5 = vector.shape_cast %4 : vector<1x4x2xf32> to vector<4x2xf32>
    %6 = vector.shape_cast %3 : vector<4x2xf32> to vector<1x4x2xf32>
    tpu.vector_store %arg3[%c0_3, %c0_4, %c0_5], %6 {strides = array<i32>} : memref<1x4x512xf32, #tpu.memory_space<vmem>>, vector<1x4x2xf32>,
    %7 = vector.extract_strided_slice %2 {offsets = [0, 2], sizes = [4, 2], strides = [1, 1]} : vector<4x512xf32> to vector<4x2xf32>
    %c0_6 = arith.constant 0 : index
    %c0_7 = arith.constant 0 : index
    %c16 = arith.constant 16 : index
    %8 = vector.load %arg3[%c0_6, %c0_7, %c16] : memref<1x4x512xf32, #tpu.memory_space<vmem>>, vector<1x4x2xf32>
    %9 = vector.shape_cast %8 : vector<1x4x2xf32> to vector<4x2xf32>
    %10 = vector.shape_cast %7 : vector<4x2xf32> to vector<1x4x2xf32>
    tpu.vector_store %arg3[%c0_6, %c0_7, %c16], %10 {strides = array<i32>} : memref<1x4x512xf32, #tpu.memory_space<vmem>>, vector<1x4x2xf32>,
    %11 = vector.extract_strided_slice %2 {offsets = [0, 4], sizes = [4, 2], strides = [1, 1]} : vector<4x512xf32> to vector<4x2xf32>
    %c0_8 = arith.constant 0 : index
    %c0_9 = arith.constant 0 : index
    %c256 = arith.constant 256 : index
    %12 = vector.load %arg3[%c0_8, %c0_9, %c256] : memref<1x4x512xf32, #tpu.memory_space<vmem>>, vector<1x4x2xf32>
    %13 = vector.shape_cast %12 : vector<1x4x2xf32> to vector<4x2xf32>
    %14 = vector.shape_cast %11 : vector<4x2xf32> to vector<1x4x2xf32>
    tpu.vector_store %arg3[%c0_8, %c0_9, %c256], %14 {strides = array<i32>} : memref<1x4x512xf32, #tpu.memory_space<vmem>>, vector<1x4x2xf32>,
    %15 = vector.extract_strided_slice %2 {offsets = [0, 6], sizes = [4, 2], strides = [1, 1]} : vector<4x512xf32> to vector<4x2xf32>
    %c0_10 = arith.constant 0 : index
    %c0_11 = arith.constant 0 : index
    %c272 = arith.constant 272 : index
    %16 = vector.load %arg3[%c0_10, %c0_11, %c272] : memref<1x4x512xf32, #tpu.memory_space<vmem>>, vector<1x4x2xf32>
    %17 = vector.shape_cast %16 : vector<1x4x2xf32> to vector<4x2xf32>
    %18 = vector.shape_cast %15 : vector<4x2xf32> to vector<1x4x2xf32>
    tpu.vector_store %arg3[%c0_10, %c0_11, %c272], %18 {strides = array<i32>} : memref<1x4x512xf32, #tpu.memory_space<vmem>>, vector<1x4x2xf32>,
    %19 = vector.extract_strided_slice %2 {offsets = [0, 8], sizes = [4, 2], strides = [1, 1]} : vector<4x512xf32> to vector<4x2xf32>
    %c0_12 = arith.constant 0 : index
    %c0_13 = arith.constant 0 : index
    %c2 = arith.constant 2 : index
    %20 = vector.load %arg3[%c0_12, %c0_13, %c2] : memref<1x4x512xf32, #tpu.memory_space<vmem>>, vector<1x4x2xf32>
    %21 = vector.shape_cast %20 : vector<1x4x2xf32> to vector<4x2xf32>
    %22 = vector.shape_cast %19 : vector<4x2xf32> to vector<1x4x2xf32>
    tpu.vector_store %arg3[%c0_12, %c0_13, %c2], %22 {strides = array<i32>} : memref<1x4x512xf32, #tpu.memory_space<vmem>>, vector<1x4x2xf32>,
    %23 = vector.extract_strided_slice %2 {offsets = [0, 10], sizes = [4, 2], strides = [1, 1]} : vector<4x512xf32> to vector<4x2xf32>
    %c0_14 = arith.constant 0 : index
    %c0_15 = arith.constant 0 : index
    %c18 = arith.constant 18 : index
    %24 = vector.load %arg3[%c0_14, %c0_15, %c18] : memref<1x4x512xf32, #tpu.memory_space<vmem>>, vector<1x4x2xf32>
    %25 = vector.shape_cast %24 : vector<1x4x2xf32> to vector<4x2xf32>
    %26 = vector.shape_cast %23 : vector<4x2xf32> to vector<1x4x2xf32>
    tpu.vector_store %arg3[%c0_14, %c0_15, %c18], %26 {strides = array<i32>} : memref<1x4x512xf32, #tpu.memory_space<vmem>>, vector<1x4x2xf32>,
    %27 = vector.extract_strided_slice %2 {offsets = [0, 12], sizes = [4, 2], strides = [1, 1]} : vector<4x512xf32> to vector<4x2xf32>
    %c0_16 = arith.constant 0 : index
    %c0_17 = arith.constant 0 : index
    %c258 = arith.constant 258 : index
    %28 = vector.load %arg3[%c0_16, %c0_17, %c258] : memref<1x4x512xf32, #tpu.memory_space<vmem>>, vector<1x4x2xf32>
    %29 = vector.shape_cast %28 : vector<1x4x2xf32> to vector<4x2xf32>
    %30 = vector.shape_cast %27 : vector<4x2xf32> to vector<1x4x2xf32>
    tpu.vector_store %arg3[%c0_16, %c0_17, %c258], %30 {strides = array<i32>} : memref<1x4x512xf32, #tpu.memory_space<vmem>>, vector<1x4x2xf32>,
    %31 = vector.extract_strided_slice %2 {offsets = [0, 14], sizes = [4, 2], strides = [1, 1]} : vector<4x512xf32> to vector<4x2xf32>
    %c0_18 = arith.constant 0 : index
    %c0_19 = arith.constant 0 : index
    %c274 = arith.constant 274 : index
    %32 = vector.load %arg3[%c0_18, %c0_19, %c274] : memref<1x4x512xf32, #tpu.memory_space<vmem>>, vector<1x4x2xf32>
    %33 = vector.shape_cast %32 : vector<1x4x2xf32> to vector<4x2xf32>
    %34 = vector.shape_cast %31 : vector<4x2xf32> to vector<1x4x2xf32>
    tpu.vector_store %arg3[%c0_18, %c0_19, %c274], %34 {strides = array<i32>} : memref<1x4x512xf32, #tpu.memory_space<vmem>>, vector<1x4x2xf32>,
    %35 = vector.extract_strided_slice %2 {offsets = [0, 16], sizes = [4, 2], strides = [1, 1]} : vector<4x512xf32> to vector<4x2xf32>
    %c0_20 = arith.constant 0 : index
    %c0_21 = arith.constant 0 : index
    %c4 = arith.constant 4 : index
    %36 = vector.load %arg3[%c0_20, %c0_21, %c4] : memref<1x4x512xf32, #tpu.memory_space<vmem>>, vector<1x4x2xf32>
    %37 = vector.shape_cast %36 : vector<1x4x2xf32> to vector<4x2xf32>
    %38 = vector.shape_cast %35 : vector<4x2xf32> to vector<1x4x2xf32>
    tpu.vector_store %arg3[%c0_20, %c0_21, %c4], %38 {strides = array<i32>} : memref<1x4x512xf32, #tpu.memory_space<vmem>>, vector<1x4x2xf32>,
    %39 = vector.extract_strided_slice %2 {offsets = [0, 18], sizes = [4, 2], strides = [1, 1]} : vector<4x512xf32> to vector<4x2xf32>
    %c0_22 = arith.constant 0 : index
    %c0_23 = arith.constant 0 : index
    %c20 = arith.constant 20 : index
    %40 = vector.load %arg3[%c0_22, %c0_23, %c20] : memref<1x4x512xf32, #tpu.memory_space<vmem>>, vector<1x4x2xf32>
    %41 = vector.shape_cast %40 : vector<1x4x2xf32> to vector<4x2xf32>
    %42 = vector.shape_cast %39 : vector<4x2xf32> to vector<1x4x2xf32>
    tpu.vector_store %arg3[%c0_22, %c0_23, %c20], %42 {strides = array<i32>} : memref<1x4x512xf32, #tpu.memory_space<vmem>>, vector<1x4x2xf32>,
    %43 = vector.extract_strided_slice %2 {offsets = [0, 20], sizes = [4, 2], strides = [1, 1]} : vector<4x512xf32> to vector<4x2xf32>
    %c0_24 = arith.constant 0 : index
    %c0_25 = arith.constant 0 : index
    %c260 = arith.constant 260 : index
    %44 = vector.load %arg3[%c0_24, %c0_25, %c260] : memref<1x4x512xf32, #tpu.memory_space<vmem>>, vector<1x4x2xf32>
    %45 = vector.shape_cast %44 : vector<1x4x2xf32> to vector<4x2xf32>
    %46 = vector.shape_cast %43 : vector<4x2xf32> to vector<1x4x2xf32>
    tpu.vector_store %arg3[%c0_24, %c0_25, %c260], %46 {strides = array<i32>} : memref<1x4x512xf32, #tpu.memory_space<vmem>>, vector<1x4x2xf32>,
    %47 = vector.extract_strided_slice %2 {offsets = [0, 22], sizes = [4, 2], strides = [1, 1]} : vector<4x512xf32> to vector<4x2xf32>
    %c0_26 = arith.constant 0 : index
    %c0_27 = arith.constant 0 : index
    %c276 = arith.constant 276 : index
    %48 = vector.load %arg3[%c0_26, %c0_27, %c276] : memref<1x4x512xf32, #tpu.memory_space<vmem>>, vector<1x4x2xf32>
    %49 = vector.shape_cast %48 : vector<1x4x2xf32> to vector<4x2xf32>
    %50 = vector.shape_cast %47 : vector<4x2xf32> to vector<1x4x2xf32>
    tpu.vector_store %arg3[%c0_26, %c0_27, %c276], %50 {strides = array<i32>} : memref<1x4x512xf32, #tpu.memory_space<vmem>>, vector<1x4x2xf32>,
    %51 = vector.extract_strided_slice %2 {offsets = [0, 24], sizes = [4, 2], strides = [1, 1]} : vector<4x512xf32> to vector<4x2xf32>
    %c0_28 = arith.constant 0 : index
    %c0_29 = arith.constant 0 : index
    %c6 = arith.constant 6 : index
    %52 = vector.load %arg3[%c0_28, %c0_29, %c6] : memref<1x4x512xf32, #tpu.memory_space<vmem>>, vector<1x4x2xf32>
    %53 = vector.shape_cast %52 : vector<1x4x2xf32> to vector<4x2xf32>
    %54 = vector.shape_cast %51 : vector<4x2xf32> to vector<1x4x2xf32>
    tpu.vector_store %arg3[%c0_28, %c0_29, %c6], %54 {strides = array<i32>} : memref<1x4x512xf32, #tpu.memory_space<vmem>>, vector<1x4x2xf32>,
    %55 = vector.extract_strided_slice %2 {offsets = [0, 26], sizes = [4, 2], strides = [1, 1]} : vector<4x512xf32> to vector<4x2xf32>
    %c0_30 = arith.constant 0 : index
    %c0_31 = arith.constant 0 : index
    %c22 = arith.constant 22 : index
    %56 = vector.load %arg3[%c0_30, %c0_31, %c22] : memref<1x4x512xf32, #tpu.memory_space<vmem>>, vector<1x4x2xf32>
    %57 = vector.shape_cast %56 : vector<1x4x2xf32> to vector<4x2xf32>
    %58 = vector.shape_cast %55 : vector<4x2xf32> to vector<1x4x2xf32>
    tpu.vector_store %arg3[%c0_30, %c0_31, %c22], %58 {strides = array<i32>} : memref<1x4x512xf32, #tpu.memory_space<vmem>>, vector<1x4x2xf32>,
    %59 = vector.extract_strided_slice %2 {offsets = [0, 28], sizes = [4, 2], strides = [1, 1]} : vector<4x512xf32> to vector<4x2xf32>
    %c0_32 = arith.constant 0 : index
    %c0_33 = arith.constant 0 : index
    %c262 = arith.constant 262 : index
    %60 = vector.load %arg3[%c0_32, %c0_33, %c262] : memref<1x4x512xf32, #tpu.memory_space<vmem>>, vector<1x4x2xf32>
    %61 = vector.shape_cast %60 : vector<1x4x2xf32> to vector<4x2xf32>
    %62 = vector.shape_cast %59 : vector<4x2xf32> to vector<1x4x2xf32>
    tpu.vector_store %arg3[%c0_32, %c0_33, %c262], %62 {strides = array<i32>} : memref<1x4x512xf32, #tpu.memory_space<vmem>>, vector<1x4x2xf32>,
    %63 = vector.extract_strided_slice %2 {offsets = [0, 30], sizes = [4, 2], strides = [1, 1]} : vector<4x512xf32> to vector<4x2xf32>
    %c0_34 = arith.constant 0 : index
    %c0_35 = arith.constant 0 : index
    %c278 = arith.constant 278 : index
    %64 = vector.load %arg3[%c0_34, %c0_35, %c278] : memref<1x4x512xf32, #tpu.memory_space<vmem>>, vector<1x4x2xf32>
    %65 = vector.shape_cast %64 : vector<1x4x2xf32> to vector<4x2xf32>
    %66 = vector.shape_cast %63 : vector<4x2xf32> to vector<1x4x2xf32>
    tpu.vector_store %arg3[%c0_34, %c0_35, %c278], %66 {strides = array<i32>} : memref<1x4x512xf32, #tpu.memory_space<vmem>>, vector<1x4x2xf32>,
    %67 = vector.extract_strided_slice %2 {offsets = [0, 32], sizes = [4, 2], strides = [1, 1]} : vector<4x512xf32> to vector<4x2xf32>
    %c0_36 = arith.constant 0 : index
    %c0_37 = arith.constant 0 : index
    %c8 = arith.constant 8 : index
    %68 = vector.load %arg3[%c0_36, %c0_37, %c8] : memref<1x4x512xf32, #tpu.memory_space<vmem>>, vector<1x4x2xf32>
    %69 = vector.shape_cast %68 : vector<1x4x2xf32> to vector<4x2xf32>
    %70 = vector.shape_cast %67 : vector<4x2xf32> to vector<1x4x2xf32>
    tpu.vector_store %arg3[%c0_36, %c0_37, %c8], %70 {strides = array<i32>} : memref<1x4x512xf32, #tpu.memory_space<vmem>>, vector<1x4x2xf32>,
    %71 = vector.extract_strided_slice %2 {offsets = [0, 34], sizes = [4, 2], strides = [1, 1]} : vector<4x512xf32> to vector<4x2xf32>
    %c0_38 = arith.constant 0 : index
    %c0_39 = arith.constant 0 : index
    %c24 = arith.constant 24 : index
    %72 = vector.load %arg3[%c0_38, %c0_39, %c24] : memref<1x4x512xf32, #tpu.memory_space<vmem>>, vector<1x4x2xf32>
    %73 = vector.shape_cast %72 : vector<1x4x2xf32> to vector<4x2xf32>
    %74 = vector.shape_cast %71 : vector<4x2xf32> to vector<1x4x2xf32>
    tpu.vector_store %arg3[%c0_38, %c0_39, %c24], %74 {strides = array<i32>} : memref<1x4x512xf32, #tpu.memory_space<vmem>>, vector<1x4x2xf32>,
    %75 = vector.extract_strided_slice %2 {offsets = [0, 36], sizes = [4, 2], strides = [1, 1]} : vector<4x512xf32> to vector<4x2xf32>
    %c0_40 = arith.constant 0 : index
    %c0_41 = arith.constant 0 : index
    %c264 = arith.constant 264 : index
    %76 = vector.load %arg3[%c0_40, %c0_41, %c264] : memref<1x4x512xf32, #tpu.memory_space<vmem>>, vector<1x4x2xf32>
    %77 = vector.shape_cast %76 : vector<1x4x2xf32> to vector<4x2xf32>
    %78 = vector.shape_cast %75 : vector<4x2xf32> to vector<1x4x2xf32>
    tpu.vector_store %arg3[%c0_40, %c0_41, %c264], %78 {strides = array<i32>} : memref<1x4x512xf32, #tpu.memory_space<vmem>>, vector<1x4x2xf32>,
    %79 = vector.extract_strided_slice %2 {offsets = [0, 38], sizes = [4, 2], strides = [1, 1]} : vector<4x512xf32> to vector<4x2xf32>
    %c0_42 = arith.constant 0 : index
    %c0_43 = arith.constant 0 : index
    %c280 = arith.constant 280 : index
    %80 = vector.load %arg3[%c0_42, %c0_43, %c280] : memref<1x4x512xf32, #tpu.memory_space<vmem>>, vector<1x4x2xf32>
    %81 = vector.shape_cast %80 : vector<1x4x2xf32> to vector<4x2xf32>
    %82 = vector.shape_cast %79 : vector<4x2xf32> to vector<1x4x2xf32>
    tpu.vector_store %arg3[%c0_42, %c0_43, %c280], %82 {strides = array<i32>} : memref<1x4x512xf32, #tpu.memory_space<vmem>>, vector<1x4x2xf32>,
    %83 = vector.extract_strided_slice %2 {offsets = [0, 40], sizes = [4, 2], strides = [1, 1]} : vector<4x512xf32> to vector<4x2xf32>
    %c0_44 = arith.constant 0 : index
    %c0_45 = arith.constant 0 : index
    %c10 = arith.constant 10 : index
    %84 = vector.load %arg3[%c0_44, %c0_45, %c10] : memref<1x4x512xf32, #tpu.memory_space<vmem>>, vector<1x4x2xf32>
    %85 = vector.shape_cast %84 : vector<1x4x2xf32> to vector<4x2xf32>
    %86 = vector.shape_cast %83 : vector<4x2xf32> to vector<1x4x2xf32>
    tpu.vector_store %arg3[%c0_44, %c0_45, %c10], %86 {strides = array<i32>} : memref<1x4x512xf32, #tpu.memory_space<vmem>>, vector<1x4x2xf32>,
    %87 = vector.extract_strided_slice %2 {offsets = [0, 42], sizes = [4, 2], strides = [1, 1]} : vector<4x512xf32> to vector<4x2xf32>
    %c0_46 = arith.constant 0 : index
    %c0_47 = arith.constant 0 : index
    %c26 = arith.constant 26 : index
    %88 = vector.load %arg3[%c0_46, %c0_47, %c26] : memref<1x4x512xf32, #tpu.memory_space<vmem>>, vector<1x4x2xf32>
    %89 = vector.shape_cast %88 : vector<1x4x2xf32> to vector<4x2xf32>
    %90 = vector.shape_cast %87 : vector<4x2xf32> to vector<1x4x2xf32>
    tpu.vector_store %arg3[%c0_46, %c0_47, %c26], %90 {strides = array<i32>} : memref<1x4x512xf32, #tpu.memory_space<vmem>>, vector<1x4x2xf32>,
    %91 = vector.extract_strided_slice %2 {offsets = [0, 44], sizes = [4, 2], strides = [1, 1]} : vector<4x512xf32> to vector<4x2xf32>
    %c0_48 = arith.constant 0 : index
    %c0_49 = arith.constant 0 : index
    %c266 = arith.constant 266 : index
    %92 = vector.load %arg3[%c0_48, %c0_49, %c266] : memref<1x4x512xf32, #tpu.memory_space<vmem>>, vector<1x4x2xf32>
    %93 = vector.shape_cast %92 : vector<1x4x2xf32> to vector<4x2xf32>
    %94 = vector.shape_cast %91 : vector<4x2xf32> to vector<1x4x2xf32>
    tpu.vector_store %arg3[%c0_48, %c0_49, %c266], %94 {strides = array<i32>} : memref<1x4x512xf32, #tpu.memory_space<vmem>>, vector<1x4x2xf32>,
    %95 = vector.extract_strided_slice %2 {offsets = [0, 46], sizes = [4, 2], strides = [1, 1]} : vector<4x512xf32> to vector<4x2xf32>
    %c0_50 = arith.constant 0 : index
    %c0_51 = arith.constant 0 : index
    %c282 = arith.constant 282 : index
    %96 = vector.load %arg3[%c0_50, %c0_51, %c282] : memref<1x4x512xf32, #tpu.memory_space<vmem>>, vector<1x4x2xf32>
    %97 = vector.shape_cast %96 : vector<1x4x2xf32> to vector<4x2xf32>
    %98 = vector.shape_cast %95 : vector<4x2xf32> to vector<1x4x2xf32>
    tpu.vector_store %arg3[%c0_50, %c0_51, %c282], %98 {strides = array<i32>} : memref<1x4x512xf32, #tpu.memory_space<vmem>>, vector<1x4x2xf32>,
    %99 = vector.extract_strided_slice %2 {offsets = [0, 48], sizes = [4, 2], strides = [1, 1]} : vector<4x512xf32> to vector<4x2xf32>
    %c0_52 = arith.constant 0 : index
    %c0_53 = arith.constant 0 : index
    %c12 = arith.constant 12 : index
    %100 = vector.load %arg3[%c0_52, %c0_53, %c12] : memref<1x4x512xf32, #tpu.memory_space<vmem>>, vector<1x4x2xf32>
    %101 = vector.shape_cast %100 : vector<1x4x2xf32> to vector<4x2xf32>
    %102 = vector.shape_cast %99 : vector<4x2xf32> to vector<1x4x2xf32>
    tpu.vector_store %arg3[%c0_52, %c0_53, %c12], %102 {strides = array<i32>} : memref<1x4x512xf32, #tpu.memory_space<vmem>>, vector<1x4x2xf32>,
    %103 = vector.extract_strided_slice %2 {offsets = [0, 50], sizes = [4, 2], strides = [1, 1]} : vector<4x512xf32> to vector<4x2xf32>
    %c0_54 = arith.constant 0 : index
    %c0_55 = arith.constant 0 : index
    %c28 = arith.constant 28 : index
    %104 = vector.load %arg3[%c0_54, %c0_55, %c28] : memref<1x4x512xf32, #tpu.memory_space<vmem>>, vector<1x4x2xf32>
    %105 = vector.shape_cast %104 : vector<1x4x2xf32> to vector<4x2xf32>
    %106 = vector.shape_cast %103 : vector<4x2xf32> to vector<1x4x2xf32>
    tpu.vector_store %arg3[%c0_54, %c0_55, %c28], %106 {strides = array<i32>} : memref<1x4x512xf32, #tpu.memory_space<vmem>>, vector<1x4x2xf32>,
    %107 = vector.extract_strided_slice %2 {offsets = [0, 52], sizes = [4, 2], strides = [1, 1]} : vector<4x512xf32> to vector<4x2xf32>
    %c0_56 = arith.constant 0 : index
    %c0_57 = arith.constant 0 : index
    %c268 = arith.constant 268 : index
    %108 = vector.load %arg3[%c0_56, %c0_57, %c268] : memref<1x4x512xf32, #tpu.memory_space<vmem>>, vector<1x4x2xf32>
    %109 = vector.shape_cast %108 : vector<1x4x2xf32> to vector<4x2xf32>
    %110 = vector.shape_cast %107 : vector<4x2xf32> to vector<1x4x2xf32>
    tpu.vector_store %arg3[%c0_56, %c0_57, %c268], %110 {strides = array<i32>} : memref<1x4x512xf32, #tpu.memory_space<vmem>>, vector<1x4x2xf32>,
    %111 = vector.extract_strided_slice %2 {offsets = [0, 54], sizes = [4, 2], strides = [1, 1]} : vector<4x512xf32> to vector<4x2xf32>
    %c0_58 = arith.constant 0 : index
    %c0_59 = arith.constant 0 : index
    %c284 = arith.constant 284 : index
    %112 = vector.load %arg3[%c0_58, %c0_59, %c284] : memref<1x4x512xf32, #tpu.memory_space<vmem>>, vector<1x4x2xf32>
    %113 = vector.shape_cast %112 : vector<1x4x2xf32> to vector<4x2xf32>
    %114 = vector.shape_cast %111 : vector<4x2xf32> to vector<1x4x2xf32>
    tpu.vector_store %arg3[%c0_58, %c0_59, %c284], %114 {strides = array<i32>} : memref<1x4x512xf32, #tpu.memory_space<vmem>>, vector<1x4x2xf32>,
    %115 = vector.extract_strided_slice %2 {offsets = [0, 56], sizes = [4, 2], strides = [1, 1]} : vector<4x512xf32> to vector<4x2xf32>
    %c0_60 = arith.constant 0 : index
    %c0_61 = arith.constant 0 : index
    %c14 = arith.constant 14 : index
    %116 = vector.load %arg3[%c0_60, %c0_61, %c14] : memref<1x4x512xf32, #tpu.memory_space<vmem>>, vector<1x4x2xf32>
    %117 = vector.shape_cast %116 : vector<1x4x2xf32> to vector<4x2xf32>
    %118 = vector.shape_cast %115 : vector<4x2xf32> to vector<1x4x2xf32>
    tpu.vector_store %arg3[%c0_60, %c0_61, %c14], %118 {strides = array<i32>} : memref<1x4x512xf32, #tpu.memory_space<vmem>>, vector<1x4x2xf32>,
    %119 = vector.extract_strided_slice %2 {offsets = [0, 58], sizes = [4, 2], strides = [1, 1]} : vector<4x512xf32> to vector<4x2xf32>
    %c0_62 = arith.constant 0 : index
    %c0_63 = arith.constant 0 : index
    %c30 = arith.constant 30 : index
    %120 = vector.load %arg3[%c0_62, %c0_63, %c30] : memref<1x4x512xf32, #tpu.memory_space<vmem>>, vector<1x4x2xf32>
    %121 = vector.shape_cast %120 : vector<1x4x2xf32> to vector<4x2xf32>
    %122 = vector.shape_cast %119 : vector<4x2xf32> to vector<1x4x2xf32>
    tpu.vector_store %arg3[%c0_62, %c0_63, %c30], %122 {strides = array<i32>} : memref<1x4x512xf32, #tpu.memory_space<vmem>>, vector<1x4x2xf32>,
    %123 = vector.extract_strided_slice %2 {offsets = [0, 60], sizes = [4, 2], strides = [1, 1]} : vector<4x512xf32> to vector<4x2xf32>
    %c0_64 = arith.constant 0 : index
    %c0_65 = arith.constant 0 : index
    %c270 = arith.constant 270 : index
    %124 = vector.load %arg3[%c0_64, %c0_65, %c270] : memref<1x4x512xf32, #tpu.memory_space<vmem>>, vector<1x4x2xf32>
    %125 = vector.shape_cast %124 : vector<1x4x2xf32> to vector<4x2xf32>
    %126 = vector.shape_cast %123 : vector<4x2xf32> to vector<1x4x2xf32>
    tpu.vector_store %arg3[%c0_64, %c0_65, %c270], %126 {strides = array<i32>} : memref<1x4x512xf32, #tpu.memory_space<vmem>>, vector<1x4x2xf32>,
    %127 = vector.extract_strided_slice %2 {offsets = [0, 62], sizes = [4, 2], strides = [1, 1]} : vector<4x512xf32> to vector<4x2xf32>
    %c0_66 = arith.constant 0 : index
    %c0_67 = arith.constant 0 : index
    %c286 = arith.constant 286 : index
    %128 = vector.load %arg3[%c0_66, %c0_67, %c286] : memref<1x4x512xf32, #tpu.memory_space<vmem>>, vector<1x4x2xf32>
    %129 = vector.shape_cast %128 : vector<1x4x2xf32> to vector<4x2xf32>
    %130 = vector.shape_cast %127 : vector<4x2xf32> to vector<1x4x2xf32>
    tpu.vector_store %arg3[%c0_66, %c0_67, %c286], %130 {strides = array<i32>} : memref<1x4x512xf32, #tpu.memory_space<vmem>>, vector<1x4x2xf32>,
    %131 = vector.extract_strided_slice %2 {offsets = [0, 64], sizes = [4, 2], strides = [1, 1]} : vector<4x512xf32> to vector<4x2xf32>
    %c0_68 = arith.constant 0 : index
    %c0_69 = arith.constant 0 : index
    %c32 = arith.constant 32 : index
    %132 = vector.load %arg3[%c0_68, %c0_69, %c32] : memref<1x4x512xf32, #tpu.memory_space<vmem>>, vector<1x4x2xf32>
    %133 = vector.shape_cast %132 : vector<1x4x2xf32> to vector<4x2xf32>
    %134 = vector.shape_cast %131 : vector<4x2xf32> to vector<1x4x2xf32>
    tpu.vector_store %arg3[%c0_68, %c0_69, %c32], %134 {strides = array<i32>} : memref<1x4x512xf32, #tpu.memory_space<vmem>>, vector<1x4x2xf32>,
    %135 = vector.extract_strided_slice %2 {offsets = [0, 66], sizes = [4, 2], strides = [1, 1]} : vector<4x512xf32> to vector<4x2xf32>
    %c0_70 = arith.constant 0 : index
    %c0_71 = arith.constant 0 : index
    %c48 = arith.constant 48 : index
    %136 = vector.load %arg3[%c0_70, %c0_71, %c48] : memref<1x4x512xf32, #tpu.memory_space<vmem>>, vector<1x4x2xf32>
    %137 = vector.shape_cast %136 : vector<1x4x2xf32> to vector<4x2xf32>
    %138 = vector.shape_cast %135 : vector<4x2xf32> to vector<1x4x2xf32>
    tpu.vector_store %arg3[%c0_70, %c0_71, %c48], %138 {strides = array<i32>} : memref<1x4x512xf32, #tpu.memory_space<vmem>>, vector<1x4x2xf32>,
    %139 = vector.extract_strided_slice %2 {offsets = [0, 68], sizes = [4, 2], strides = [1, 1]} : vector<4x512xf32> to vector<4x2xf32>
    %c0_72 = arith.constant 0 : index
    %c0_73 = arith.constant 0 : index
    %c288 = arith.constant 288 : index
    %140 = vector.load %arg3[%c0_72, %c0_73, %c288] : memref<1x4x512xf32, #tpu.memory_space<vmem>>, vector<1x4x2xf32>
    %141 = vector.shape_cast %140 : vector<1x4x2xf32> to vector<4x2xf32>
    %142 = vector.shape_cast %139 : vector<4x2xf32> to vector<1x4x2xf32>
    tpu.vector_store %arg3[%c0_72, %c0_73, %c288], %142 {strides = array<i32>} : memref<1x4x512xf32, #tpu.memory_space<vmem>>, vector<1x4x2xf32>,
    %143 = vector.extract_strided_slice %2 {offsets = [0, 70], sizes = [4, 2], strides = [1, 1]} : vector<4x512xf32> to vector<4x2xf32>
    %c0_74 = arith.constant 0 : index
    %c0_75 = arith.constant 0 : index
    %c304 = arith.constant 304 : index
    %144 = vector.load %arg3[%c0_74, %c0_75, %c304] : memref<1x4x512xf32, #tpu.memory_space<vmem>>, vector<1x4x2xf32>
    %145 = vector.shape_cast %144 : vector<1x4x2xf32> to vector<4x2xf32>
    %146 = vector.shape_cast %143 : vector<4x2xf32> to vector<1x4x2xf32>
    tpu.vector_store %arg3[%c0_74, %c0_75, %c304], %146 {strides = array<i32>} : memref<1x4x512xf32, #tpu.memory_space<vmem>>, vector<1x4x2xf32>,
    %147 = vector.extract_strided_slice %2 {offsets = [0, 72], sizes = [4, 2], strides = [1, 1]} : vector<4x512xf32> to vector<4x2xf32>
    %c0_76 = arith.constant 0 : index
    %c0_77 = arith.constant 0 : index
    %c34 = arith.constant 34 : index
    %148 = vector.load %arg3[%c0_76, %c0_77, %c34] : memref<1x4x512xf32, #tpu.memory_space<vmem>>, vector<1x4x2xf32>
    %149 = vector.shape_cast %148 : vector<1x4x2xf32> to vector<4x2xf32>
    %150 = vector.shape_cast %147 : vector<4x2xf32> to vector<1x4x2xf32>
    tpu.vector_store %arg3[%c0_76, %c0_77, %c34], %150 {strides = array<i32>} : memref<1x4x512xf32, #tpu.memory_space<vmem>>, vector<1x4x2xf32>,
    %151 = vector.extract_strided_slice %2 {offsets = [0, 74], sizes = [4, 2], strides = [1, 1]} : vector<4x512xf32> to vector<4x2xf32>
    %c0_78 = arith.constant 0 : index
    %c0_79 = arith.constant 0 : index
    %c50 = arith.constant 50 : index
    %152 = vector.load %arg3[%c0_78, %c0_79, %c50] : memref<1x4x512xf32, #tpu.memory_space<vmem>>, vector<1x4x2xf32>
    %153 = vector.shape_cast %152 : vector<1x4x2xf32> to vector<4x2xf32>
    %154 = vector.shape_cast %151 : vector<4x2xf32> to vector<1x4x2xf32>
    tpu.vector_store %arg3[%c0_78, %c0_79, %c50], %154 {strides = array<i32>} : memref<1x4x512xf32, #tpu.memory_space<vmem>>, vector<1x4x2xf32>,
    %155 = vector.extract_strided_slice %2 {offsets = [0, 76], sizes = [4, 2], strides = [1, 1]} : vector<4x512xf32> to vector<4x2xf32>
    %c0_80 = arith.constant 0 : index
    %c0_81 = arith.constant 0 : index
    %c290 = arith.constant 290 : index
    %156 = vector.load %arg3[%c0_80, %c0_81, %c290] : memref<1x4x512xf32, #tpu.memory_space<vmem>>, vector<1x4x2xf32>
    %157 = vector.shape_cast %156 : vector<1x4x2xf32> to vector<4x2xf32>
    %158 = vector.shape_cast %155 : vector<4x2xf32> to vector<1x4x2xf32>
    tpu.vector_store %arg3[%c0_80, %c0_81, %c290], %158 {strides = array<i32>} : memref<1x4x512xf32, #tpu.memory_space<vmem>>, vector<1x4x2xf32>,
    %159 = vector.extract_strided_slice %2 {offsets = [0, 78], sizes = [4, 2], strides = [1, 1]} : vector<4x512xf32> to vector<4x2xf32>
    %c0_82 = arith.constant 0 : index
    %c0_83 = arith.constant 0 : index
    %c306 = arith.constant 306 : index
    %160 = vector.load %arg3[%c0_82, %c0_83, %c306] : memref<1x4x512xf32, #tpu.memory_space<vmem>>, vector<1x4x2xf32>
    %161 = vector.shape_cast %160 : vector<1x4x2xf32> to vector<4x2xf32>
    %162 = vector.shape_cast %159 : vector<4x2xf32> to vector<1x4x2xf32>
    tpu.vector_store %arg3[%c0_82, %c0_83, %c306], %162 {strides = array<i32>} : memref<1x4x512xf32, #tpu.memory_space<vmem>>, vector<1x4x2xf32>,
    %163 = vector.extract_strided_slice %2 {offsets = [0, 80], sizes = [4, 2], strides = [1, 1]} : vector<4x512xf32> to vector<4x2xf32>
    %c0_84 = arith.constant 0 : index
    %c0_85 = arith.constant 0 : index
    %c36 = arith.constant 36 : index
    %164 = vector.load %arg3[%c0_84, %c0_85, %c36] : memref<1x4x512xf32, #tpu.memory_space<vmem>>, vector<1x4x2xf32>
    %165 = vector.shape_cast %164 : vector<1x4x2xf32> to vector<4x2xf32>
    %166 = vector.shape_cast %163 : vector<4x2xf32> to vector<1x4x2xf32>
    tpu.vector_store %arg3[%c0_84, %c0_85, %c36], %166 {strides = array<i32>} : memref<1x4x512xf32, #tpu.memory_space<vmem>>, vector<1x4x2xf32>,
    %167 = vector.extract_strided_slice %2 {offsets = [0, 82], sizes = [4, 2], strides = [1, 1]} : vector<4x512xf32> to vector<4x2xf32>
    %c0_86 = arith.constant 0 : index
    %c0_87 = arith.constant 0 : index
    %c52 = arith.constant 52 : index
    %168 = vector.load %arg3[%c0_86, %c0_87, %c52] : memref<1x4x512xf32, #tpu.memory_space<vmem>>, vector<1x4x2xf32>
    %169 = vector.shape_cast %168 : vector<1x4x2xf32> to vector<4x2xf32>
    %170 = vector.shape_cast %167 : vector<4x2xf32> to vector<1x4x2xf32>
    tpu.vector_store %arg3[%c0_86, %c0_87, %c52], %170 {strides = array<i32>} : memref<1x4x512xf32, #tpu.memory_space<vmem>>, vector<1x4x2xf32>,
    %171 = vector.extract_strided_slice %2 {offsets = [0, 84], sizes = [4, 2], strides = [1, 1]} : vector<4x512xf32> to vector<4x2xf32>
    %c0_88 = arith.constant 0 : index
    %c0_89 = arith.constant 0 : index
    %c292 = arith.constant 292 : index
    %172 = vector.load %arg3[%c0_88, %c0_89, %c292] : memref<1x4x512xf32, #tpu.memory_space<vmem>>, vector<1x4x2xf32>
    %173 = vector.shape_cast %172 : vector<1x4x2xf32> to vector<4x2xf32>
    %174 = vector.shape_cast %171 : vector<4x2xf32> to vector<1x4x2xf32>
    tpu.vector_store %arg3[%c0_88, %c0_89, %c292], %174 {strides = array<i32>} : memref<1x4x512xf32, #tpu.memory_space<vmem>>, vector<1x4x2xf32>,
    %175 = vector.extract_strided_slice %2 {offsets = [0, 86], sizes = [4, 2], strides = [1, 1]} : vector<4x512xf32> to vector<4x2xf32>
    %c0_90 = arith.constant 0 : index
    %c0_91 = arith.constant 0 : index
    %c308 = arith.constant 308 : index
    %176 = vector.load %arg3[%c0_90, %c0_91, %c308] : memref<1x4x512xf32, #tpu.memory_space<vmem>>, vector<1x4x2xf32>
    %177 = vector.shape_cast %176 : vector<1x4x2xf32> to vector<4x2xf32>
    %178 = vector.shape_cast %175 : vector<4x2xf32> to vector<1x4x2xf32>
    tpu.vector_store %arg3[%c0_90, %c0_91, %c308], %178 {strides = array<i32>} : memref<1x4x512xf32, #tpu.memory_space<vmem>>, vector<1x4x2xf32>,
    %179 = vector.extract_strided_slice %2 {offsets = [0, 88], sizes = [4, 2], strides = [1, 1]} : vector<4x512xf32> to vector<4x2xf32>
    %c0_92 = arith.constant 0 : index
    %c0_93 = arith.constant 0 : index
    %c38 = arith.constant 38 : index
    %180 = vector.load %arg3[%c0_92, %c0_93, %c38] : memref<1x4x512xf32, #tpu.memory_space<vmem>>, vector<1x4x2xf32>
    %181 = vector.shape_cast %180 : vector<1x4x2xf32> to vector<4x2xf32>
    %182 = vector.shape_cast %179 : vector<4x2xf32> to vector<1x4x2xf32>
    tpu.vector_store %arg3[%c0_92, %c0_93, %c38], %182 {strides = array<i32>} : memref<1x4x512xf32, #tpu.memory_space<vmem>>, vector<1x4x2xf32>,
    %183 = vector.extract_strided_slice %2 {offsets = [0, 90], sizes = [4, 2], strides = [1, 1]} : vector<4x512xf32> to vector<4x2xf32>
    %c0_94 = arith.constant 0 : index
    %c0_95 = arith.constant 0 : index
    %c54 = arith.constant 54 : index
    %184 = vector.load %arg3[%c0_94, %c0_95, %c54] : memref<1x4x512xf32, #tpu.memory_space<vmem>>, vector<1x4x2xf32>
    %185 = vector.shape_cast %184 : vector<1x4x2xf32> to vector<4x2xf32>
    %186 = vector.shape_cast %183 : vector<4x2xf32> to vector<1x4x2xf32>
    tpu.vector_store %arg3[%c0_94, %c0_95, %c54], %186 {strides = array<i32>} : memref<1x4x512xf32, #tpu.memory_space<vmem>>, vector<1x4x2xf32>,
    %187 = vector.extract_strided_slice %2 {offsets = [0, 92], sizes = [4, 2], strides = [1, 1]} : vector<4x512xf32> to vector<4x2xf32>
    %c0_96 = arith.constant 0 : index
    %c0_97 = arith.constant 0 : index
    %c294 = arith.constant 294 : index
    %188 = vector.load %arg3[%c0_96, %c0_97, %c294] : memref<1x4x512xf32, #tpu.memory_space<vmem>>, vector<1x4x2xf32>
    %189 = vector.shape_cast %188 : vector<1x4x2xf32> to vector<4x2xf32>
    %190 = vector.shape_cast %187 : vector<4x2xf32> to vector<1x4x2xf32>
    tpu.vector_store %arg3[%c0_96, %c0_97, %c294], %190 {strides = array<i32>} : memref<1x4x512xf32, #tpu.memory_space<vmem>>, vector<1x4x2xf32>,
    %191 = vector.extract_strided_slice %2 {offsets = [0, 94], sizes = [4, 2], strides = [1, 1]} : vector<4x512xf32> to vector<4x2xf32>
    %c0_98 = arith.constant 0 : index
    %c0_99 = arith.constant 0 : index
    %c310 = arith.constant 310 : index
    %192 = vector.load %arg3[%c0_98, %c0_99, %c310] : memref<1x4x512xf32, #tpu.memory_space<vmem>>, vector<1x4x2xf32>
    %193 = vector.shape_cast %192 : vector<1x4x2xf32> to vector<4x2xf32>
    %194 = vector.shape_cast %191 : vector<4x2xf32> to vector<1x4x2xf32>
    tpu.vector_store %arg3[%c0_98, %c0_99, %c310], %194 {strides = array<i32>} : memref<1x4x512xf32, #tpu.memory_space<vmem>>, vector<1x4x2xf32>,
    %195 = vector.extract_strided_slice %2 {offsets = [0, 96], sizes = [4, 2], strides = [1, 1]} : vector<4x512xf32> to vector<4x2xf32>
    %c0_100 = arith.constant 0 : index
    %c0_101 = arith.constant 0 : index
    %c40 = arith.constant 40 : index
    %196 = vector.load %arg3[%c0_100, %c0_101, %c40] : memref<1x4x512xf32, #tpu.memory_space<vmem>>, vector<1x4x2xf32>
    %197 = vector.shape_cast %196 : vector<1x4x2xf32> to vector<4x2xf32>
    %198 = vector.shape_cast %195 : vector<4x2xf32> to vector<1x4x2xf32>
    tpu.vector_store %arg3[%c0_100, %c0_101, %c40], %198 {strides = array<i32>} : memref<1x4x512xf32, #tpu.memory_space<vmem>>, vector<1x4x2xf32>,
    %199 = vector.extract_strided_slice %2 {offsets = [0, 98], sizes = [4, 2], strides = [1, 1]} : vector<4x512xf32> to vector<4x2xf32>
    %c0_102 = arith.constant 0 : index
    %c0_103 = arith.constant 0 : index
    %c56 = arith.constant 56 : index
    %200 = vector.load %arg3[%c0_102, %c0_103, %c56] : memref<1x4x512xf32, #tpu.memory_space<vmem>>, vector<1x4x2xf32>
    %201 = vector.shape_cast %200 : vector<1x4x2xf32> to vector<4x2xf32>
    %202 = vector.shape_cast %199 : vector<4x2xf32> to vector<1x4x2xf32>
    tpu.vector_store %arg3[%c0_102, %c0_103, %c56], %202 {strides = array<i32>} : memref<1x4x512xf32, #tpu.memory_space<vmem>>, vector<1x4x2xf32>,
    %203 = vector.extract_strided_slice %2 {offsets = [0, 100], sizes = [4, 2], strides = [1, 1]} : vector<4x512xf32> to vector<4x2xf32>
    %c0_104 = arith.constant 0 : index
    %c0_105 = arith.constant 0 : index
    %c296 = arith.constant 296 : index
    %204 = vector.load %arg3[%c0_104, %c0_105, %c296] : memref<1x4x512xf32, #tpu.memory_space<vmem>>, vector<1x4x2xf32>
    %205 = vector.shape_cast %204 : vector<1x4x2xf32> to vector<4x2xf32>
    %206 = vector.shape_cast %203 : vector<4x2xf32> to vector<1x4x2xf32>
    tpu.vector_store %arg3[%c0_104, %c0_105, %c296], %206 {strides = array<i32>} : memref<1x4x512xf32, #tpu.memory_space<vmem>>, vector<1x4x2xf32>,
    %207 = vector.extract_strided_slice %2 {offsets = [0, 102], sizes = [4, 2], strides = [1, 1]} : vector<4x512xf32> to vector<4x2xf32>
    %c0_106 = arith.constant 0 : index
    %c0_107 = arith.constant 0 : index
    %c312 = arith.constant 312 : index
    %208 = vector.load %arg3[%c0_106, %c0_107, %c312] : memref<1x4x512xf32, #tpu.memory_space<vmem>>, vector<1x4x2xf32>
    %209 = vector.shape_cast %208 : vector<1x4x2xf32> to vector<4x2xf32>
    %210 = vector.shape_cast %207 : vector<4x2xf32> to vector<1x4x2xf32>
    tpu.vector_store %arg3[%c0_106, %c0_107, %c312], %210 {strides = array<i32>} : memref<1x4x512xf32, #tpu.memory_space<vmem>>, vector<1x4x2xf32>,
    %211 = vector.extract_strided_slice %2 {offsets = [0, 104], sizes = [4, 2], strides = [1, 1]} : vector<4x512xf32> to vector<4x2xf32>
    %c0_108 = arith.constant 0 : index
    %c0_109 = arith.constant 0 : index
    %c42 = arith.constant 42 : index
    %212 = vector.load %arg3[%c0_108, %c0_109, %c42] : memref<1x4x512xf32, #tpu.memory_space<vmem>>, vector<1x4x2xf32>
    %213 = vector.shape_cast %212 : vector<1x4x2xf32> to vector<4x2xf32>
    %214 = vector.shape_cast %211 : vector<4x2xf32> to vector<1x4x2xf32>
    tpu.vector_store %arg3[%c0_108, %c0_109, %c42], %214 {strides = array<i32>} : memref<1x4x512xf32, #tpu.memory_space<vmem>>, vector<1x4x2xf32>,
    %215 = vector.extract_strided_slice %2 {offsets = [0, 106], sizes = [4, 2], strides = [1, 1]} : vector<4x512xf32> to vector<4x2xf32>
    %c0_110 = arith.constant 0 : index
    %c0_111 = arith.constant 0 : index
    %c58 = arith.constant 58 : index
    %216 = vector.load %arg3[%c0_110, %c0_111, %c58] : memref<1x4x512xf32, #tpu.memory_space<vmem>>, vector<1x4x2xf32>
    %217 = vector.shape_cast %216 : vector<1x4x2xf32> to vector<4x2xf32>
    %218 = vector.shape_cast %215 : vector<4x2xf32> to vector<1x4x2xf32>
    tpu.vector_store %arg3[%c0_110, %c0_111, %c58], %218 {strides = array<i32>} : memref<1x4x512xf32, #tpu.memory_space<vmem>>, vector<1x4x2xf32>,
    %219 = vector.extract_strided_slice %2 {offsets = [0, 108], sizes = [4, 2], strides = [1, 1]} : vector<4x512xf32> to vector<4x2xf32>
    %c0_112 = arith.constant 0 : index
    %c0_113 = arith.constant 0 : index
    %c298 = arith.constant 298 : index
    %220 = vector.load %arg3[%c0_112, %c0_113, %c298] : memref<1x4x512xf32, #tpu.memory_space<vmem>>, vector<1x4x2xf32>
    %221 = vector.shape_cast %220 : vector<1x4x2xf32> to vector<4x2xf32>
    %222 = vector.shape_cast %219 : vector<4x2xf32> to vector<1x4x2xf32>
    tpu.vector_store %arg3[%c0_112, %c0_113, %c298], %222 {strides = array<i32>} : memref<1x4x512xf32, #tpu.memory_space<vmem>>, vector<1x4x2xf32>,
    %223 = vector.extract_strided_slice %2 {offsets = [0, 110], sizes = [4, 2], strides = [1, 1]} : vector<4x512xf32> to vector<4x2xf32>
    %c0_114 = arith.constant 0 : index
    %c0_115 = arith.constant 0 : index
    %c314 = arith.constant 314 : index
    %224 = vector.load %arg3[%c0_114, %c0_115, %c314] : memref<1x4x512xf32, #tpu.memory_space<vmem>>, vector<1x4x2xf32>
    %225 = vector.shape_cast %224 : vector<1x4x2xf32> to vector<4x2xf32>
    %226 = vector.shape_cast %223 : vector<4x2xf32> to vector<1x4x2xf32>
    tpu.vector_store %arg3[%c0_114, %c0_115, %c314], %226 {strides = array<i32>} : memref<1x4x512xf32, #tpu.memory_space<vmem>>, vector<1x4x2xf32>,
    %227 = vector.extract_strided_slice %2 {offsets = [0, 112], sizes = [4, 2], strides = [1, 1]} : vector<4x512xf32> to vector<4x2xf32>
    %c0_116 = arith.constant 0 : index
    %c0_117 = arith.constant 0 : index
    %c44 = arith.constant 44 : index
    %228 = vector.load %arg3[%c0_116, %c0_117, %c44] : memref<1x4x512xf32, #tpu.memory_space<vmem>>, vector<1x4x2xf32>
    %229 = vector.shape_cast %228 : vector<1x4x2xf32> to vector<4x2xf32>
    %230 = vector.shape_cast %227 : vector<4x2xf32> to vector<1x4x2xf32>
    tpu.vector_store %arg3[%c0_116, %c0_117, %c44], %230 {strides = array<i32>} : memref<1x4x512xf32, #tpu.memory_space<vmem>>, vector<1x4x2xf32>,
    %231 = vector.extract_strided_slice %2 {offsets = [0, 114], sizes = [4, 2], strides = [1, 1]} : vector<4x512xf32> to vector<4x2xf32>
    %c0_118 = arith.constant 0 : index
    %c0_119 = arith.constant 0 : index
    %c60 = arith.constant 60 : index
    %232 = vector.load %arg3[%c0_118, %c0_119, %c60] : memref<1x4x512xf32, #tpu.memory_space<vmem>>, vector<1x4x2xf32>
    %233 = vector.shape_cast %232 : vector<1x4x2xf32> to vector<4x2xf32>
    %234 = vector.shape_cast %231 : vector<4x2xf32> to vector<1x4x2xf32>
    tpu.vector_store %arg3[%c0_118, %c0_119, %c60], %234 {strides = array<i32>} : memref<1x4x512xf32, #tpu.memory_space<vmem>>, vector<1x4x2xf32>,
    %235 = vector.extract_strided_slice %2 {offsets = [0, 116], sizes = [4, 2], strides = [1, 1]} : vector<4x512xf32> to vector<4x2xf32>
    %c0_120 = arith.constant 0 : index
    %c0_121 = arith.constant 0 : index
    %c300 = arith.constant 300 : index
    %236 = vector.load %arg3[%c0_120, %c0_121, %c300] : memref<1x4x512xf32, #tpu.memory_space<vmem>>, vector<1x4x2xf32>
    %237 = vector.shape_cast %236 : vector<1x4x2xf32> to vector<4x2xf32>
    %238 = vector.shape_cast %235 : vector<4x2xf32> to vector<1x4x2xf32>
    tpu.vector_store %arg3[%c0_120, %c0_121, %c300], %238 {strides = array<i32>} : memref<1x4x512xf32, #tpu.memory_space<vmem>>, vector<1x4x2xf32>,
    %239 = vector.extract_strided_slice %2 {offsets = [0, 118], sizes = [4, 2], strides = [1, 1]} : vector<4x512xf32> to vector<4x2xf32>
    %c0_122 = arith.constant 0 : index
    %c0_123 = arith.constant 0 : index
    %c316 = arith.constant 316 : index
    %240 = vector.load %arg3[%c0_122, %c0_123, %c316] : memref<1x4x512xf32, #tpu.memory_space<vmem>>, vector<1x4x2xf32>
    %241 = vector.shape_cast %240 : vector<1x4x2xf32> to vector<4x2xf32>
    %242 = vector.shape_cast %239 : vector<4x2xf32> to vector<1x4x2xf32>
    tpu.vector_store %arg3[%c0_122, %c0_123, %c316], %242 {strides = array<i32>} : memref<1x4x512xf32, #tpu.memory_space<vmem>>, vector<1x4x2xf32>,
    %243 = vector.extract_strided_slice %2 {offsets = [0, 120], sizes = [4, 2], strides = [1, 1]} : vector<4x512xf32> to vector<4x2xf32>
    %c0_124 = arith.constant 0 : index
    %c0_125 = arith.constant 0 : index
    %c46 = arith.constant 46 : index
    %244 = vector.load %arg3[%c0_124, %c0_125, %c46] : memref<1x4x512xf32, #tpu.memory_space<vmem>>, vector<1x4x2xf32>
    %245 = vector.shape_cast %244 : vector<1x4x2xf32> to vector<4x2xf32>
    %246 = vector.shape_cast %243 : vector<4x2xf32> to vector<1x4x2xf32>
    tpu.vector_store %arg3[%c0_124, %c0_125, %c46], %246 {strides = array<i32>} : memref<1x4x512xf32, #tpu.memory_space<vmem>>, vector<1x4x2xf32>,
    %247 = vector.extract_strided_slice %2 {offsets = [0, 122], sizes = [4, 2], strides = [1, 1]} : vector<4x512xf32> to vector<4x2xf32>
    %c0_126 = arith.constant 0 : index
    %c0_127 = arith.constant 0 : index
    %c62 = arith.constant 62 : index
    %248 = vector.load %arg3[%c0_126, %c0_127, %c62] : memref<1x4x512xf32, #tpu.memory_space<vmem>>, vector<1x4x2xf32>
    %249 = vector.shape_cast %248 : vector<1x4x2xf32> to vector<4x2xf32>
    %250 = vector.shape_cast %247 : vector<4x2xf32> to vector<1x4x2xf32>
    tpu.vector_store %arg3[%c0_126, %c0_127, %c62], %250 {strides = array<i32>} : memref<1x4x512xf32, #tpu.memory_space<vmem>>, vector<1x4x2xf32>,
    %251 = vector.extract_strided_slice %2 {offsets = [0, 124], sizes = [4, 2], strides = [1, 1]} : vector<4x512xf32> to vector<4x2xf32>
    %c0_128 = arith.constant 0 : index
    %c0_129 = arith.constant 0 : index
    %c302 = arith.constant 302 : index
    %252 = vector.load %arg3[%c0_128, %c0_129, %c302] : memref<1x4x512xf32, #tpu.memory_space<vmem>>, vector<1x4x2xf32>
    %253 = vector.shape_cast %252 : vector<1x4x2xf32> to vector<4x2xf32>
    %254 = vector.shape_cast %251 : vector<4x2xf32> to vector<1x4x2xf32>
    tpu.vector_store %arg3[%c0_128, %c0_129, %c302], %254 {strides = array<i32>} : memref<1x4x512xf32, #tpu.memory_space<vmem>>, vector<1x4x2xf32>,
    %255 = vector.extract_strided_slice %2 {offsets = [0, 126], sizes = [4, 2], strides = [1, 1]} : vector<4x512xf32> to vector<4x2xf32>
    %c0_130 = arith.constant 0 : index
    %c0_131 = arith.constant 0 : index
    %c318 = arith.constant 318 : index
    %256 = vector.load %arg3[%c0_130, %c0_131, %c318] : memref<1x4x512xf32, #tpu.memory_space<vmem>>, vector<1x4x2xf32>
    %257 = vector.shape_cast %256 : vector<1x4x2xf32> to vector<4x2xf32>
    %258 = vector.shape_cast %255 : vector<4x2xf32> to vector<1x4x2xf32>
    tpu.vector_store %arg3[%c0_130, %c0_131, %c318], %258 {strides = array<i32>} : memref<1x4x512xf32, #tpu.memory_space<vmem>>, vector<1x4x2xf32>,
    %259 = vector.extract_strided_slice %2 {offsets = [0, 128], sizes = [4, 2], strides = [1, 1]} : vector<4x512xf32> to vector<4x2xf32>
    %c0_132 = arith.constant 0 : index
    %c0_133 = arith.constant 0 : index
    %c64 = arith.constant 64 : index
    %260 = vector.load %arg3[%c0_132, %c0_133, %c64] : memref<1x4x512xf32, #tpu.memory_space<vmem>>, vector<1x4x2xf32>
    %261 = vector.shape_cast %260 : vector<1x4x2xf32> to vector<4x2xf32>
    %262 = vector.shape_cast %259 : vector<4x2xf32> to vector<1x4x2xf32>
    tpu.vector_store %arg3[%c0_132, %c0_133, %c64], %262 {strides = array<i32>} : memref<1x4x512xf32, #tpu.memory_space<vmem>>, vector<1x4x2xf32>,
    %263 = vector.extract_strided_slice %2 {offsets = [0, 130], sizes = [4, 2], strides = [1, 1]} : vector<4x512xf32> to vector<4x2xf32>
    %c0_134 = arith.constant 0 : index
    %c0_135 = arith.constant 0 : index
    %c80 = arith.constant 80 : index
    %264 = vector.load %arg3[%c0_134, %c0_135, %c80] : memref<1x4x512xf32, #tpu.memory_space<vmem>>, vector<1x4x2xf32>
    %265 = vector.shape_cast %264 : vector<1x4x2xf32> to vector<4x2xf32>
    %266 = vector.shape_cast %263 : vector<4x2xf32> to vector<1x4x2xf32>
    tpu.vector_store %arg3[%c0_134, %c0_135, %c80], %266 {strides = array<i32>} : memref<1x4x512xf32, #tpu.memory_space<vmem>>, vector<1x4x2xf32>,
    %267 = vector.extract_strided_slice %2 {offsets = [0, 132], sizes = [4, 2], strides = [1, 1]} : vector<4x512xf32> to vector<4x2xf32>
    %c0_136 = arith.constant 0 : index
    %c0_137 = arith.constant 0 : index
    %c320 = arith.constant 320 : index
    %268 = vector.load %arg3[%c0_136, %c0_137, %c320] : memref<1x4x512xf32, #tpu.memory_space<vmem>>, vector<1x4x2xf32>
    %269 = vector.shape_cast %268 : vector<1x4x2xf32> to vector<4x2xf32>
    %270 = vector.shape_cast %267 : vector<4x2xf32> to vector<1x4x2xf32>
    tpu.vector_store %arg3[%c0_136, %c0_137, %c320], %270 {strides = array<i32>} : memref<1x4x512xf32, #tpu.memory_space<vmem>>, vector<1x4x2xf32>,
    %271 = vector.extract_strided_slice %2 {offsets = [0, 134], sizes = [4, 2], strides = [1, 1]} : vector<4x512xf32> to vector<4x2xf32>
    %c0_138 = arith.constant 0 : index
    %c0_139 = arith.constant 0 : index
    %c336 = arith.constant 336 : index
    %272 = vector.load %arg3[%c0_138, %c0_139, %c336] : memref<1x4x512xf32, #tpu.memory_space<vmem>>, vector<1x4x2xf32>
    %273 = vector.shape_cast %272 : vector<1x4x2xf32> to vector<4x2xf32>
    %274 = vector.shape_cast %271 : vector<4x2xf32> to vector<1x4x2xf32>
    tpu.vector_store %arg3[%c0_138, %c0_139, %c336], %274 {strides = array<i32>} : memref<1x4x512xf32, #tpu.memory_space<vmem>>, vector<1x4x2xf32>,
    %275 = vector.extract_strided_slice %2 {offsets = [0, 136], sizes = [4, 2], strides = [1, 1]} : vector<4x512xf32> to vector<4x2xf32>
    %c0_140 = arith.constant 0 : index
    %c0_141 = arith.constant 0 : index
    %c66 = arith.constant 66 : index
    %276 = vector.load %arg3[%c0_140, %c0_141, %c66] : memref<1x4x512xf32, #tpu.memory_space<vmem>>, vector<1x4x2xf32>
    %277 = vector.shape_cast %276 : vector<1x4x2xf32> to vector<4x2xf32>
    %278 = vector.shape_cast %275 : vector<4x2xf32> to vector<1x4x2xf32>
    tpu.vector_store %arg3[%c0_140, %c0_141, %c66], %278 {strides = array<i32>} : memref<1x4x512xf32, #tpu.memory_space<vmem>>, vector<1x4x2xf32>,
    %279 = vector.extract_strided_slice %2 {offsets = [0, 138], sizes = [4, 2], strides = [1, 1]} : vector<4x512xf32> to vector<4x2xf32>
    %c0_142 = arith.constant 0 : index
    %c0_143 = arith.constant 0 : index
    %c82 = arith.constant 82 : index
    %280 = vector.load %arg3[%c0_142, %c0_143, %c82] : memref<1x4x512xf32, #tpu.memory_space<vmem>>, vector<1x4x2xf32>
    %281 = vector.shape_cast %280 : vector<1x4x2xf32> to vector<4x2xf32>
    %282 = vector.shape_cast %279 : vector<4x2xf32> to vector<1x4x2xf32>
    tpu.vector_store %arg3[%c0_142, %c0_143, %c82], %282 {strides = array<i32>} : memref<1x4x512xf32, #tpu.memory_space<vmem>>, vector<1x4x2xf32>,
    %283 = vector.extract_strided_slice %2 {offsets = [0, 140], sizes = [4, 2], strides = [1, 1]} : vector<4x512xf32> to vector<4x2xf32>
    %c0_144 = arith.constant 0 : index
    %c0_145 = arith.constant 0 : index
    %c322 = arith.constant 322 : index
    %284 = vector.load %arg3[%c0_144, %c0_145, %c322] : memref<1x4x512xf32, #tpu.memory_space<vmem>>, vector<1x4x2xf32>
    %285 = vector.shape_cast %284 : vector<1x4x2xf32> to vector<4x2xf32>
    %286 = vector.shape_cast %283 : vector<4x2xf32> to vector<1x4x2xf32>
    tpu.vector_store %arg3[%c0_144, %c0_145, %c322], %286 {strides = array<i32>} : memref<1x4x512xf32, #tpu.memory_space<vmem>>, vector<1x4x2xf32>,
    %287 = vector.extract_strided_slice %2 {offsets = [0, 142], sizes = [4, 2], strides = [1, 1]} : vector<4x512xf32> to vector<4x2xf32>
    %c0_146 = arith.constant 0 : index
    %c0_147 = arith.constant 0 : index
    %c338 = arith.constant 338 : index
    %288 = vector.load %arg3[%c0_146, %c0_147, %c338] : memref<1x4x512xf32, #tpu.memory_space<vmem>>, vector<1x4x2xf32>
    %289 = vector.shape_cast %288 : vector<1x4x2xf32> to vector<4x2xf32>
    %290 = vector.shape_cast %287 : vector<4x2xf32> to vector<1x4x2xf32>
    tpu.vector_store %arg3[%c0_146, %c0_147, %c338], %290 {strides = array<i32>} : memref<1x4x512xf32, #tpu.memory_space<vmem>>, vector<1x4x2xf32>,
    %291 = vector.extract_strided_slice %2 {offsets = [0, 144], sizes = [4, 2], strides = [1, 1]} : vector<4x512xf32> to vector<4x2xf32>
    %c0_148 = arith.constant 0 : index
    %c0_149 = arith.constant 0 : index
    %c68 = arith.constant 68 : index
    %292 = vector.load %arg3[%c0_148, %c0_149, %c68] : memref<1x4x512xf32, #tpu.memory_space<vmem>>, vector<1x4x2xf32>
    %293 = vector.shape_cast %292 : vector<1x4x2xf32> to vector<4x2xf32>
    %294 = vector.shape_cast %291 : vector<4x2xf32> to vector<1x4x2xf32>
    tpu.vector_store %arg3[%c0_148, %c0_149, %c68], %294 {strides = array<i32>} : memref<1x4x512xf32, #tpu.memory_space<vmem>>, vector<1x4x2xf32>,
    %295 = vector.extract_strided_slice %2 {offsets = [0, 146], sizes = [4, 2], strides = [1, 1]} : vector<4x512xf32> to vector<4x2xf32>
    %c0_150 = arith.constant 0 : index
    %c0_151 = arith.constant 0 : index
    %c84 = arith.constant 84 : index
    %296 = vector.load %arg3[%c0_150, %c0_151, %c84] : memref<1x4x512xf32, #tpu.memory_space<vmem>>, vector<1x4x2xf32>
    %297 = vector.shape_cast %296 : vector<1x4x2xf32> to vector<4x2xf32>
    %298 = vector.shape_cast %295 : vector<4x2xf32> to vector<1x4x2xf32>
    tpu.vector_store %arg3[%c0_150, %c0_151, %c84], %298 {strides = array<i32>} : memref<1x4x512xf32, #tpu.memory_space<vmem>>, vector<1x4x2xf32>,
    %299 = vector.extract_strided_slice %2 {offsets = [0, 148], sizes = [4, 2], strides = [1, 1]} : vector<4x512xf32> to vector<4x2xf32>
    %c0_152 = arith.constant 0 : index
    %c0_153 = arith.constant 0 : index
    %c324 = arith.constant 324 : index
    %300 = vector.load %arg3[%c0_152, %c0_153, %c324] : memref<1x4x512xf32, #tpu.memory_space<vmem>>, vector<1x4x2xf32>
    %301 = vector.shape_cast %300 : vector<1x4x2xf32> to vector<4x2xf32>
    %302 = vector.shape_cast %299 : vector<4x2xf32> to vector<1x4x2xf32>
    tpu.vector_store %arg3[%c0_152, %c0_153, %c324], %302 {strides = array<i32>} : memref<1x4x512xf32, #tpu.memory_space<vmem>>, vector<1x4x2xf32>,
    %303 = vector.extract_strided_slice %2 {offsets = [0, 150], sizes = [4, 2], strides = [1, 1]} : vector<4x512xf32> to vector<4x2xf32>
    %c0_154 = arith.constant 0 : index
    %c0_155 = arith.constant 0 : index
    %c340 = arith.constant 340 : index
    %304 = vector.load %arg3[%c0_154, %c0_155, %c340] : memref<1x4x512xf32, #tpu.memory_space<vmem>>, vector<1x4x2xf32>
    %305 = vector.shape_cast %304 : vector<1x4x2xf32> to vector<4x2xf32>
    %306 = vector.shape_cast %303 : vector<4x2xf32> to vector<1x4x2xf32>
    tpu.vector_store %arg3[%c0_154, %c0_155, %c340], %306 {strides = array<i32>} : memref<1x4x512xf32, #tpu.memory_space<vmem>>, vector<1x4x2xf32>,
    %307 = vector.extract_strided_slice %2 {offsets = [0, 152], sizes = [4, 2], strides = [1, 1]} : vector<4x512xf32> to vector<4x2xf32>
    %c0_156 = arith.constant 0 : index
    %c0_157 = arith.constant 0 : index
    %c70 = arith.constant 70 : index
    %308 = vector.load %arg3[%c0_156, %c0_157, %c70] : memref<1x4x512xf32, #tpu.memory_space<vmem>>, vector<1x4x2xf32>
    %309 = vector.shape_cast %308 : vector<1x4x2xf32> to vector<4x2xf32>
    %310 = vector.shape_cast %307 : vector<4x2xf32> to vector<1x4x2xf32>
    tpu.vector_store %arg3[%c0_156, %c0_157, %c70], %310 {strides = array<i32>} : memref<1x4x512xf32, #tpu.memory_space<vmem>>, vector<1x4x2xf32>,
    %311 = vector.extract_strided_slice %2 {offsets = [0, 154], sizes = [4, 2], strides = [1, 1]} : vector<4x512xf32> to vector<4x2xf32>
    %c0_158 = arith.constant 0 : index
    %c0_159 = arith.constant 0 : index
    %c86 = arith.constant 86 : index
    %312 = vector.load %arg3[%c0_158, %c0_159, %c86] : memref<1x4x512xf32, #tpu.memory_space<vmem>>, vector<1x4x2xf32>
    %313 = vector.shape_cast %312 : vector<1x4x2xf32> to vector<4x2xf32>
    %314 = vector.shape_cast %311 : vector<4x2xf32> to vector<1x4x2xf32>
    tpu.vector_store %arg3[%c0_158, %c0_159, %c86], %314 {strides = array<i32>} : memref<1x4x512xf32, #tpu.memory_space<vmem>>, vector<1x4x2xf32>,
    %315 = vector.extract_strided_slice %2 {offsets = [0, 156], sizes = [4, 2], strides = [1, 1]} : vector<4x512xf32> to vector<4x2xf32>
    %c0_160 = arith.constant 0 : index
    %c0_161 = arith.constant 0 : index
    %c326 = arith.constant 326 : index
    %316 = vector.load %arg3[%c0_160, %c0_161, %c326] : memref<1x4x512xf32, #tpu.memory_space<vmem>>, vector<1x4x2xf32>
    %317 = vector.shape_cast %316 : vector<1x4x2xf32> to vector<4x2xf32>
    %318 = vector.shape_cast %315 : vector<4x2xf32> to vector<1x4x2xf32>
    tpu.vector_store %arg3[%c0_160, %c0_161, %c326], %318 {strides = array<i32>} : memref<1x4x512xf32, #tpu.memory_space<vmem>>, vector<1x4x2xf32>,
    %319 = vector.extract_strided_slice %2 {offsets = [0, 158], sizes = [4, 2], strides = [1, 1]} : vector<4x512xf32> to vector<4x2xf32>
    %c0_162 = arith.constant 0 : index
    %c0_163 = arith.constant 0 : index
    %c342 = arith.constant 342 : index
    %320 = vector.load %arg3[%c0_162, %c0_163, %c342] : memref<1x4x512xf32, #tpu.memory_space<vmem>>, vector<1x4x2xf32>
    %321 = vector.shape_cast %320 : vector<1x4x2xf32> to vector<4x2xf32>
    %322 = vector.shape_cast %319 : vector<4x2xf32> to vector<1x4x2xf32>
    tpu.vector_store %arg3[%c0_162, %c0_163, %c342], %322 {strides = array<i32>} : memref<1x4x512xf32, #tpu.memory_space<vmem>>, vector<1x4x2xf32>,
    %323 = vector.extract_strided_slice %2 {offsets = [0, 160], sizes = [4, 2], strides = [1, 1]} : vector<4x512xf32> to vector<4x2xf32>
    %c0_164 = arith.constant 0 : index
    %c0_165 = arith.constant 0 : index
    %c72 = arith.constant 72 : index
    %324 = vector.load %arg3[%c0_164, %c0_165, %c72] : memref<1x4x512xf32, #tpu.memory_space<vmem>>, vector<1x4x2xf32>
    %325 = vector.shape_cast %324 : vector<1x4x2xf32> to vector<4x2xf32>
    %326 = vector.shape_cast %323 : vector<4x2xf32> to vector<1x4x2xf32>
    tpu.vector_store %arg3[%c0_164, %c0_165, %c72], %326 {strides = array<i32>} : memref<1x4x512xf32, #tpu.memory_space<vmem>>, vector<1x4x2xf32>,
    %327 = vector.extract_strided_slice %2 {offsets = [0, 162], sizes = [4, 2], strides = [1, 1]} : vector<4x512xf32> to vector<4x2xf32>
    %c0_166 = arith.constant 0 : index
    %c0_167 = arith.constant 0 : index
    %c88 = arith.constant 88 : index
    %328 = vector.load %arg3[%c0_166, %c0_167, %c88] : memref<1x4x512xf32, #tpu.memory_space<vmem>>, vector<1x4x2xf32>
    %329 = vector.shape_cast %328 : vector<1x4x2xf32> to vector<4x2xf32>
    %330 = vector.shape_cast %327 : vector<4x2xf32> to vector<1x4x2xf32>
    tpu.vector_store %arg3[%c0_166, %c0_167, %c88], %330 {strides = array<i32>} : memref<1x4x512xf32, #tpu.memory_space<vmem>>, vector<1x4x2xf32>,
    %331 = vector.extract_strided_slice %2 {offsets = [0, 164], sizes = [4, 2], strides = [1, 1]} : vector<4x512xf32> to vector<4x2xf32>
    %c0_168 = arith.constant 0 : index
    %c0_169 = arith.constant 0 : index
    %c328 = arith.constant 328 : index
    %332 = vector.load %arg3[%c0_168, %c0_169, %c328] : memref<1x4x512xf32, #tpu.memory_space<vmem>>, vector<1x4x2xf32>
    %333 = vector.shape_cast %332 : vector<1x4x2xf32> to vector<4x2xf32>
    %334 = vector.shape_cast %331 : vector<4x2xf32> to vector<1x4x2xf32>
    tpu.vector_store %arg3[%c0_168, %c0_169, %c328], %334 {strides = array<i32>} : memref<1x4x512xf32, #tpu.memory_space<vmem>>, vector<1x4x2xf32>,
    %335 = vector.extract_strided_slice %2 {offsets = [0, 166], sizes = [4, 2], strides = [1, 1]} : vector<4x512xf32> to vector<4x2xf32>
    %c0_170 = arith.constant 0 : index
    %c0_171 = arith.constant 0 : index
    %c344 = arith.constant 344 : index
    %336 = vector.load %arg3[%c0_170, %c0_171, %c344] : memref<1x4x512xf32, #tpu.memory_space<vmem>>, vector<1x4x2xf32>
    %337 = vector.shape_cast %336 : vector<1x4x2xf32> to vector<4x2xf32>
    %338 = vector.shape_cast %335 : vector<4x2xf32> to vector<1x4x2xf32>
    tpu.vector_store %arg3[%c0_170, %c0_171, %c344], %338 {strides = array<i32>} : memref<1x4x512xf32, #tpu.memory_space<vmem>>, vector<1x4x2xf32>,
    %339 = vector.extract_strided_slice %2 {offsets = [0, 168], sizes = [4, 2], strides = [1, 1]} : vector<4x512xf32> to vector<4x2xf32>
    %c0_172 = arith.constant 0 : index
    %c0_173 = arith.constant 0 : index
    %c74 = arith.constant 74 : index
    %340 = vector.load %arg3[%c0_172, %c0_173, %c74] : memref<1x4x512xf32, #tpu.memory_space<vmem>>, vector<1x4x2xf32>
    %341 = vector.shape_cast %340 : vector<1x4x2xf32> to vector<4x2xf32>
    %342 = vector.shape_cast %339 : vector<4x2xf32> to vector<1x4x2xf32>
    tpu.vector_store %arg3[%c0_172, %c0_173, %c74], %342 {strides = array<i32>} : memref<1x4x512xf32, #tpu.memory_space<vmem>>, vector<1x4x2xf32>,
    %343 = vector.extract_strided_slice %2 {offsets = [0, 170], sizes = [4, 2], strides = [1, 1]} : vector<4x512xf32> to vector<4x2xf32>
    %c0_174 = arith.constant 0 : index
    %c0_175 = arith.constant 0 : index
    %c90 = arith.constant 90 : index
    %344 = vector.load %arg3[%c0_174, %c0_175, %c90] : memref<1x4x512xf32, #tpu.memory_space<vmem>>, vector<1x4x2xf32>
    %345 = vector.shape_cast %344 : vector<1x4x2xf32> to vector<4x2xf32>
    %346 = vector.shape_cast %343 : vector<4x2xf32> to vector<1x4x2xf32>
    tpu.vector_store %arg3[%c0_174, %c0_175, %c90], %346 {strides = array<i32>} : memref<1x4x512xf32, #tpu.memory_space<vmem>>, vector<1x4x2xf32>,
    %347 = vector.extract_strided_slice %2 {offsets = [0, 172], sizes = [4, 2], strides = [1, 1]} : vector<4x512xf32> to vector<4x2xf32>
    %c0_176 = arith.constant 0 : index
    %c0_177 = arith.constant 0 : index
    %c330 = arith.constant 330 : index
    %348 = vector.load %arg3[%c0_176, %c0_177, %c330] : memref<1x4x512xf32, #tpu.memory_space<vmem>>, vector<1x4x2xf32>
    %349 = vector.shape_cast %348 : vector<1x4x2xf32> to vector<4x2xf32>
    %350 = vector.shape_cast %347 : vector<4x2xf32> to vector<1x4x2xf32>
    tpu.vector_store %arg3[%c0_176, %c0_177, %c330], %350 {strides = array<i32>} : memref<1x4x512xf32, #tpu.memory_space<vmem>>, vector<1x4x2xf32>,
    %351 = vector.extract_strided_slice %2 {offsets = [0, 174], sizes = [4, 2], strides = [1, 1]} : vector<4x512xf32> to vector<4x2xf32>
    %c0_178 = arith.constant 0 : index
    %c0_179 = arith.constant 0 : index
    %c346 = arith.constant 346 : index
    %352 = vector.load %arg3[%c0_178, %c0_179, %c346] : memref<1x4x512xf32, #tpu.memory_space<vmem>>, vector<1x4x2xf32>
    %353 = vector.shape_cast %352 : vector<1x4x2xf32> to vector<4x2xf32>
    %354 = vector.shape_cast %351 : vector<4x2xf32> to vector<1x4x2xf32>
    tpu.vector_store %arg3[%c0_178, %c0_179, %c346], %354 {strides = array<i32>} : memref<1x4x512xf32, #tpu.memory_space<vmem>>, vector<1x4x2xf32>,
    %355 = vector.extract_strided_slice %2 {offsets = [0, 176], sizes = [4, 2], strides = [1, 1]} : vector<4x512xf32> to vector<4x2xf32>
    %c0_180 = arith.constant 0 : index
    %c0_181 = arith.constant 0 : index
    %c76 = arith.constant 76 : index
    %356 = vector.load %arg3[%c0_180, %c0_181, %c76] : memref<1x4x512xf32, #tpu.memory_space<vmem>>, vector<1x4x2xf32>
    %357 = vector.shape_cast %356 : vector<1x4x2xf32> to vector<4x2xf32>
    %358 = vector.shape_cast %355 : vector<4x2xf32> to vector<1x4x2xf32>
    tpu.vector_store %arg3[%c0_180, %c0_181, %c76], %358 {strides = array<i32>} : memref<1x4x512xf32, #tpu.memory_space<vmem>>, vector<1x4x2xf32>,
    %359 = vector.extract_strided_slice %2 {offsets = [0, 178], sizes = [4, 2], strides = [1, 1]} : vector<4x512xf32> to vector<4x2xf32>
    %c0_182 = arith.constant 0 : index
    %c0_183 = arith.constant 0 : index
    %c92 = arith.constant 92 : index
    %360 = vector.load %arg3[%c0_182, %c0_183, %c92] : memref<1x4x512xf32, #tpu.memory_space<vmem>>, vector<1x4x2xf32>
    %361 = vector.shape_cast %360 : vector<1x4x2xf32> to vector<4x2xf32>
    %362 = vector.shape_cast %359 : vector<4x2xf32> to vector<1x4x2xf32>
    tpu.vector_store %arg3[%c0_182, %c0_183, %c92], %362 {strides = array<i32>} : memref<1x4x512xf32, #tpu.memory_space<vmem>>, vector<1x4x2xf32>,
    %363 = vector.extract_strided_slice %2 {offsets = [0, 180], sizes = [4, 2], strides = [1, 1]} : vector<4x512xf32> to vector<4x2xf32>
    %c0_184 = arith.constant 0 : index
    %c0_185 = arith.constant 0 : index
    %c332 = arith.constant 332 : index
    %364 = vector.load %arg3[%c0_184, %c0_185, %c332] : memref<1x4x512xf32, #tpu.memory_space<vmem>>, vector<1x4x2xf32>
    %365 = vector.shape_cast %364 : vector<1x4x2xf32> to vector<4x2xf32>
    %366 = vector.shape_cast %363 : vector<4x2xf32> to vector<1x4x2xf32>
    tpu.vector_store %arg3[%c0_184, %c0_185, %c332], %366 {strides = array<i32>} : memref<1x4x512xf32, #tpu.memory_space<vmem>>, vector<1x4x2xf32>,
    %367 = vector.extract_strided_slice %2 {offsets = [0, 182], sizes = [4, 2], strides = [1, 1]} : vector<4x512xf32> to vector<4x2xf32>
    %c0_186 = arith.constant 0 : index
    %c0_187 = arith.constant 0 : index
    %c348 = arith.constant 348 : index
    %368 = vector.load %arg3[%c0_186, %c0_187, %c348] : memref<1x4x512xf32, #tpu.memory_space<vmem>>, vector<1x4x2xf32>
    %369 = vector.shape_cast %368 : vector<1x4x2xf32> to vector<4x2xf32>
    %370 = vector.shape_cast %367 : vector<4x2xf32> to vector<1x4x2xf32>
    tpu.vector_store %arg3[%c0_186, %c0_187, %c348], %370 {strides = array<i32>} : memref<1x4x512xf32, #tpu.memory_space<vmem>>, vector<1x4x2xf32>,
    %371 = vector.extract_strided_slice %2 {offsets = [0, 184], sizes = [4, 2], strides = [1, 1]} : vector<4x512xf32> to vector<4x2xf32>
    %c0_188 = arith.constant 0 : index
    %c0_189 = arith.constant 0 : index
    %c78 = arith.constant 78 : index
    %372 = vector.load %arg3[%c0_188, %c0_189, %c78] : memref<1x4x512xf32, #tpu.memory_space<vmem>>, vector<1x4x2xf32>
    %373 = vector.shape_cast %372 : vector<1x4x2xf32> to vector<4x2xf32>
    %374 = vector.shape_cast %371 : vector<4x2xf32> to vector<1x4x2xf32>
    tpu.vector_store %arg3[%c0_188, %c0_189, %c78], %374 {strides = array<i32>} : memref<1x4x512xf32, #tpu.memory_space<vmem>>, vector<1x4x2xf32>,
    %375 = vector.extract_strided_slice %2 {offsets = [0, 186], sizes = [4, 2], strides = [1, 1]} : vector<4x512xf32> to vector<4x2xf32>
    %c0_190 = arith.constant 0 : index
    %c0_191 = arith.constant 0 : index
    %c94 = arith.constant 94 : index
    %376 = vector.load %arg3[%c0_190, %c0_191, %c94] : memref<1x4x512xf32, #tpu.memory_space<vmem>>, vector<1x4x2xf32>
    %377 = vector.shape_cast %376 : vector<1x4x2xf32> to vector<4x2xf32>
    %378 = vector.shape_cast %375 : vector<4x2xf32> to vector<1x4x2xf32>
    tpu.vector_store %arg3[%c0_190, %c0_191, %c94], %378 {strides = array<i32>} : memref<1x4x512xf32, #tpu.memory_space<vmem>>, vector<1x4x2xf32>,
    %379 = vector.extract_strided_slice %2 {offsets = [0, 188], sizes = [4, 2], strides = [1, 1]} : vector<4x512xf32> to vector<4x2xf32>
    %c0_192 = arith.constant 0 : index
    %c0_193 = arith.constant 0 : index
    %c334 = arith.constant 334 : index
    %380 = vector.load %arg3[%c0_192, %c0_193, %c334] : memref<1x4x512xf32, #tpu.memory_space<vmem>>, vector<1x4x2xf32>
    %381 = vector.shape_cast %380 : vector<1x4x2xf32> to vector<4x2xf32>
    %382 = vector.shape_cast %379 : vector<4x2xf32> to vector<1x4x2xf32>
    tpu.vector_store %arg3[%c0_192, %c0_193, %c334], %382 {strides = array<i32>} : memref<1x4x512xf32, #tpu.memory_space<vmem>>, vector<1x4x2xf32>,
    %383 = vector.extract_strided_slice %2 {offsets = [0, 190], sizes = [4, 2], strides = [1, 1]} : vector<4x512xf32> to vector<4x2xf32>
    %c0_194 = arith.constant 0 : index
    %c0_195 = arith.constant 0 : index
    %c350 = arith.constant 350 : index
    %384 = vector.load %arg3[%c0_194, %c0_195, %c350] : memref<1x4x512xf32, #tpu.memory_space<vmem>>, vector<1x4x2xf32>
    %385 = vector.shape_cast %384 : vector<1x4x2xf32> to vector<4x2xf32>
    %386 = vector.shape_cast %383 : vector<4x2xf32> to vector<1x4x2xf32>
    tpu.vector_store %arg3[%c0_194, %c0_195, %c350], %386 {strides = array<i32>} : memref<1x4x512xf32, #tpu.memory_space<vmem>>, vector<1x4x2xf32>,
    %387 = vector.extract_strided_slice %2 {offsets = [0, 192], sizes = [4, 2], strides = [1, 1]} : vector<4x512xf32> to vector<4x2xf32>
    %c0_196 = arith.constant 0 : index
    %c0_197 = arith.constant 0 : index
    %c96 = arith.constant 96 : index
    %388 = vector.load %arg3[%c0_196, %c0_197, %c96] : memref<1x4x512xf32, #tpu.memory_space<vmem>>, vector<1x4x2xf32>
    %389 = vector.shape_cast %388 : vector<1x4x2xf32> to vector<4x2xf32>
    %390 = vector.shape_cast %387 : vector<4x2xf32> to vector<1x4x2xf32>
    tpu.vector_store %arg3[%c0_196, %c0_197, %c96], %390 {strides = array<i32>} : memref<1x4x512xf32, #tpu.memory_space<vmem>>, vector<1x4x2xf32>,
    %391 = vector.extract_strided_slice %2 {offsets = [0, 194], sizes = [4, 2], strides = [1, 1]} : vector<4x512xf32> to vector<4x2xf32>
    %c0_198 = arith.constant 0 : index
    %c0_199 = arith.constant 0 : index
    %c112 = arith.constant 112 : index
    %392 = vector.load %arg3[%c0_198, %c0_199, %c112] : memref<1x4x512xf32, #tpu.memory_space<vmem>>, vector<1x4x2xf32>
    %393 = vector.shape_cast %392 : vector<1x4x2xf32> to vector<4x2xf32>
    %394 = vector.shape_cast %391 : vector<4x2xf32> to vector<1x4x2xf32>
    tpu.vector_store %arg3[%c0_198, %c0_199, %c112], %394 {strides = array<i32>} : memref<1x4x512xf32, #tpu.memory_space<vmem>>, vector<1x4x2xf32>,
    %395 = vector.extract_strided_slice %2 {offsets = [0, 196], sizes = [4, 2], strides = [1, 1]} : vector<4x512xf32> to vector<4x2xf32>
    %c0_200 = arith.constant 0 : index
    %c0_201 = arith.constant 0 : index
    %c352 = arith.constant 352 : index
    %396 = vector.load %arg3[%c0_200, %c0_201, %c352] : memref<1x4x512xf32, #tpu.memory_space<vmem>>, vector<1x4x2xf32>
    %397 = vector.shape_cast %396 : vector<1x4x2xf32> to vector<4x2xf32>
    %398 = vector.shape_cast %395 : vector<4x2xf32> to vector<1x4x2xf32>
    tpu.vector_store %arg3[%c0_200, %c0_201, %c352], %398 {strides = array<i32>} : memref<1x4x512xf32, #tpu.memory_space<vmem>>, vector<1x4x2xf32>,
    %399 = vector.extract_strided_slice %2 {offsets = [0, 198], sizes = [4, 2], strides = [1, 1]} : vector<4x512xf32> to vector<4x2xf32>
    %c0_202 = arith.constant 0 : index
    %c0_203 = arith.constant 0 : index
    %c368 = arith.constant 368 : index
    %400 = vector.load %arg3[%c0_202, %c0_203, %c368] : memref<1x4x512xf32, #tpu.memory_space<vmem>>, vector<1x4x2xf32>
    %401 = vector.shape_cast %400 : vector<1x4x2xf32> to vector<4x2xf32>
    %402 = vector.shape_cast %399 : vector<4x2xf32> to vector<1x4x2xf32>
    tpu.vector_store %arg3[%c0_202, %c0_203, %c368], %402 {strides = array<i32>} : memref<1x4x512xf32, #tpu.memory_space<vmem>>, vector<1x4x2xf32>,
    %403 = vector.extract_strided_slice %2 {offsets = [0, 200], sizes = [4, 2], strides = [1, 1]} : vector<4x512xf32> to vector<4x2xf32>
    %c0_204 = arith.constant 0 : index
    %c0_205 = arith.constant 0 : index
    %c98 = arith.constant 98 : index
    %404 = vector.load %arg3[%c0_204, %c0_205, %c98] : memref<1x4x512xf32, #tpu.memory_space<vmem>>, vector<1x4x2xf32>
    %405 = vector.shape_cast %404 : vector<1x4x2xf32> to vector<4x2xf32>
    %406 = vector.shape_cast %403 : vector<4x2xf32> to vector<1x4x2xf32>
    tpu.vector_store %arg3[%c0_204, %c0_205, %c98], %406 {strides = array<i32>} : memref<1x4x512xf32, #tpu.memory_space<vmem>>, vector<1x4x2xf32>,
    %407 = vector.extract_strided_slice %2 {offsets = [0, 202], sizes = [4, 2], strides = [1, 1]} : vector<4x512xf32> to vector<4x2xf32>
    %c0_206 = arith.constant 0 : index
    %c0_207 = arith.constant 0 : index
    %c114 = arith.constant 114 : index
    %408 = vector.load %arg3[%c0_206, %c0_207, %c114] : memref<1x4x512xf32, #tpu.memory_space<vmem>>, vector<1x4x2xf32>
    %409 = vector.shape_cast %408 : vector<1x4x2xf32> to vector<4x2xf32>
    %410 = vector.shape_cast %407 : vector<4x2xf32> to vector<1x4x2xf32>
    tpu.vector_store %arg3[%c0_206, %c0_207, %c114], %410 {strides = array<i32>} : memref<1x4x512xf32, #tpu.memory_space<vmem>>, vector<1x4x2xf32>,
    %411 = vector.extract_strided_slice %2 {offsets = [0, 204], sizes = [4, 2], strides = [1, 1]} : vector<4x512xf32> to vector<4x2xf32>
    %c0_208 = arith.constant 0 : index
    %c0_209 = arith.constant 0 : index
    %c354 = arith.constant 354 : index
    %412 = vector.load %arg3[%c0_208, %c0_209, %c354] : memref<1x4x512xf32, #tpu.memory_space<vmem>>, vector<1x4x2xf32>
    %413 = vector.shape_cast %412 : vector<1x4x2xf32> to vector<4x2xf32>
    %414 = vector.shape_cast %411 : vector<4x2xf32> to vector<1x4x2xf32>
    tpu.vector_store %arg3[%c0_208, %c0_209, %c354], %414 {strides = array<i32>} : memref<1x4x512xf32, #tpu.memory_space<vmem>>, vector<1x4x2xf32>,
    %415 = vector.extract_strided_slice %2 {offsets = [0, 206], sizes = [4, 2], strides = [1, 1]} : vector<4x512xf32> to vector<4x2xf32>
    %c0_210 = arith.constant 0 : index
    %c0_211 = arith.constant 0 : index
    %c370 = arith.constant 370 : index
    %416 = vector.load %arg3[%c0_210, %c0_211, %c370] : memref<1x4x512xf32, #tpu.memory_space<vmem>>, vector<1x4x2xf32>
    %417 = vector.shape_cast %416 : vector<1x4x2xf32> to vector<4x2xf32>
    %418 = vector.shape_cast %415 : vector<4x2xf32> to vector<1x4x2xf32>
    tpu.vector_store %arg3[%c0_210, %c0_211, %c370], %418 {strides = array<i32>} : memref<1x4x512xf32, #tpu.memory_space<vmem>>, vector<1x4x2xf32>,
    %419 = vector.extract_strided_slice %2 {offsets = [0, 208], sizes = [4, 2], strides = [1, 1]} : vector<4x512xf32> to vector<4x2xf32>
    %c0_212 = arith.constant 0 : index
    %c0_213 = arith.constant 0 : index
    %c100 = arith.constant 100 : index
    %420 = vector.load %arg3[%c0_212, %c0_213, %c100] : memref<1x4x512xf32, #tpu.memory_space<vmem>>, vector<1x4x2xf32>
    %421 = vector.shape_cast %420 : vector<1x4x2xf32> to vector<4x2xf32>
    %422 = vector.shape_cast %419 : vector<4x2xf32> to vector<1x4x2xf32>
    tpu.vector_store %arg3[%c0_212, %c0_213, %c100], %422 {strides = array<i32>} : memref<1x4x512xf32, #tpu.memory_space<vmem>>, vector<1x4x2xf32>,
    %423 = vector.extract_strided_slice %2 {offsets = [0, 210], sizes = [4, 2], strides = [1, 1]} : vector<4x512xf32> to vector<4x2xf32>
    %c0_214 = arith.constant 0 : index
    %c0_215 = arith.constant 0 : index
    %c116 = arith.constant 116 : index
    %424 = vector.load %arg3[%c0_214, %c0_215, %c116] : memref<1x4x512xf32, #tpu.memory_space<vmem>>, vector<1x4x2xf32>
    %425 = vector.shape_cast %424 : vector<1x4x2xf32> to vector<4x2xf32>
    %426 = vector.shape_cast %423 : vector<4x2xf32> to vector<1x4x2xf32>
    tpu.vector_store %arg3[%c0_214, %c0_215, %c116], %426 {strides = array<i32>} : memref<1x4x512xf32, #tpu.memory_space<vmem>>, vector<1x4x2xf32>,
    %427 = vector.extract_strided_slice %2 {offsets = [0, 212], sizes = [4, 2], strides = [1, 1]} : vector<4x512xf32> to vector<4x2xf32>
    %c0_216 = arith.constant 0 : index
    %c0_217 = arith.constant 0 : index
    %c356 = arith.constant 356 : index
    %428 = vector.load %arg3[%c0_216, %c0_217, %c356] : memref<1x4x512xf32, #tpu.memory_space<vmem>>, vector<1x4x2xf32>
    %429 = vector.shape_cast %428 : vector<1x4x2xf32> to vector<4x2xf32>
    %430 = vector.shape_cast %427 : vector<4x2xf32> to vector<1x4x2xf32>
    tpu.vector_store %arg3[%c0_216, %c0_217, %c356], %430 {strides = array<i32>} : memref<1x4x512xf32, #tpu.memory_space<vmem>>, vector<1x4x2xf32>,
    %431 = vector.extract_strided_slice %2 {offsets = [0, 214], sizes = [4, 2], strides = [1, 1]} : vector<4x512xf32> to vector<4x2xf32>
    %c0_218 = arith.constant 0 : index
    %c0_219 = arith.constant 0 : index
    %c372 = arith.constant 372 : index
    %432 = vector.load %arg3[%c0_218, %c0_219, %c372] : memref<1x4x512xf32, #tpu.memory_space<vmem>>, vector<1x4x2xf32>
    %433 = vector.shape_cast %432 : vector<1x4x2xf32> to vector<4x2xf32>
    %434 = vector.shape_cast %431 : vector<4x2xf32> to vector<1x4x2xf32>
    tpu.vector_store %arg3[%c0_218, %c0_219, %c372], %434 {strides = array<i32>} : memref<1x4x512xf32, #tpu.memory_space<vmem>>, vector<1x4x2xf32>,
    %435 = vector.extract_strided_slice %2 {offsets = [0, 216], sizes = [4, 2], strides = [1, 1]} : vector<4x512xf32> to vector<4x2xf32>
    %c0_220 = arith.constant 0 : index
    %c0_221 = arith.constant 0 : index
    %c102 = arith.constant 102 : index
    %436 = vector.load %arg3[%c0_220, %c0_221, %c102] : memref<1x4x512xf32, #tpu.memory_space<vmem>>, vector<1x4x2xf32>
    %437 = vector.shape_cast %436 : vector<1x4x2xf32> to vector<4x2xf32>
    %438 = vector.shape_cast %435 : vector<4x2xf32> to vector<1x4x2xf32>
    tpu.vector_store %arg3[%c0_220, %c0_221, %c102], %438 {strides = array<i32>} : memref<1x4x512xf32, #tpu.memory_space<vmem>>, vector<1x4x2xf32>,
    %439 = vector.extract_strided_slice %2 {offsets = [0, 218], sizes = [4, 2], strides = [1, 1]} : vector<4x512xf32> to vector<4x2xf32>
    %c0_222 = arith.constant 0 : index
    %c0_223 = arith.constant 0 : index
    %c118 = arith.constant 118 : index
    %440 = vector.load %arg3[%c0_222, %c0_223, %c118] : memref<1x4x512xf32, #tpu.memory_space<vmem>>, vector<1x4x2xf32>
    %441 = vector.shape_cast %440 : vector<1x4x2xf32> to vector<4x2xf32>
    %442 = vector.shape_cast %439 : vector<4x2xf32> to vector<1x4x2xf32>
    tpu.vector_store %arg3[%c0_222, %c0_223, %c118], %442 {strides = array<i32>} : memref<1x4x512xf32, #tpu.memory_space<vmem>>, vector<1x4x2xf32>,
    %443 = vector.extract_strided_slice %2 {offsets = [0, 220], sizes = [4, 2], strides = [1, 1]} : vector<4x512xf32> to vector<4x2xf32>
    %c0_224 = arith.constant 0 : index
    %c0_225 = arith.constant 0 : index
    %c358 = arith.constant 358 : index
    %444 = vector.load %arg3[%c0_224, %c0_225, %c358] : memref<1x4x512xf32, #tpu.memory_space<vmem>>, vector<1x4x2xf32>
    %445 = vector.shape_cast %444 : vector<1x4x2xf32> to vector<4x2xf32>
    %446 = vector.shape_cast %443 : vector<4x2xf32> to vector<1x4x2xf32>
    tpu.vector_store %arg3[%c0_224, %c0_225, %c358], %446 {strides = array<i32>} : memref<1x4x512xf32, #tpu.memory_space<vmem>>, vector<1x4x2xf32>,
    %447 = vector.extract_strided_slice %2 {offsets = [0, 222], sizes = [4, 2], strides = [1, 1]} : vector<4x512xf32> to vector<4x2xf32>
    %c0_226 = arith.constant 0 : index
    %c0_227 = arith.constant 0 : index
    %c374 = arith.constant 374 : index
    %448 = vector.load %arg3[%c0_226, %c0_227, %c374] : memref<1x4x512xf32, #tpu.memory_space<vmem>>, vector<1x4x2xf32>
    %449 = vector.shape_cast %448 : vector<1x4x2xf32> to vector<4x2xf32>
    %450 = vector.shape_cast %447 : vector<4x2xf32> to vector<1x4x2xf32>
    tpu.vector_store %arg3[%c0_226, %c0_227, %c374], %450 {strides = array<i32>} : memref<1x4x512xf32, #tpu.memory_space<vmem>>, vector<1x4x2xf32>,
    %451 = vector.extract_strided_slice %2 {offsets = [0, 224], sizes = [4, 2], strides = [1, 1]} : vector<4x512xf32> to vector<4x2xf32>
    %c0_228 = arith.constant 0 : index
    %c0_229 = arith.constant 0 : index
    %c104 = arith.constant 104 : index
    %452 = vector.load %arg3[%c0_228, %c0_229, %c104] : memref<1x4x512xf32, #tpu.memory_space<vmem>>, vector<1x4x2xf32>
    %453 = vector.shape_cast %452 : vector<1x4x2xf32> to vector<4x2xf32>
    %454 = vector.shape_cast %451 : vector<4x2xf32> to vector<1x4x2xf32>
    tpu.vector_store %arg3[%c0_228, %c0_229, %c104], %454 {strides = array<i32>} : memref<1x4x512xf32, #tpu.memory_space<vmem>>, vector<1x4x2xf32>,
    %455 = vector.extract_strided_slice %2 {offsets = [0, 226], sizes = [4, 2], strides = [1, 1]} : vector<4x512xf32> to vector<4x2xf32>
    %c0_230 = arith.constant 0 : index
    %c0_231 = arith.constant 0 : index
    %c120 = arith.constant 120 : index
    %456 = vector.load %arg3[%c0_230, %c0_231, %c120] : memref<1x4x512xf32, #tpu.memory_space<vmem>>, vector<1x4x2xf32>
    %457 = vector.shape_cast %456 : vector<1x4x2xf32> to vector<4x2xf32>
    %458 = vector.shape_cast %455 : vector<4x2xf32> to vector<1x4x2xf32>
    tpu.vector_store %arg3[%c0_230, %c0_231, %c120], %458 {strides = array<i32>} : memref<1x4x512xf32, #tpu.memory_space<vmem>>, vector<1x4x2xf32>,
    %459 = vector.extract_strided_slice %2 {offsets = [0, 228], sizes = [4, 2], strides = [1, 1]} : vector<4x512xf32> to vector<4x2xf32>
    %c0_232 = arith.constant 0 : index
    %c0_233 = arith.constant 0 : index
    %c360 = arith.constant 360 : index
    %460 = vector.load %arg3[%c0_232, %c0_233, %c360] : memref<1x4x512xf32, #tpu.memory_space<vmem>>, vector<1x4x2xf32>
    %461 = vector.shape_cast %460 : vector<1x4x2xf32> to vector<4x2xf32>
    %462 = vector.shape_cast %459 : vector<4x2xf32> to vector<1x4x2xf32>
    tpu.vector_store %arg3[%c0_232, %c0_233, %c360], %462 {strides = array<i32>} : memref<1x4x512xf32, #tpu.memory_space<vmem>>, vector<1x4x2xf32>,
    %463 = vector.extract_strided_slice %2 {offsets = [0, 230], sizes = [4, 2], strides = [1, 1]} : vector<4x512xf32> to vector<4x2xf32>
    %c0_234 = arith.constant 0 : index
    %c0_235 = arith.constant 0 : index
    %c376 = arith.constant 376 : index
    %464 = vector.load %arg3[%c0_234, %c0_235, %c376] : memref<1x4x512xf32, #tpu.memory_space<vmem>>, vector<1x4x2xf32>
    %465 = vector.shape_cast %464 : vector<1x4x2xf32> to vector<4x2xf32>
    %466 = vector.shape_cast %463 : vector<4x2xf32> to vector<1x4x2xf32>
    tpu.vector_store %arg3[%c0_234, %c0_235, %c376], %466 {strides = array<i32>} : memref<1x4x512xf32, #tpu.memory_space<vmem>>, vector<1x4x2xf32>,
    %467 = vector.extract_strided_slice %2 {offsets = [0, 232], sizes = [4, 2], strides = [1, 1]} : vector<4x512xf32> to vector<4x2xf32>
    %c0_236 = arith.constant 0 : index
    %c0_237 = arith.constant 0 : index
    %c106 = arith.constant 106 : index
    %468 = vector.load %arg3[%c0_236, %c0_237, %c106] : memref<1x4x512xf32, #tpu.memory_space<vmem>>, vector<1x4x2xf32>
    %469 = vector.shape_cast %468 : vector<1x4x2xf32> to vector<4x2xf32>
    %470 = vector.shape_cast %467 : vector<4x2xf32> to vector<1x4x2xf32>
    tpu.vector_store %arg3[%c0_236, %c0_237, %c106], %470 {strides = array<i32>} : memref<1x4x512xf32, #tpu.memory_space<vmem>>, vector<1x4x2xf32>,
    %471 = vector.extract_strided_slice %2 {offsets = [0, 234], sizes = [4, 2], strides = [1, 1]} : vector<4x512xf32> to vector<4x2xf32>
    %c0_238 = arith.constant 0 : index
    %c0_239 = arith.constant 0 : index
    %c122 = arith.constant 122 : index
    %472 = vector.load %arg3[%c0_238, %c0_239, %c122] : memref<1x4x512xf32, #tpu.memory_space<vmem>>, vector<1x4x2xf32>
    %473 = vector.shape_cast %472 : vector<1x4x2xf32> to vector<4x2xf32>
    %474 = vector.shape_cast %471 : vector<4x2xf32> to vector<1x4x2xf32>
    tpu.vector_store %arg3[%c0_238, %c0_239, %c122], %474 {strides = array<i32>} : memref<1x4x512xf32, #tpu.memory_space<vmem>>, vector<1x4x2xf32>,
    %475 = vector.extract_strided_slice %2 {offsets = [0, 236], sizes = [4, 2], strides = [1, 1]} : vector<4x512xf32> to vector<4x2xf32>
    %c0_240 = arith.constant 0 : index
    %c0_241 = arith.constant 0 : index
    %c362 = arith.constant 362 : index
    %476 = vector.load %arg3[%c0_240, %c0_241, %c362] : memref<1x4x512xf32, #tpu.memory_space<vmem>>, vector<1x4x2xf32>
    %477 = vector.shape_cast %476 : vector<1x4x2xf32> to vector<4x2xf32>
    %478 = vector.shape_cast %475 : vector<4x2xf32> to vector<1x4x2xf32>
    tpu.vector_store %arg3[%c0_240, %c0_241, %c362], %478 {strides = array<i32>} : memref<1x4x512xf32, #tpu.memory_space<vmem>>, vector<1x4x2xf32>,
    %479 = vector.extract_strided_slice %2 {offsets = [0, 238], sizes = [4, 2], strides = [1, 1]} : vector<4x512xf32> to vector<4x2xf32>
    %c0_242 = arith.constant 0 : index
    %c0_243 = arith.constant 0 : index
    %c378 = arith.constant 378 : index
    %480 = vector.load %arg3[%c0_242, %c0_243, %c378] : memref<1x4x512xf32, #tpu.memory_space<vmem>>, vector<1x4x2xf32>
    %481 = vector.shape_cast %480 : vector<1x4x2xf32> to vector<4x2xf32>
    %482 = vector.shape_cast %479 : vector<4x2xf32> to vector<1x4x2xf32>
    tpu.vector_store %arg3[%c0_242, %c0_243, %c378], %482 {strides = array<i32>} : memref<1x4x512xf32, #tpu.memory_space<vmem>>, vector<1x4x2xf32>,
    %483 = vector.extract_strided_slice %2 {offsets = [0, 240], sizes = [4, 2], strides = [1, 1]} : vector<4x512xf32> to vector<4x2xf32>
    %c0_244 = arith.constant 0 : index
    %c0_245 = arith.constant 0 : index
    %c108 = arith.constant 108 : index
    %484 = vector.load %arg3[%c0_244, %c0_245, %c108] : memref<1x4x512xf32, #tpu.memory_space<vmem>>, vector<1x4x2xf32>
    %485 = vector.shape_cast %484 : vector<1x4x2xf32> to vector<4x2xf32>
    %486 = vector.shape_cast %483 : vector<4x2xf32> to vector<1x4x2xf32>
    tpu.vector_store %arg3[%c0_244, %c0_245, %c108], %486 {strides = array<i32>} : memref<1x4x512xf32, #tpu.memory_space<vmem>>, vector<1x4x2xf32>,
    %487 = vector.extract_strided_slice %2 {offsets = [0, 242], sizes = [4, 2], strides = [1, 1]} : vector<4x512xf32> to vector<4x2xf32>
    %c0_246 = arith.constant 0 : index
    %c0_247 = arith.constant 0 : index
    %c124 = arith.constant 124 : index
    %488 = vector.load %arg3[%c0_246, %c0_247, %c124] : memref<1x4x512xf32, #tpu.memory_space<vmem>>, vector<1x4x2xf32>
    %489 = vector.shape_cast %488 : vector<1x4x2xf32> to vector<4x2xf32>
    %490 = vector.shape_cast %487 : vector<4x2xf32> to vector<1x4x2xf32>
    tpu.vector_store %arg3[%c0_246, %c0_247, %c124], %490 {strides = array<i32>} : memref<1x4x512xf32, #tpu.memory_space<vmem>>, vector<1x4x2xf32>,
    %491 = vector.extract_strided_slice %2 {offsets = [0, 244], sizes = [4, 2], strides = [1, 1]} : vector<4x512xf32> to vector<4x2xf32>
    %c0_248 = arith.constant 0 : index
    %c0_249 = arith.constant 0 : index
    %c364 = arith.constant 364 : index
    %492 = vector.load %arg3[%c0_248, %c0_249, %c364] : memref<1x4x512xf32, #tpu.memory_space<vmem>>, vector<1x4x2xf32>
    %493 = vector.shape_cast %492 : vector<1x4x2xf32> to vector<4x2xf32>
    %494 = vector.shape_cast %491 : vector<4x2xf32> to vector<1x4x2xf32>
    tpu.vector_store %arg3[%c0_248, %c0_249, %c364], %494 {strides = array<i32>} : memref<1x4x512xf32, #tpu.memory_space<vmem>>, vector<1x4x2xf32>,
    %495 = vector.extract_strided_slice %2 {offsets = [0, 246], sizes = [4, 2], strides = [1, 1]} : vector<4x512xf32> to vector<4x2xf32>
    %c0_250 = arith.constant 0 : index
    %c0_251 = arith.constant 0 : index
    %c380 = arith.constant 380 : index
    %496 = vector.load %arg3[%c0_250, %c0_251, %c380] : memref<1x4x512xf32, #tpu.memory_space<vmem>>, vector<1x4x2xf32>
    %497 = vector.shape_cast %496 : vector<1x4x2xf32> to vector<4x2xf32>
    %498 = vector.shape_cast %495 : vector<4x2xf32> to vector<1x4x2xf32>
    tpu.vector_store %arg3[%c0_250, %c0_251, %c380], %498 {strides = array<i32>} : memref<1x4x512xf32, #tpu.memory_space<vmem>>, vector<1x4x2xf32>,
    %499 = vector.extract_strided_slice %2 {offsets = [0, 248], sizes = [4, 2], strides = [1, 1]} : vector<4x512xf32> to vector<4x2xf32>
    %c0_252 = arith.constant 0 : index
    %c0_253 = arith.constant 0 : index
    %c110 = arith.constant 110 : index
    %500 = vector.load %arg3[%c0_252, %c0_253, %c110] : memref<1x4x512xf32, #tpu.memory_space<vmem>>, vector<1x4x2xf32>
    %501 = vector.shape_cast %500 : vector<1x4x2xf32> to vector<4x2xf32>
    %502 = vector.shape_cast %499 : vector<4x2xf32> to vector<1x4x2xf32>
    tpu.vector_store %arg3[%c0_252, %c0_253, %c110], %502 {strides = array<i32>} : memref<1x4x512xf32, #tpu.memory_space<vmem>>, vector<1x4x2xf32>,
    %503 = vector.extract_strided_slice %2 {offsets = [0, 250], sizes = [4, 2], strides = [1, 1]} : vector<4x512xf32> to vector<4x2xf32>
    %c0_254 = arith.constant 0 : index
    %c0_255 = arith.constant 0 : index
    %c126 = arith.constant 126 : index
    %504 = vector.load %arg3[%c0_254, %c0_255, %c126] : memref<1x4x512xf32, #tpu.memory_space<vmem>>, vector<1x4x2xf32>
    %505 = vector.shape_cast %504 : vector<1x4x2xf32> to vector<4x2xf32>
    %506 = vector.shape_cast %503 : vector<4x2xf32> to vector<1x4x2xf32>
    tpu.vector_store %arg3[%c0_254, %c0_255, %c126], %506 {strides = array<i32>} : memref<1x4x512xf32, #tpu.memory_space<vmem>>, vector<1x4x2xf32>,
    %507 = vector.extract_strided_slice %2 {offsets = [0, 252], sizes = [4, 2], strides = [1, 1]} : vector<4x512xf32> to vector<4x2xf32>
    %c0_256 = arith.constant 0 : index
    %c0_257 = arith.constant 0 : index
    %c366 = arith.constant 366 : index
    %508 = vector.load %arg3[%c0_256, %c0_257, %c366] : memref<1x4x512xf32, #tpu.memory_space<vmem>>, vector<1x4x2xf32>
    %509 = vector.shape_cast %508 : vector<1x4x2xf32> to vector<4x2xf32>
    %510 = vector.shape_cast %507 : vector<4x2xf32> to vector<1x4x2xf32>
    tpu.vector_store %arg3[%c0_256, %c0_257, %c366], %510 {strides = array<i32>} : memref<1x4x512xf32, #tpu.memory_space<vmem>>, vector<1x4x2xf32>,
    %511 = vector.extract_strided_slice %2 {offsets = [0, 254], sizes = [4, 2], strides = [1, 1]} : vector<4x512xf32> to vector<4x2xf32>
    %c0_258 = arith.constant 0 : index
    %c0_259 = arith.constant 0 : index
    %c382 = arith.constant 382 : index
    %512 = vector.load %arg3[%c0_258, %c0_259, %c382] : memref<1x4x512xf32, #tpu.memory_space<vmem>>, vector<1x4x2xf32>
    %513 = vector.shape_cast %512 : vector<1x4x2xf32> to vector<4x2xf32>
    %514 = vector.shape_cast %511 : vector<4x2xf32> to vector<1x4x2xf32>
    tpu.vector_store %arg3[%c0_258, %c0_259, %c382], %514 {strides = array<i32>} : memref<1x4x512xf32, #tpu.memory_space<vmem>>, vector<1x4x2xf32>,
    %515 = vector.extract_strided_slice %2 {offsets = [0, 256], sizes = [4, 2], strides = [1, 1]} : vector<4x512xf32> to vector<4x2xf32>
    %c0_260 = arith.constant 0 : index
    %c0_261 = arith.constant 0 : index
    %c128 = arith.constant 128 : index
    %516 = vector.load %arg3[%c0_260, %c0_261, %c128] : memref<1x4x512xf32, #tpu.memory_space<vmem>>, vector<1x4x2xf32>
    %517 = vector.shape_cast %516 : vector<1x4x2xf32> to vector<4x2xf32>
    %518 = vector.shape_cast %515 : vector<4x2xf32> to vector<1x4x2xf32>
    tpu.vector_store %arg3[%c0_260, %c0_261, %c128], %518 {strides = array<i32>} : memref<1x4x512xf32, #tpu.memory_space<vmem>>, vector<1x4x2xf32>,
    %519 = vector.extract_strided_slice %2 {offsets = [0, 258], sizes = [4, 2], strides = [1, 1]} : vector<4x512xf32> to vector<4x2xf32>
    %c0_262 = arith.constant 0 : index
    %c0_263 = arith.constant 0 : index
    %c144 = arith.constant 144 : index
    %520 = vector.load %arg3[%c0_262, %c0_263, %c144] : memref<1x4x512xf32, #tpu.memory_space<vmem>>, vector<1x4x2xf32>
    %521 = vector.shape_cast %520 : vector<1x4x2xf32> to vector<4x2xf32>
    %522 = vector.shape_cast %519 : vector<4x2xf32> to vector<1x4x2xf32>
    tpu.vector_store %arg3[%c0_262, %c0_263, %c144], %522 {strides = array<i32>} : memref<1x4x512xf32, #tpu.memory_space<vmem>>, vector<1x4x2xf32>,
    %523 = vector.extract_strided_slice %2 {offsets = [0, 260], sizes = [4, 2], strides = [1, 1]} : vector<4x512xf32> to vector<4x2xf32>
    %c0_264 = arith.constant 0 : index
    %c0_265 = arith.constant 0 : index
    %c384 = arith.constant 384 : index
    %524 = vector.load %arg3[%c0_264, %c0_265, %c384] : memref<1x4x512xf32, #tpu.memory_space<vmem>>, vector<1x4x2xf32>
    %525 = vector.shape_cast %524 : vector<1x4x2xf32> to vector<4x2xf32>
    %526 = vector.shape_cast %523 : vector<4x2xf32> to vector<1x4x2xf32>
    tpu.vector_store %arg3[%c0_264, %c0_265, %c384], %526 {strides = array<i32>} : memref<1x4x512xf32, #tpu.memory_space<vmem>>, vector<1x4x2xf32>,
    %527 = vector.extract_strided_slice %2 {offsets = [0, 262], sizes = [4, 2], strides = [1, 1]} : vector<4x512xf32> to vector<4x2xf32>
    %c0_266 = arith.constant 0 : index
    %c0_267 = arith.constant 0 : index
    %c400 = arith.constant 400 : index
    %528 = vector.load %arg3[%c0_266, %c0_267, %c400] : memref<1x4x512xf32, #tpu.memory_space<vmem>>, vector<1x4x2xf32>
    %529 = vector.shape_cast %528 : vector<1x4x2xf32> to vector<4x2xf32>
    %530 = vector.shape_cast %527 : vector<4x2xf32> to vector<1x4x2xf32>
    tpu.vector_store %arg3[%c0_266, %c0_267, %c400], %530 {strides = array<i32>} : memref<1x4x512xf32, #tpu.memory_space<vmem>>, vector<1x4x2xf32>,
    %531 = vector.extract_strided_slice %2 {offsets = [0, 264], sizes = [4, 2], strides = [1, 1]} : vector<4x512xf32> to vector<4x2xf32>
    %c0_268 = arith.constant 0 : index
    %c0_269 = arith.constant 0 : index
    %c130 = arith.constant 130 : index
    %532 = vector.load %arg3[%c0_268, %c0_269, %c130] : memref<1x4x512xf32, #tpu.memory_space<vmem>>, vector<1x4x2xf32>
    %533 = vector.shape_cast %532 : vector<1x4x2xf32> to vector<4x2xf32>
    %534 = vector.shape_cast %531 : vector<4x2xf32> to vector<1x4x2xf32>
    tpu.vector_store %arg3[%c0_268, %c0_269, %c130], %534 {strides = array<i32>} : memref<1x4x512xf32, #tpu.memory_space<vmem>>, vector<1x4x2xf32>,
    %535 = vector.extract_strided_slice %2 {offsets = [0, 266], sizes = [4, 2], strides = [1, 1]} : vector<4x512xf32> to vector<4x2xf32>
    %c0_270 = arith.constant 0 : index
    %c0_271 = arith.constant 0 : index
    %c146 = arith.constant 146 : index
    %536 = vector.load %arg3[%c0_270, %c0_271, %c146] : memref<1x4x512xf32, #tpu.memory_space<vmem>>, vector<1x4x2xf32>
    %537 = vector.shape_cast %536 : vector<1x4x2xf32> to vector<4x2xf32>
    %538 = vector.shape_cast %535 : vector<4x2xf32> to vector<1x4x2xf32>
    tpu.vector_store %arg3[%c0_270, %c0_271, %c146], %538 {strides = array<i32>} : memref<1x4x512xf32, #tpu.memory_space<vmem>>, vector<1x4x2xf32>,
    %539 = vector.extract_strided_slice %2 {offsets = [0, 268], sizes = [4, 2], strides = [1, 1]} : vector<4x512xf32> to vector<4x2xf32>
    %c0_272 = arith.constant 0 : index
    %c0_273 = arith.constant 0 : index
    %c386 = arith.constant 386 : index
    %540 = vector.load %arg3[%c0_272, %c0_273, %c386] : memref<1x4x512xf32, #tpu.memory_space<vmem>>, vector<1x4x2xf32>
    %541 = vector.shape_cast %540 : vector<1x4x2xf32> to vector<4x2xf32>
    %542 = vector.shape_cast %539 : vector<4x2xf32> to vector<1x4x2xf32>
    tpu.vector_store %arg3[%c0_272, %c0_273, %c386], %542 {strides = array<i32>} : memref<1x4x512xf32, #tpu.memory_space<vmem>>, vector<1x4x2xf32>,
    %543 = vector.extract_strided_slice %2 {offsets = [0, 270], sizes = [4, 2], strides = [1, 1]} : vector<4x512xf32> to vector<4x2xf32>
    %c0_274 = arith.constant 0 : index
    %c0_275 = arith.constant 0 : index
    %c402 = arith.constant 402 : index
    %544 = vector.load %arg3[%c0_274, %c0_275, %c402] : memref<1x4x512xf32, #tpu.memory_space<vmem>>, vector<1x4x2xf32>
    %545 = vector.shape_cast %544 : vector<1x4x2xf32> to vector<4x2xf32>
    %546 = vector.shape_cast %543 : vector<4x2xf32> to vector<1x4x2xf32>
    tpu.vector_store %arg3[%c0_274, %c0_275, %c402], %546 {strides = array<i32>} : memref<1x4x512xf32, #tpu.memory_space<vmem>>, vector<1x4x2xf32>,
    %547 = vector.extract_strided_slice %2 {offsets = [0, 272], sizes = [4, 2], strides = [1, 1]} : vector<4x512xf32> to vector<4x2xf32>
    %c0_276 = arith.constant 0 : index
    %c0_277 = arith.constant 0 : index
    %c132 = arith.constant 132 : index
    %548 = vector.load %arg3[%c0_276, %c0_277, %c132] : memref<1x4x512xf32, #tpu.memory_space<vmem>>, vector<1x4x2xf32>
    %549 = vector.shape_cast %548 : vector<1x4x2xf32> to vector<4x2xf32>
    %550 = vector.shape_cast %547 : vector<4x2xf32> to vector<1x4x2xf32>
    tpu.vector_store %arg3[%c0_276, %c0_277, %c132], %550 {strides = array<i32>} : memref<1x4x512xf32, #tpu.memory_space<vmem>>, vector<1x4x2xf32>,
    %551 = vector.extract_strided_slice %2 {offsets = [0, 274], sizes = [4, 2], strides = [1, 1]} : vector<4x512xf32> to vector<4x2xf32>
    %c0_278 = arith.constant 0 : index
    %c0_279 = arith.constant 0 : index
    %c148 = arith.constant 148 : index
    %552 = vector.load %arg3[%c0_278, %c0_279, %c148] : memref<1x4x512xf32, #tpu.memory_space<vmem>>, vector<1x4x2xf32>
    %553 = vector.shape_cast %552 : vector<1x4x2xf32> to vector<4x2xf32>
    %554 = vector.shape_cast %551 : vector<4x2xf32> to vector<1x4x2xf32>
    tpu.vector_store %arg3[%c0_278, %c0_279, %c148], %554 {strides = array<i32>} : memref<1x4x512xf32, #tpu.memory_space<vmem>>, vector<1x4x2xf32>,
    %555 = vector.extract_strided_slice %2 {offsets = [0, 276], sizes = [4, 2], strides = [1, 1]} : vector<4x512xf32> to vector<4x2xf32>
    %c0_280 = arith.constant 0 : index
    %c0_281 = arith.constant 0 : index
    %c388 = arith.constant 388 : index
    %556 = vector.load %arg3[%c0_280, %c0_281, %c388] : memref<1x4x512xf32, #tpu.memory_space<vmem>>, vector<1x4x2xf32>
    %557 = vector.shape_cast %556 : vector<1x4x2xf32> to vector<4x2xf32>
    %558 = vector.shape_cast %555 : vector<4x2xf32> to vector<1x4x2xf32>
    tpu.vector_store %arg3[%c0_280, %c0_281, %c388], %558 {strides = array<i32>} : memref<1x4x512xf32, #tpu.memory_space<vmem>>, vector<1x4x2xf32>,
    %559 = vector.extract_strided_slice %2 {offsets = [0, 278], sizes = [4, 2], strides = [1, 1]} : vector<4x512xf32> to vector<4x2xf32>
    %c0_282 = arith.constant 0 : index
    %c0_283 = arith.constant 0 : index
    %c404 = arith.constant 404 : index
    %560 = vector.load %arg3[%c0_282, %c0_283, %c404] : memref<1x4x512xf32, #tpu.memory_space<vmem>>, vector<1x4x2xf32>
    %561 = vector.shape_cast %560 : vector<1x4x2xf32> to vector<4x2xf32>
    %562 = vector.shape_cast %559 : vector<4x2xf32> to vector<1x4x2xf32>
    tpu.vector_store %arg3[%c0_282, %c0_283, %c404], %562 {strides = array<i32>} : memref<1x4x512xf32, #tpu.memory_space<vmem>>, vector<1x4x2xf32>,
    %563 = vector.extract_strided_slice %2 {offsets = [0, 280], sizes = [4, 2], strides = [1, 1]} : vector<4x512xf32> to vector<4x2xf32>
    %c0_284 = arith.constant 0 : index
    %c0_285 = arith.constant 0 : index
    %c134 = arith.constant 134 : index
    %564 = vector.load %arg3[%c0_284, %c0_285, %c134] : memref<1x4x512xf32, #tpu.memory_space<vmem>>, vector<1x4x2xf32>
    %565 = vector.shape_cast %564 : vector<1x4x2xf32> to vector<4x2xf32>
    %566 = vector.shape_cast %563 : vector<4x2xf32> to vector<1x4x2xf32>
    tpu.vector_store %arg3[%c0_284, %c0_285, %c134], %566 {strides = array<i32>} : memref<1x4x512xf32, #tpu.memory_space<vmem>>, vector<1x4x2xf32>,
    %567 = vector.extract_strided_slice %2 {offsets = [0, 282], sizes = [4, 2], strides = [1, 1]} : vector<4x512xf32> to vector<4x2xf32>
    %c0_286 = arith.constant 0 : index
    %c0_287 = arith.constant 0 : index
    %c150 = arith.constant 150 : index
    %568 = vector.load %arg3[%c0_286, %c0_287, %c150] : memref<1x4x512xf32, #tpu.memory_space<vmem>>, vector<1x4x2xf32>
    %569 = vector.shape_cast %568 : vector<1x4x2xf32> to vector<4x2xf32>
    %570 = vector.shape_cast %567 : vector<4x2xf32> to vector<1x4x2xf32>
    tpu.vector_store %arg3[%c0_286, %c0_287, %c150], %570 {strides = array<i32>} : memref<1x4x512xf32, #tpu.memory_space<vmem>>, vector<1x4x2xf32>,
    %571 = vector.extract_strided_slice %2 {offsets = [0, 284], sizes = [4, 2], strides = [1, 1]} : vector<4x512xf32> to vector<4x2xf32>
    %c0_288 = arith.constant 0 : index
    %c0_289 = arith.constant 0 : index
    %c390 = arith.constant 390 : index
    %572 = vector.load %arg3[%c0_288, %c0_289, %c390] : memref<1x4x512xf32, #tpu.memory_space<vmem>>, vector<1x4x2xf32>
    %573 = vector.shape_cast %572 : vector<1x4x2xf32> to vector<4x2xf32>
    %574 = vector.shape_cast %571 : vector<4x2xf32> to vector<1x4x2xf32>
    tpu.vector_store %arg3[%c0_288, %c0_289, %c390], %574 {strides = array<i32>} : memref<1x4x512xf32, #tpu.memory_space<vmem>>, vector<1x4x2xf32>,
    %575 = vector.extract_strided_slice %2 {offsets = [0, 286], sizes = [4, 2], strides = [1, 1]} : vector<4x512xf32> to vector<4x2xf32>
    %c0_290 = arith.constant 0 : index
    %c0_291 = arith.constant 0 : index
    %c406 = arith.constant 406 : index
    %576 = vector.load %arg3[%c0_290, %c0_291, %c406] : memref<1x4x512xf32, #tpu.memory_space<vmem>>, vector<1x4x2xf32>
    %577 = vector.shape_cast %576 : vector<1x4x2xf32> to vector<4x2xf32>
    %578 = vector.shape_cast %575 : vector<4x2xf32> to vector<1x4x2xf32>
    tpu.vector_store %arg3[%c0_290, %c0_291, %c406], %578 {strides = array<i32>} : memref<1x4x512xf32, #tpu.memory_space<vmem>>, vector<1x4x2xf32>,
    %579 = vector.extract_strided_slice %2 {offsets = [0, 288], sizes = [4, 2], strides = [1, 1]} : vector<4x512xf32> to vector<4x2xf32>
    %c0_292 = arith.constant 0 : index
    %c0_293 = arith.constant 0 : index
    %c136 = arith.constant 136 : index
    %580 = vector.load %arg3[%c0_292, %c0_293, %c136] : memref<1x4x512xf32, #tpu.memory_space<vmem>>, vector<1x4x2xf32>
    %581 = vector.shape_cast %580 : vector<1x4x2xf32> to vector<4x2xf32>
    %582 = vector.shape_cast %579 : vector<4x2xf32> to vector<1x4x2xf32>
    tpu.vector_store %arg3[%c0_292, %c0_293, %c136], %582 {strides = array<i32>} : memref<1x4x512xf32, #tpu.memory_space<vmem>>, vector<1x4x2xf32>,
    %583 = vector.extract_strided_slice %2 {offsets = [0, 290], sizes = [4, 2], strides = [1, 1]} : vector<4x512xf32> to vector<4x2xf32>
    %c0_294 = arith.constant 0 : index
    %c0_295 = arith.constant 0 : index
    %c152 = arith.constant 152 : index
    %584 = vector.load %arg3[%c0_294, %c0_295, %c152] : memref<1x4x512xf32, #tpu.memory_space<vmem>>, vector<1x4x2xf32>
    %585 = vector.shape_cast %584 : vector<1x4x2xf32> to vector<4x2xf32>
    %586 = vector.shape_cast %583 : vector<4x2xf32> to vector<1x4x2xf32>
    tpu.vector_store %arg3[%c0_294, %c0_295, %c152], %586 {strides = array<i32>} : memref<1x4x512xf32, #tpu.memory_space<vmem>>, vector<1x4x2xf32>,
    %587 = vector.extract_strided_slice %2 {offsets = [0, 292], sizes = [4, 2], strides = [1, 1]} : vector<4x512xf32> to vector<4x2xf32>
    %c0_296 = arith.constant 0 : index
    %c0_297 = arith.constant 0 : index
    %c392 = arith.constant 392 : index
    %588 = vector.load %arg3[%c0_296, %c0_297, %c392] : memref<1x4x512xf32, #tpu.memory_space<vmem>>, vector<1x4x2xf32>
    %589 = vector.shape_cast %588 : vector<1x4x2xf32> to vector<4x2xf32>
    %590 = vector.shape_cast %587 : vector<4x2xf32> to vector<1x4x2xf32>
    tpu.vector_store %arg3[%c0_296, %c0_297, %c392], %590 {strides = array<i32>} : memref<1x4x512xf32, #tpu.memory_space<vmem>>, vector<1x4x2xf32>,
    %591 = vector.extract_strided_slice %2 {offsets = [0, 294], sizes = [4, 2], strides = [1, 1]} : vector<4x512xf32> to vector<4x2xf32>
    %c0_298 = arith.constant 0 : index
    %c0_299 = arith.constant 0 : index
    %c408 = arith.constant 408 : index
    %592 = vector.load %arg3[%c0_298, %c0_299, %c408] : memref<1x4x512xf32, #tpu.memory_space<vmem>>, vector<1x4x2xf32>
    %593 = vector.shape_cast %592 : vector<1x4x2xf32> to vector<4x2xf32>
    %594 = vector.shape_cast %591 : vector<4x2xf32> to vector<1x4x2xf32>
    tpu.vector_store %arg3[%c0_298, %c0_299, %c408], %594 {strides = array<i32>} : memref<1x4x512xf32, #tpu.memory_space<vmem>>, vector<1x4x2xf32>,
    %595 = vector.extract_strided_slice %2 {offsets = [0, 296], sizes = [4, 2], strides = [1, 1]} : vector<4x512xf32> to vector<4x2xf32>
    %c0_300 = arith.constant 0 : index
    %c0_301 = arith.constant 0 : index
    %c138 = arith.constant 138 : index
    %596 = vector.load %arg3[%c0_300, %c0_301, %c138] : memref<1x4x512xf32, #tpu.memory_space<vmem>>, vector<1x4x2xf32>
    %597 = vector.shape_cast %596 : vector<1x4x2xf32> to vector<4x2xf32>
    %598 = vector.shape_cast %595 : vector<4x2xf32> to vector<1x4x2xf32>
    tpu.vector_store %arg3[%c0_300, %c0_301, %c138], %598 {strides = array<i32>} : memref<1x4x512xf32, #tpu.memory_space<vmem>>, vector<1x4x2xf32>,
    %599 = vector.extract_strided_slice %2 {offsets = [0, 298], sizes = [4, 2], strides = [1, 1]} : vector<4x512xf32> to vector<4x2xf32>
    %c0_302 = arith.constant 0 : index
    %c0_303 = arith.constant 0 : index
    %c154 = arith.constant 154 : index
    %600 = vector.load %arg3[%c0_302, %c0_303, %c154] : memref<1x4x512xf32, #tpu.memory_space<vmem>>, vector<1x4x2xf32>
    %601 = vector.shape_cast %600 : vector<1x4x2xf32> to vector<4x2xf32>
    %602 = vector.shape_cast %599 : vector<4x2xf32> to vector<1x4x2xf32>
    tpu.vector_store %arg3[%c0_302, %c0_303, %c154], %602 {strides = array<i32>} : memref<1x4x512xf32, #tpu.memory_space<vmem>>, vector<1x4x2xf32>,
    %603 = vector.extract_strided_slice %2 {offsets = [0, 300], sizes = [4, 2], strides = [1, 1]} : vector<4x512xf32> to vector<4x2xf32>
    %c0_304 = arith.constant 0 : index
    %c0_305 = arith.constant 0 : index
    %c394 = arith.constant 394 : index
    %604 = vector.load %arg3[%c0_304, %c0_305, %c394] : memref<1x4x512xf32, #tpu.memory_space<vmem>>, vector<1x4x2xf32>
    %605 = vector.shape_cast %604 : vector<1x4x2xf32> to vector<4x2xf32>
    %606 = vector.shape_cast %603 : vector<4x2xf32> to vector<1x4x2xf32>
    tpu.vector_store %arg3[%c0_304, %c0_305, %c394], %606 {strides = array<i32>} : memref<1x4x512xf32, #tpu.memory_space<vmem>>, vector<1x4x2xf32>,
    %607 = vector.extract_strided_slice %2 {offsets = [0, 302], sizes = [4, 2], strides = [1, 1]} : vector<4x512xf32> to vector<4x2xf32>
    %c0_306 = arith.constant 0 : index
    %c0_307 = arith.constant 0 : index
    %c410 = arith.constant 410 : index
    %608 = vector.load %arg3[%c0_306, %c0_307, %c410] : memref<1x4x512xf32, #tpu.memory_space<vmem>>, vector<1x4x2xf32>
    %609 = vector.shape_cast %608 : vector<1x4x2xf32> to vector<4x2xf32>
    %610 = vector.shape_cast %607 : vector<4x2xf32> to vector<1x4x2xf32>
    tpu.vector_store %arg3[%c0_306, %c0_307, %c410], %610 {strides = array<i32>} : memref<1x4x512xf32, #tpu.memory_space<vmem>>, vector<1x4x2xf32>,
    %611 = vector.extract_strided_slice %2 {offsets = [0, 304], sizes = [4, 2], strides = [1, 1]} : vector<4x512xf32> to vector<4x2xf32>
    %c0_308 = arith.constant 0 : index
    %c0_309 = arith.constant 0 : index
    %c140 = arith.constant 140 : index
    %612 = vector.load %arg3[%c0_308, %c0_309, %c140] : memref<1x4x512xf32, #tpu.memory_space<vmem>>, vector<1x4x2xf32>
    %613 = vector.shape_cast %612 : vector<1x4x2xf32> to vector<4x2xf32>
    %614 = vector.shape_cast %611 : vector<4x2xf32> to vector<1x4x2xf32>
    tpu.vector_store %arg3[%c0_308, %c0_309, %c140], %614 {strides = array<i32>} : memref<1x4x512xf32, #tpu.memory_space<vmem>>, vector<1x4x2xf32>,
    %615 = vector.extract_strided_slice %2 {offsets = [0, 306], sizes = [4, 2], strides = [1, 1]} : vector<4x512xf32> to vector<4x2xf32>
    %c0_310 = arith.constant 0 : index
    %c0_311 = arith.constant 0 : index
    %c156 = arith.constant 156 : index
    %616 = vector.load %arg3[%c0_310, %c0_311, %c156] : memref<1x4x512xf32, #tpu.memory_space<vmem>>, vector<1x4x2xf32>
    %617 = vector.shape_cast %616 : vector<1x4x2xf32> to vector<4x2xf32>
    %618 = vector.shape_cast %615 : vector<4x2xf32> to vector<1x4x2xf32>
    tpu.vector_store %arg3[%c0_310, %c0_311, %c156], %618 {strides = array<i32>} : memref<1x4x512xf32, #tpu.memory_space<vmem>>, vector<1x4x2xf32>,
    %619 = vector.extract_strided_slice %2 {offsets = [0, 308], sizes = [4, 2], strides = [1, 1]} : vector<4x512xf32> to vector<4x2xf32>
    %c0_312 = arith.constant 0 : index
    %c0_313 = arith.constant 0 : index
    %c396 = arith.constant 396 : index
    %620 = vector.load %arg3[%c0_312, %c0_313, %c396] : memref<1x4x512xf32, #tpu.memory_space<vmem>>, vector<1x4x2xf32>
    %621 = vector.shape_cast %620 : vector<1x4x2xf32> to vector<4x2xf32>
    %622 = vector.shape_cast %619 : vector<4x2xf32> to vector<1x4x2xf32>
    tpu.vector_store %arg3[%c0_312, %c0_313, %c396], %622 {strides = array<i32>} : memref<1x4x512xf32, #tpu.memory_space<vmem>>, vector<1x4x2xf32>,
    %623 = vector.extract_strided_slice %2 {offsets = [0, 310], sizes = [4, 2], strides = [1, 1]} : vector<4x512xf32> to vector<4x2xf32>
    %c0_314 = arith.constant 0 : index
    %c0_315 = arith.constant 0 : index
    %c412 = arith.constant 412 : index
    %624 = vector.load %arg3[%c0_314, %c0_315, %c412] : memref<1x4x512xf32, #tpu.memory_space<vmem>>, vector<1x4x2xf32>
    %625 = vector.shape_cast %624 : vector<1x4x2xf32> to vector<4x2xf32>
    %626 = vector.shape_cast %623 : vector<4x2xf32> to vector<1x4x2xf32>
    tpu.vector_store %arg3[%c0_314, %c0_315, %c412], %626 {strides = array<i32>} : memref<1x4x512xf32, #tpu.memory_space<vmem>>, vector<1x4x2xf32>,
    %627 = vector.extract_strided_slice %2 {offsets = [0, 312], sizes = [4, 2], strides = [1, 1]} : vector<4x512xf32> to vector<4x2xf32>
    %c0_316 = arith.constant 0 : index
    %c0_317 = arith.constant 0 : index
    %c142 = arith.constant 142 : index
    %628 = vector.load %arg3[%c0_316, %c0_317, %c142] : memref<1x4x512xf32, #tpu.memory_space<vmem>>, vector<1x4x2xf32>
    %629 = vector.shape_cast %628 : vector<1x4x2xf32> to vector<4x2xf32>
    %630 = vector.shape_cast %627 : vector<4x2xf32> to vector<1x4x2xf32>
    tpu.vector_store %arg3[%c0_316, %c0_317, %c142], %630 {strides = array<i32>} : memref<1x4x512xf32, #tpu.memory_space<vmem>>, vector<1x4x2xf32>,
    %631 = vector.extract_strided_slice %2 {offsets = [0, 314], sizes = [4, 2], strides = [1, 1]} : vector<4x512xf32> to vector<4x2xf32>
    %c0_318 = arith.constant 0 : index
    %c0_319 = arith.constant 0 : index
    %c158 = arith.constant 158 : index
    %632 = vector.load %arg3[%c0_318, %c0_319, %c158] : memref<1x4x512xf32, #tpu.memory_space<vmem>>, vector<1x4x2xf32>
    %633 = vector.shape_cast %632 : vector<1x4x2xf32> to vector<4x2xf32>
    %634 = vector.shape_cast %631 : vector<4x2xf32> to vector<1x4x2xf32>
    tpu.vector_store %arg3[%c0_318, %c0_319, %c158], %634 {strides = array<i32>} : memref<1x4x512xf32, #tpu.memory_space<vmem>>, vector<1x4x2xf32>,
    %635 = vector.extract_strided_slice %2 {offsets = [0, 316], sizes = [4, 2], strides = [1, 1]} : vector<4x512xf32> to vector<4x2xf32>
    %c0_320 = arith.constant 0 : index
    %c0_321 = arith.constant 0 : index
    %c398 = arith.constant 398 : index
    %636 = vector.load %arg3[%c0_320, %c0_321, %c398] : memref<1x4x512xf32, #tpu.memory_space<vmem>>, vector<1x4x2xf32>
    %637 = vector.shape_cast %636 : vector<1x4x2xf32> to vector<4x2xf32>
    %638 = vector.shape_cast %635 : vector<4x2xf32> to vector<1x4x2xf32>
    tpu.vector_store %arg3[%c0_320, %c0_321, %c398], %638 {strides = array<i32>} : memref<1x4x512xf32, #tpu.memory_space<vmem>>, vector<1x4x2xf32>,
    %639 = vector.extract_strided_slice %2 {offsets = [0, 318], sizes = [4, 2], strides = [1, 1]} : vector<4x512xf32> to vector<4x2xf32>
    %c0_322 = arith.constant 0 : index
    %c0_323 = arith.constant 0 : index
    %c414 = arith.constant 414 : index
    %640 = vector.load %arg3[%c0_322, %c0_323, %c414] : memref<1x4x512xf32, #tpu.memory_space<vmem>>, vector<1x4x2xf32>
    %641 = vector.shape_cast %640 : vector<1x4x2xf32> to vector<4x2xf32>
    %642 = vector.shape_cast %639 : vector<4x2xf32> to vector<1x4x2xf32>
    tpu.vector_store %arg3[%c0_322, %c0_323, %c414], %642 {strides = array<i32>} : memref<1x4x512xf32, #tpu.memory_space<vmem>>, vector<1x4x2xf32>,
    %643 = vector.extract_strided_slice %2 {offsets = [0, 320], sizes = [4, 2], strides = [1, 1]} : vector<4x512xf32> to vector<4x2xf32>
    %c0_324 = arith.constant 0 : index
    %c0_325 = arith.constant 0 : index
    %c160 = arith.constant 160 : index
    %644 = vector.load %arg3[%c0_324, %c0_325, %c160] : memref<1x4x512xf32, #tpu.memory_space<vmem>>, vector<1x4x2xf32>
    %645 = vector.shape_cast %644 : vector<1x4x2xf32> to vector<4x2xf32>
    %646 = vector.shape_cast %643 : vector<4x2xf32> to vector<1x4x2xf32>
    tpu.vector_store %arg3[%c0_324, %c0_325, %c160], %646 {strides = array<i32>} : memref<1x4x512xf32, #tpu.memory_space<vmem>>, vector<1x4x2xf32>,
    %647 = vector.extract_strided_slice %2 {offsets = [0, 322], sizes = [4, 2], strides = [1, 1]} : vector<4x512xf32> to vector<4x2xf32>
    %c0_326 = arith.constant 0 : index
    %c0_327 = arith.constant 0 : index
    %c176 = arith.constant 176 : index
    %648 = vector.load %arg3[%c0_326, %c0_327, %c176] : memref<1x4x512xf32, #tpu.memory_space<vmem>>, vector<1x4x2xf32>
    %649 = vector.shape_cast %648 : vector<1x4x2xf32> to vector<4x2xf32>
    %650 = vector.shape_cast %647 : vector<4x2xf32> to vector<1x4x2xf32>
    tpu.vector_store %arg3[%c0_326, %c0_327, %c176], %650 {strides = array<i32>} : memref<1x4x512xf32, #tpu.memory_space<vmem>>, vector<1x4x2xf32>,
    %651 = vector.extract_strided_slice %2 {offsets = [0, 324], sizes = [4, 2], strides = [1, 1]} : vector<4x512xf32> to vector<4x2xf32>
    %c0_328 = arith.constant 0 : index
    %c0_329 = arith.constant 0 : index
    %c416 = arith.constant 416 : index
    %652 = vector.load %arg3[%c0_328, %c0_329, %c416] : memref<1x4x512xf32, #tpu.memory_space<vmem>>, vector<1x4x2xf32>
    %653 = vector.shape_cast %652 : vector<1x4x2xf32> to vector<4x2xf32>
    %654 = vector.shape_cast %651 : vector<4x2xf32> to vector<1x4x2xf32>
    tpu.vector_store %arg3[%c0_328, %c0_329, %c416], %654 {strides = array<i32>} : memref<1x4x512xf32, #tpu.memory_space<vmem>>, vector<1x4x2xf32>,
    %655 = vector.extract_strided_slice %2 {offsets = [0, 326], sizes = [4, 2], strides = [1, 1]} : vector<4x512xf32> to vector<4x2xf32>
    %c0_330 = arith.constant 0 : index
    %c0_331 = arith.constant 0 : index
    %c432 = arith.constant 432 : index
    %656 = vector.load %arg3[%c0_330, %c0_331, %c432] : memref<1x4x512xf32, #tpu.memory_space<vmem>>, vector<1x4x2xf32>
    %657 = vector.shape_cast %656 : vector<1x4x2xf32> to vector<4x2xf32>
    %658 = vector.shape_cast %655 : vector<4x2xf32> to vector<1x4x2xf32>
    tpu.vector_store %arg3[%c0_330, %c0_331, %c432], %658 {strides = array<i32>} : memref<1x4x512xf32, #tpu.memory_space<vmem>>, vector<1x4x2xf32>,
    %659 = vector.extract_strided_slice %2 {offsets = [0, 328], sizes = [4, 2], strides = [1, 1]} : vector<4x512xf32> to vector<4x2xf32>
    %c0_332 = arith.constant 0 : index
    %c0_333 = arith.constant 0 : index
    %c162 = arith.constant 162 : index
    %660 = vector.load %arg3[%c0_332, %c0_333, %c162] : memref<1x4x512xf32, #tpu.memory_space<vmem>>, vector<1x4x2xf32>
    %661 = vector.shape_cast %660 : vector<1x4x2xf32> to vector<4x2xf32>
    %662 = vector.shape_cast %659 : vector<4x2xf32> to vector<1x4x2xf32>
    tpu.vector_store %arg3[%c0_332, %c0_333, %c162], %662 {strides = array<i32>} : memref<1x4x512xf32, #tpu.memory_space<vmem>>, vector<1x4x2xf32>,
    %663 = vector.extract_strided_slice %2 {offsets = [0, 330], sizes = [4, 2], strides = [1, 1]} : vector<4x512xf32> to vector<4x2xf32>
    %c0_334 = arith.constant 0 : index
    %c0_335 = arith.constant 0 : index
    %c178 = arith.constant 178 : index
    %664 = vector.load %arg3[%c0_334, %c0_335, %c178] : memref<1x4x512xf32, #tpu.memory_space<vmem>>, vector<1x4x2xf32>
    %665 = vector.shape_cast %664 : vector<1x4x2xf32> to vector<4x2xf32>
    %666 = vector.shape_cast %663 : vector<4x2xf32> to vector<1x4x2xf32>
    tpu.vector_store %arg3[%c0_334, %c0_335, %c178], %666 {strides = array<i32>} : memref<1x4x512xf32, #tpu.memory_space<vmem>>, vector<1x4x2xf32>,
    %667 = vector.extract_strided_slice %2 {offsets = [0, 332], sizes = [4, 2], strides = [1, 1]} : vector<4x512xf32> to vector<4x2xf32>
    %c0_336 = arith.constant 0 : index
    %c0_337 = arith.constant 0 : index
    %c418 = arith.constant 418 : index
    %668 = vector.load %arg3[%c0_336, %c0_337, %c418] : memref<1x4x512xf32, #tpu.memory_space<vmem>>, vector<1x4x2xf32>
    %669 = vector.shape_cast %668 : vector<1x4x2xf32> to vector<4x2xf32>
    %670 = vector.shape_cast %667 : vector<4x2xf32> to vector<1x4x2xf32>
    tpu.vector_store %arg3[%c0_336, %c0_337, %c418], %670 {strides = array<i32>} : memref<1x4x512xf32, #tpu.memory_space<vmem>>, vector<1x4x2xf32>,
    %671 = vector.extract_strided_slice %2 {offsets = [0, 334], sizes = [4, 2], strides = [1, 1]} : vector<4x512xf32> to vector<4x2xf32>
    %c0_338 = arith.constant 0 : index
    %c0_339 = arith.constant 0 : index
    %c434 = arith.constant 434 : index
    %672 = vector.load %arg3[%c0_338, %c0_339, %c434] : memref<1x4x512xf32, #tpu.memory_space<vmem>>, vector<1x4x2xf32>
    %673 = vector.shape_cast %672 : vector<1x4x2xf32> to vector<4x2xf32>
    %674 = vector.shape_cast %671 : vector<4x2xf32> to vector<1x4x2xf32>
    tpu.vector_store %arg3[%c0_338, %c0_339, %c434], %674 {strides = array<i32>} : memref<1x4x512xf32, #tpu.memory_space<vmem>>, vector<1x4x2xf32>,
    %675 = vector.extract_strided_slice %2 {offsets = [0, 336], sizes = [4, 2], strides = [1, 1]} : vector<4x512xf32> to vector<4x2xf32>
    %c0_340 = arith.constant 0 : index
    %c0_341 = arith.constant 0 : index
    %c164 = arith.constant 164 : index
    %676 = vector.load %arg3[%c0_340, %c0_341, %c164] : memref<1x4x512xf32, #tpu.memory_space<vmem>>, vector<1x4x2xf32>
    %677 = vector.shape_cast %676 : vector<1x4x2xf32> to vector<4x2xf32>
    %678 = vector.shape_cast %675 : vector<4x2xf32> to vector<1x4x2xf32>
    tpu.vector_store %arg3[%c0_340, %c0_341, %c164], %678 {strides = array<i32>} : memref<1x4x512xf32, #tpu.memory_space<vmem>>, vector<1x4x2xf32>,
    %679 = vector.extract_strided_slice %2 {offsets = [0, 338], sizes = [4, 2], strides = [1, 1]} : vector<4x512xf32> to vector<4x2xf32>
    %c0_342 = arith.constant 0 : index
    %c0_343 = arith.constant 0 : index
    %c180 = arith.constant 180 : index
    %680 = vector.load %arg3[%c0_342, %c0_343, %c180] : memref<1x4x512xf32, #tpu.memory_space<vmem>>, vector<1x4x2xf32>
    %681 = vector.shape_cast %680 : vector<1x4x2xf32> to vector<4x2xf32>
    %682 = vector.shape_cast %679 : vector<4x2xf32> to vector<1x4x2xf32>
    tpu.vector_store %arg3[%c0_342, %c0_343, %c180], %682 {strides = array<i32>} : memref<1x4x512xf32, #tpu.memory_space<vmem>>, vector<1x4x2xf32>,
    %683 = vector.extract_strided_slice %2 {offsets = [0, 340], sizes = [4, 2], strides = [1, 1]} : vector<4x512xf32> to vector<4x2xf32>
    %c0_344 = arith.constant 0 : index
    %c0_345 = arith.constant 0 : index
    %c420 = arith.constant 420 : index
    %684 = vector.load %arg3[%c0_344, %c0_345, %c420] : memref<1x4x512xf32, #tpu.memory_space<vmem>>, vector<1x4x2xf32>
    %685 = vector.shape_cast %684 : vector<1x4x2xf32> to vector<4x2xf32>
    %686 = vector.shape_cast %683 : vector<4x2xf32> to vector<1x4x2xf32>
    tpu.vector_store %arg3[%c0_344, %c0_345, %c420], %686 {strides = array<i32>} : memref<1x4x512xf32, #tpu.memory_space<vmem>>, vector<1x4x2xf32>,
    %687 = vector.extract_strided_slice %2 {offsets = [0, 342], sizes = [4, 2], strides = [1, 1]} : vector<4x512xf32> to vector<4x2xf32>
    %c0_346 = arith.constant 0 : index
    %c0_347 = arith.constant 0 : index
    %c436 = arith.constant 436 : index
    %688 = vector.load %arg3[%c0_346, %c0_347, %c436] : memref<1x4x512xf32, #tpu.memory_space<vmem>>, vector<1x4x2xf32>
    %689 = vector.shape_cast %688 : vector<1x4x2xf32> to vector<4x2xf32>
    %690 = vector.shape_cast %687 : vector<4x2xf32> to vector<1x4x2xf32>
    tpu.vector_store %arg3[%c0_346, %c0_347, %c436], %690 {strides = array<i32>} : memref<1x4x512xf32, #tpu.memory_space<vmem>>, vector<1x4x2xf32>,
    %691 = vector.extract_strided_slice %2 {offsets = [0, 344], sizes = [4, 2], strides = [1, 1]} : vector<4x512xf32> to vector<4x2xf32>
    %c0_348 = arith.constant 0 : index
    %c0_349 = arith.constant 0 : index
    %c166 = arith.constant 166 : index
    %692 = vector.load %arg3[%c0_348, %c0_349, %c166] : memref<1x4x512xf32, #tpu.memory_space<vmem>>, vector<1x4x2xf32>
    %693 = vector.shape_cast %692 : vector<1x4x2xf32> to vector<4x2xf32>
    %694 = vector.shape_cast %691 : vector<4x2xf32> to vector<1x4x2xf32>
    tpu.vector_store %arg3[%c0_348, %c0_349, %c166], %694 {strides = array<i32>} : memref<1x4x512xf32, #tpu.memory_space<vmem>>, vector<1x4x2xf32>,
    %695 = vector.extract_strided_slice %2 {offsets = [0, 346], sizes = [4, 2], strides = [1, 1]} : vector<4x512xf32> to vector<4x2xf32>
    %c0_350 = arith.constant 0 : index
    %c0_351 = arith.constant 0 : index
    %c182 = arith.constant 182 : index
    %696 = vector.load %arg3[%c0_350, %c0_351, %c182] : memref<1x4x512xf32, #tpu.memory_space<vmem>>, vector<1x4x2xf32>
    %697 = vector.shape_cast %696 : vector<1x4x2xf32> to vector<4x2xf32>
    %698 = vector.shape_cast %695 : vector<4x2xf32> to vector<1x4x2xf32>
    tpu.vector_store %arg3[%c0_350, %c0_351, %c182], %698 {strides = array<i32>} : memref<1x4x512xf32, #tpu.memory_space<vmem>>, vector<1x4x2xf32>,
    %699 = vector.extract_strided_slice %2 {offsets = [0, 348], sizes = [4, 2], strides = [1, 1]} : vector<4x512xf32> to vector<4x2xf32>
    %c0_352 = arith.constant 0 : index
    %c0_353 = arith.constant 0 : index
    %c422 = arith.constant 422 : index
    %700 = vector.load %arg3[%c0_352, %c0_353, %c422] : memref<1x4x512xf32, #tpu.memory_space<vmem>>, vector<1x4x2xf32>
    %701 = vector.shape_cast %700 : vector<1x4x2xf32> to vector<4x2xf32>
    %702 = vector.shape_cast %699 : vector<4x2xf32> to vector<1x4x2xf32>
    tpu.vector_store %arg3[%c0_352, %c0_353, %c422], %702 {strides = array<i32>} : memref<1x4x512xf32, #tpu.memory_space<vmem>>, vector<1x4x2xf32>,
    %703 = vector.extract_strided_slice %2 {offsets = [0, 350], sizes = [4, 2], strides = [1, 1]} : vector<4x512xf32> to vector<4x2xf32>
    %c0_354 = arith.constant 0 : index
    %c0_355 = arith.constant 0 : index
    %c438 = arith.constant 438 : index
    %704 = vector.load %arg3[%c0_354, %c0_355, %c438] : memref<1x4x512xf32, #tpu.memory_space<vmem>>, vector<1x4x2xf32>
    %705 = vector.shape_cast %704 : vector<1x4x2xf32> to vector<4x2xf32>
    %706 = vector.shape_cast %703 : vector<4x2xf32> to vector<1x4x2xf32>
    tpu.vector_store %arg3[%c0_354, %c0_355, %c438], %706 {strides = array<i32>} : memref<1x4x512xf32, #tpu.memory_space<vmem>>, vector<1x4x2xf32>,
    %707 = vector.extract_strided_slice %2 {offsets = [0, 352], sizes = [4, 2], strides = [1, 1]} : vector<4x512xf32> to vector<4x2xf32>
    %c0_356 = arith.constant 0 : index
    %c0_357 = arith.constant 0 : index
    %c168 = arith.constant 168 : index
    %708 = vector.load %arg3[%c0_356, %c0_357, %c168] : memref<1x4x512xf32, #tpu.memory_space<vmem>>, vector<1x4x2xf32>
    %709 = vector.shape_cast %708 : vector<1x4x2xf32> to vector<4x2xf32>
    %710 = vector.shape_cast %707 : vector<4x2xf32> to vector<1x4x2xf32>
    tpu.vector_store %arg3[%c0_356, %c0_357, %c168], %710 {strides = array<i32>} : memref<1x4x512xf32, #tpu.memory_space<vmem>>, vector<1x4x2xf32>,
    %711 = vector.extract_strided_slice %2 {offsets = [0, 354], sizes = [4, 2], strides = [1, 1]} : vector<4x512xf32> to vector<4x2xf32>
    %c0_358 = arith.constant 0 : index
    %c0_359 = arith.constant 0 : index
    %c184 = arith.constant 184 : index
    %712 = vector.load %arg3[%c0_358, %c0_359, %c184] : memref<1x4x512xf32, #tpu.memory_space<vmem>>, vector<1x4x2xf32>
    %713 = vector.shape_cast %712 : vector<1x4x2xf32> to vector<4x2xf32>
    %714 = vector.shape_cast %711 : vector<4x2xf32> to vector<1x4x2xf32>
    tpu.vector_store %arg3[%c0_358, %c0_359, %c184], %714 {strides = array<i32>} : memref<1x4x512xf32, #tpu.memory_space<vmem>>, vector<1x4x2xf32>,
    %715 = vector.extract_strided_slice %2 {offsets = [0, 356], sizes = [4, 2], strides = [1, 1]} : vector<4x512xf32> to vector<4x2xf32>
    %c0_360 = arith.constant 0 : index
    %c0_361 = arith.constant 0 : index
    %c424 = arith.constant 424 : index
    %716 = vector.load %arg3[%c0_360, %c0_361, %c424] : memref<1x4x512xf32, #tpu.memory_space<vmem>>, vector<1x4x2xf32>
    %717 = vector.shape_cast %716 : vector<1x4x2xf32> to vector<4x2xf32>
    %718 = vector.shape_cast %715 : vector<4x2xf32> to vector<1x4x2xf32>
    tpu.vector_store %arg3[%c0_360, %c0_361, %c424], %718 {strides = array<i32>} : memref<1x4x512xf32, #tpu.memory_space<vmem>>, vector<1x4x2xf32>,
    %719 = vector.extract_strided_slice %2 {offsets = [0, 358], sizes = [4, 2], strides = [1, 1]} : vector<4x512xf32> to vector<4x2xf32>
    %c0_362 = arith.constant 0 : index
    %c0_363 = arith.constant 0 : index
    %c440 = arith.constant 440 : index
    %720 = vector.load %arg3[%c0_362, %c0_363, %c440] : memref<1x4x512xf32, #tpu.memory_space<vmem>>, vector<1x4x2xf32>
    %721 = vector.shape_cast %720 : vector<1x4x2xf32> to vector<4x2xf32>
    %722 = vector.shape_cast %719 : vector<4x2xf32> to vector<1x4x2xf32>
    tpu.vector_store %arg3[%c0_362, %c0_363, %c440], %722 {strides = array<i32>} : memref<1x4x512xf32, #tpu.memory_space<vmem>>, vector<1x4x2xf32>,
    %723 = vector.extract_strided_slice %2 {offsets = [0, 360], sizes = [4, 2], strides = [1, 1]} : vector<4x512xf32> to vector<4x2xf32>
    %c0_364 = arith.constant 0 : index
    %c0_365 = arith.constant 0 : index
    %c170 = arith.constant 170 : index
    %724 = vector.load %arg3[%c0_364, %c0_365, %c170] : memref<1x4x512xf32, #tpu.memory_space<vmem>>, vector<1x4x2xf32>
    %725 = vector.shape_cast %724 : vector<1x4x2xf32> to vector<4x2xf32>
    %726 = vector.shape_cast %723 : vector<4x2xf32> to vector<1x4x2xf32>
    tpu.vector_store %arg3[%c0_364, %c0_365, %c170], %726 {strides = array<i32>} : memref<1x4x512xf32, #tpu.memory_space<vmem>>, vector<1x4x2xf32>,
    %727 = vector.extract_strided_slice %2 {offsets = [0, 362], sizes = [4, 2], strides = [1, 1]} : vector<4x512xf32> to vector<4x2xf32>
    %c0_366 = arith.constant 0 : index
    %c0_367 = arith.constant 0 : index
    %c186 = arith.constant 186 : index
    %728 = vector.load %arg3[%c0_366, %c0_367, %c186] : memref<1x4x512xf32, #tpu.memory_space<vmem>>, vector<1x4x2xf32>
    %729 = vector.shape_cast %728 : vector<1x4x2xf32> to vector<4x2xf32>
    %730 = vector.shape_cast %727 : vector<4x2xf32> to vector<1x4x2xf32>
    tpu.vector_store %arg3[%c0_366, %c0_367, %c186], %730 {strides = array<i32>} : memref<1x4x512xf32, #tpu.memory_space<vmem>>, vector<1x4x2xf32>,
    %731 = vector.extract_strided_slice %2 {offsets = [0, 364], sizes = [4, 2], strides = [1, 1]} : vector<4x512xf32> to vector<4x2xf32>
    %c0_368 = arith.constant 0 : index
    %c0_369 = arith.constant 0 : index
    %c426 = arith.constant 426 : index
    %732 = vector.load %arg3[%c0_368, %c0_369, %c426] : memref<1x4x512xf32, #tpu.memory_space<vmem>>, vector<1x4x2xf32>
    %733 = vector.shape_cast %732 : vector<1x4x2xf32> to vector<4x2xf32>
    %734 = vector.shape_cast %731 : vector<4x2xf32> to vector<1x4x2xf32>
    tpu.vector_store %arg3[%c0_368, %c0_369, %c426], %734 {strides = array<i32>} : memref<1x4x512xf32, #tpu.memory_space<vmem>>, vector<1x4x2xf32>,
    %735 = vector.extract_strided_slice %2 {offsets = [0, 366], sizes = [4, 2], strides = [1, 1]} : vector<4x512xf32> to vector<4x2xf32>
    %c0_370 = arith.constant 0 : index
    %c0_371 = arith.constant 0 : index
    %c442 = arith.constant 442 : index
    %736 = vector.load %arg3[%c0_370, %c0_371, %c442] : memref<1x4x512xf32, #tpu.memory_space<vmem>>, vector<1x4x2xf32>
    %737 = vector.shape_cast %736 : vector<1x4x2xf32> to vector<4x2xf32>
    %738 = vector.shape_cast %735 : vector<4x2xf32> to vector<1x4x2xf32>
    tpu.vector_store %arg3[%c0_370, %c0_371, %c442], %738 {strides = array<i32>} : memref<1x4x512xf32, #tpu.memory_space<vmem>>, vector<1x4x2xf32>,
    %739 = vector.extract_strided_slice %2 {offsets = [0, 368], sizes = [4, 2], strides = [1, 1]} : vector<4x512xf32> to vector<4x2xf32>
    %c0_372 = arith.constant 0 : index
    %c0_373 = arith.constant 0 : index
    %c172 = arith.constant 172 : index
    %740 = vector.load %arg3[%c0_372, %c0_373, %c172] : memref<1x4x512xf32, #tpu.memory_space<vmem>>, vector<1x4x2xf32>
    %741 = vector.shape_cast %740 : vector<1x4x2xf32> to vector<4x2xf32>
    %742 = vector.shape_cast %739 : vector<4x2xf32> to vector<1x4x2xf32>
    tpu.vector_store %arg3[%c0_372, %c0_373, %c172], %742 {strides = array<i32>} : memref<1x4x512xf32, #tpu.memory_space<vmem>>, vector<1x4x2xf32>,
    %743 = vector.extract_strided_slice %2 {offsets = [0, 370], sizes = [4, 2], strides = [1, 1]} : vector<4x512xf32> to vector<4x2xf32>
    %c0_374 = arith.constant 0 : index
    %c0_375 = arith.constant 0 : index
    %c188 = arith.constant 188 : index
    %744 = vector.load %arg3[%c0_374, %c0_375, %c188] : memref<1x4x512xf32, #tpu.memory_space<vmem>>, vector<1x4x2xf32>
    %745 = vector.shape_cast %744 : vector<1x4x2xf32> to vector<4x2xf32>
    %746 = vector.shape_cast %743 : vector<4x2xf32> to vector<1x4x2xf32>
    tpu.vector_store %arg3[%c0_374, %c0_375, %c188], %746 {strides = array<i32>} : memref<1x4x512xf32, #tpu.memory_space<vmem>>, vector<1x4x2xf32>,
    %747 = vector.extract_strided_slice %2 {offsets = [0, 372], sizes = [4, 2], strides = [1, 1]} : vector<4x512xf32> to vector<4x2xf32>
    %c0_376 = arith.constant 0 : index
    %c0_377 = arith.constant 0 : index
    %c428 = arith.constant 428 : index
    %748 = vector.load %arg3[%c0_376, %c0_377, %c428] : memref<1x4x512xf32, #tpu.memory_space<vmem>>, vector<1x4x2xf32>
    %749 = vector.shape_cast %748 : vector<1x4x2xf32> to vector<4x2xf32>
    %750 = vector.shape_cast %747 : vector<4x2xf32> to vector<1x4x2xf32>
    tpu.vector_store %arg3[%c0_376, %c0_377, %c428], %750 {strides = array<i32>} : memref<1x4x512xf32, #tpu.memory_space<vmem>>, vector<1x4x2xf32>,
    %751 = vector.extract_strided_slice %2 {offsets = [0, 374], sizes = [4, 2], strides = [1, 1]} : vector<4x512xf32> to vector<4x2xf32>
    %c0_378 = arith.constant 0 : index
    %c0_379 = arith.constant 0 : index
    %c444 = arith.constant 444 : index
    %752 = vector.load %arg3[%c0_378, %c0_379, %c444] : memref<1x4x512xf32, #tpu.memory_space<vmem>>, vector<1x4x2xf32>
    %753 = vector.shape_cast %752 : vector<1x4x2xf32> to vector<4x2xf32>
    %754 = vector.shape_cast %751 : vector<4x2xf32> to vector<1x4x2xf32>
    tpu.vector_store %arg3[%c0_378, %c0_379, %c444], %754 {strides = array<i32>} : memref<1x4x512xf32, #tpu.memory_space<vmem>>, vector<1x4x2xf32>,
    %755 = vector.extract_strided_slice %2 {offsets = [0, 376], sizes = [4, 2], strides = [1, 1]} : vector<4x512xf32> to vector<4x2xf32>
    %c0_380 = arith.constant 0 : index
    %c0_381 = arith.constant 0 : index
    %c174 = arith.constant 174 : index
    %756 = vector.load %arg3[%c0_380, %c0_381, %c174] : memref<1x4x512xf32, #tpu.memory_space<vmem>>, vector<1x4x2xf32>
    %757 = vector.shape_cast %756 : vector<1x4x2xf32> to vector<4x2xf32>
    %758 = vector.shape_cast %755 : vector<4x2xf32> to vector<1x4x2xf32>
    tpu.vector_store %arg3[%c0_380, %c0_381, %c174], %758 {strides = array<i32>} : memref<1x4x512xf32, #tpu.memory_space<vmem>>, vector<1x4x2xf32>,
    %759 = vector.extract_strided_slice %2 {offsets = [0, 378], sizes = [4, 2], strides = [1, 1]} : vector<4x512xf32> to vector<4x2xf32>
    %c0_382 = arith.constant 0 : index
    %c0_383 = arith.constant 0 : index
    %c190 = arith.constant 190 : index
    %760 = vector.load %arg3[%c0_382, %c0_383, %c190] : memref<1x4x512xf32, #tpu.memory_space<vmem>>, vector<1x4x2xf32>
    %761 = vector.shape_cast %760 : vector<1x4x2xf32> to vector<4x2xf32>
    %762 = vector.shape_cast %759 : vector<4x2xf32> to vector<1x4x2xf32>
    tpu.vector_store %arg3[%c0_382, %c0_383, %c190], %762 {strides = array<i32>} : memref<1x4x512xf32, #tpu.memory_space<vmem>>, vector<1x4x2xf32>,
    %763 = vector.extract_strided_slice %2 {offsets = [0, 380], sizes = [4, 2], strides = [1, 1]} : vector<4x512xf32> to vector<4x2xf32>
    %c0_384 = arith.constant 0 : index
    %c0_385 = arith.constant 0 : index
    %c430 = arith.constant 430 : index
    %764 = vector.load %arg3[%c0_384, %c0_385, %c430] : memref<1x4x512xf32, #tpu.memory_space<vmem>>, vector<1x4x2xf32>
    %765 = vector.shape_cast %764 : vector<1x4x2xf32> to vector<4x2xf32>
    %766 = vector.shape_cast %763 : vector<4x2xf32> to vector<1x4x2xf32>
    tpu.vector_store %arg3[%c0_384, %c0_385, %c430], %766 {strides = array<i32>} : memref<1x4x512xf32, #tpu.memory_space<vmem>>, vector<1x4x2xf32>,
    %767 = vector.extract_strided_slice %2 {offsets = [0, 382], sizes = [4, 2], strides = [1, 1]} : vector<4x512xf32> to vector<4x2xf32>
    %c0_386 = arith.constant 0 : index
    %c0_387 = arith.constant 0 : index
    %c446 = arith.constant 446 : index
    %768 = vector.load %arg3[%c0_386, %c0_387, %c446] : memref<1x4x512xf32, #tpu.memory_space<vmem>>, vector<1x4x2xf32>
    %769 = vector.shape_cast %768 : vector<1x4x2xf32> to vector<4x2xf32>
    %770 = vector.shape_cast %767 : vector<4x2xf32> to vector<1x4x2xf32>
    tpu.vector_store %arg3[%c0_386, %c0_387, %c446], %770 {strides = array<i32>} : memref<1x4x512xf32, #tpu.memory_space<vmem>>, vector<1x4x2xf32>,
    %771 = vector.extract_strided_slice %2 {offsets = [0, 384], sizes = [4, 2], strides = [1, 1]} : vector<4x512xf32> to vector<4x2xf32>
    %c0_388 = arith.constant 0 : index
    %c0_389 = arith.constant 0 : index
    %c192 = arith.constant 192 : index
    %772 = vector.load %arg3[%c0_388, %c0_389, %c192] : memref<1x4x512xf32, #tpu.memory_space<vmem>>, vector<1x4x2xf32>
    %773 = vector.shape_cast %772 : vector<1x4x2xf32> to vector<4x2xf32>
    %774 = vector.shape_cast %771 : vector<4x2xf32> to vector<1x4x2xf32>
    tpu.vector_store %arg3[%c0_388, %c0_389, %c192], %774 {strides = array<i32>} : memref<1x4x512xf32, #tpu.memory_space<vmem>>, vector<1x4x2xf32>,
    %775 = vector.extract_strided_slice %2 {offsets = [0, 386], sizes = [4, 2], strides = [1, 1]} : vector<4x512xf32> to vector<4x2xf32>
    %c0_390 = arith.constant 0 : index
    %c0_391 = arith.constant 0 : index
    %c208 = arith.constant 208 : index
    %776 = vector.load %arg3[%c0_390, %c0_391, %c208] : memref<1x4x512xf32, #tpu.memory_space<vmem>>, vector<1x4x2xf32>
    %777 = vector.shape_cast %776 : vector<1x4x2xf32> to vector<4x2xf32>
    %778 = vector.shape_cast %775 : vector<4x2xf32> to vector<1x4x2xf32>
    tpu.vector_store %arg3[%c0_390, %c0_391, %c208], %778 {strides = array<i32>} : memref<1x4x512xf32, #tpu.memory_space<vmem>>, vector<1x4x2xf32>,
    %779 = vector.extract_strided_slice %2 {offsets = [0, 388], sizes = [4, 2], strides = [1, 1]} : vector<4x512xf32> to vector<4x2xf32>
    %c0_392 = arith.constant 0 : index
    %c0_393 = arith.constant 0 : index
    %c448 = arith.constant 448 : index
    %780 = vector.load %arg3[%c0_392, %c0_393, %c448] : memref<1x4x512xf32, #tpu.memory_space<vmem>>, vector<1x4x2xf32>
    %781 = vector.shape_cast %780 : vector<1x4x2xf32> to vector<4x2xf32>
    %782 = vector.shape_cast %779 : vector<4x2xf32> to vector<1x4x2xf32>
    tpu.vector_store %arg3[%c0_392, %c0_393, %c448], %782 {strides = array<i32>} : memref<1x4x512xf32, #tpu.memory_space<vmem>>, vector<1x4x2xf32>,
    %783 = vector.extract_strided_slice %2 {offsets = [0, 390], sizes = [4, 2], strides = [1, 1]} : vector<4x512xf32> to vector<4x2xf32>
    %c0_394 = arith.constant 0 : index
    %c0_395 = arith.constant 0 : index
    %c464 = arith.constant 464 : index
    %784 = vector.load %arg3[%c0_394, %c0_395, %c464] : memref<1x4x512xf32, #tpu.memory_space<vmem>>, vector<1x4x2xf32>
    %785 = vector.shape_cast %784 : vector<1x4x2xf32> to vector<4x2xf32>
    %786 = vector.shape_cast %783 : vector<4x2xf32> to vector<1x4x2xf32>
    tpu.vector_store %arg3[%c0_394, %c0_395, %c464], %786 {strides = array<i32>} : memref<1x4x512xf32, #tpu.memory_space<vmem>>, vector<1x4x2xf32>,
    %787 = vector.extract_strided_slice %2 {offsets = [0, 392], sizes = [4, 2], strides = [1, 1]} : vector<4x512xf32> to vector<4x2xf32>
    %c0_396 = arith.constant 0 : index
    %c0_397 = arith.constant 0 : index
    %c194 = arith.constant 194 : index
    %788 = vector.load %arg3[%c0_396, %c0_397, %c194] : memref<1x4x512xf32, #tpu.memory_space<vmem>>, vector<1x4x2xf32>
    %789 = vector.shape_cast %788 : vector<1x4x2xf32> to vector<4x2xf32>
    %790 = vector.shape_cast %787 : vector<4x2xf32> to vector<1x4x2xf32>
    tpu.vector_store %arg3[%c0_396, %c0_397, %c194], %790 {strides = array<i32>} : memref<1x4x512xf32, #tpu.memory_space<vmem>>, vector<1x4x2xf32>,
    %791 = vector.extract_strided_slice %2 {offsets = [0, 394], sizes = [4, 2], strides = [1, 1]} : vector<4x512xf32> to vector<4x2xf32>
    %c0_398 = arith.constant 0 : index
    %c0_399 = arith.constant 0 : index
    %c210 = arith.constant 210 : index
    %792 = vector.load %arg3[%c0_398, %c0_399, %c210] : memref<1x4x512xf32, #tpu.memory_space<vmem>>, vector<1x4x2xf32>
    %793 = vector.shape_cast %792 : vector<1x4x2xf32> to vector<4x2xf32>
    %794 = vector.shape_cast %791 : vector<4x2xf32> to vector<1x4x2xf32>
    tpu.vector_store %arg3[%c0_398, %c0_399, %c210], %794 {strides = array<i32>} : memref<1x4x512xf32, #tpu.memory_space<vmem>>, vector<1x4x2xf32>,
    %795 = vector.extract_strided_slice %2 {offsets = [0, 396], sizes = [4, 2], strides = [1, 1]} : vector<4x512xf32> to vector<4x2xf32>
    %c0_400 = arith.constant 0 : index
    %c0_401 = arith.constant 0 : index
    %c450 = arith.constant 450 : index
    %796 = vector.load %arg3[%c0_400, %c0_401, %c450] : memref<1x4x512xf32, #tpu.memory_space<vmem>>, vector<1x4x2xf32>
    %797 = vector.shape_cast %796 : vector<1x4x2xf32> to vector<4x2xf32>
    %798 = vector.shape_cast %795 : vector<4x2xf32> to vector<1x4x2xf32>
    tpu.vector_store %arg3[%c0_400, %c0_401, %c450], %798 {strides = array<i32>} : memref<1x4x512xf32, #tpu.memory_space<vmem>>, vector<1x4x2xf32>,
    %799 = vector.extract_strided_slice %2 {offsets = [0, 398], sizes = [4, 2], strides = [1, 1]} : vector<4x512xf32> to vector<4x2xf32>
    %c0_402 = arith.constant 0 : index
    %c0_403 = arith.constant 0 : index
    %c466 = arith.constant 466 : index
    %800 = vector.load %arg3[%c0_402, %c0_403, %c466] : memref<1x4x512xf32, #tpu.memory_space<vmem>>, vector<1x4x2xf32>
    %801 = vector.shape_cast %800 : vector<1x4x2xf32> to vector<4x2xf32>
    %802 = vector.shape_cast %799 : vector<4x2xf32> to vector<1x4x2xf32>
    tpu.vector_store %arg3[%c0_402, %c0_403, %c466], %802 {strides = array<i32>} : memref<1x4x512xf32, #tpu.memory_space<vmem>>, vector<1x4x2xf32>,
    %803 = vector.extract_strided_slice %2 {offsets = [0, 400], sizes = [4, 2], strides = [1, 1]} : vector<4x512xf32> to vector<4x2xf32>
    %c0_404 = arith.constant 0 : index
    %c0_405 = arith.constant 0 : index
    %c196 = arith.constant 196 : index
    %804 = vector.load %arg3[%c0_404, %c0_405, %c196] : memref<1x4x512xf32, #tpu.memory_space<vmem>>, vector<1x4x2xf32>
    %805 = vector.shape_cast %804 : vector<1x4x2xf32> to vector<4x2xf32>
    %806 = vector.shape_cast %803 : vector<4x2xf32> to vector<1x4x2xf32>
    tpu.vector_store %arg3[%c0_404, %c0_405, %c196], %806 {strides = array<i32>} : memref<1x4x512xf32, #tpu.memory_space<vmem>>, vector<1x4x2xf32>,
    %807 = vector.extract_strided_slice %2 {offsets = [0, 402], sizes = [4, 2], strides = [1, 1]} : vector<4x512xf32> to vector<4x2xf32>
    %c0_406 = arith.constant 0 : index
    %c0_407 = arith.constant 0 : index
    %c212 = arith.constant 212 : index
    %808 = vector.load %arg3[%c0_406, %c0_407, %c212] : memref<1x4x512xf32, #tpu.memory_space<vmem>>, vector<1x4x2xf32>
    %809 = vector.shape_cast %808 : vector<1x4x2xf32> to vector<4x2xf32>
    %810 = vector.shape_cast %807 : vector<4x2xf32> to vector<1x4x2xf32>
    tpu.vector_store %arg3[%c0_406, %c0_407, %c212], %810 {strides = array<i32>} : memref<1x4x512xf32, #tpu.memory_space<vmem>>, vector<1x4x2xf32>,
    %811 = vector.extract_strided_slice %2 {offsets = [0, 404], sizes = [4, 2], strides = [1, 1]} : vector<4x512xf32> to vector<4x2xf32>
    %c0_408 = arith.constant 0 : index
    %c0_409 = arith.constant 0 : index
    %c452 = arith.constant 452 : index
    %812 = vector.load %arg3[%c0_408, %c0_409, %c452] : memref<1x4x512xf32, #tpu.memory_space<vmem>>, vector<1x4x2xf32>
    %813 = vector.shape_cast %812 : vector<1x4x2xf32> to vector<4x2xf32>
    %814 = vector.shape_cast %811 : vector<4x2xf32> to vector<1x4x2xf32>
    tpu.vector_store %arg3[%c0_408, %c0_409, %c452], %814 {strides = array<i32>} : memref<1x4x512xf32, #tpu.memory_space<vmem>>, vector<1x4x2xf32>,
    %815 = vector.extract_strided_slice %2 {offsets = [0, 406], sizes = [4, 2], strides = [1, 1]} : vector<4x512xf32> to vector<4x2xf32>
    %c0_410 = arith.constant 0 : index
    %c0_411 = arith.constant 0 : index
    %c468 = arith.constant 468 : index
    %816 = vector.load %arg3[%c0_410, %c0_411, %c468] : memref<1x4x512xf32, #tpu.memory_space<vmem>>, vector<1x4x2xf32>
    %817 = vector.shape_cast %816 : vector<1x4x2xf32> to vector<4x2xf32>
    %818 = vector.shape_cast %815 : vector<4x2xf32> to vector<1x4x2xf32>
    tpu.vector_store %arg3[%c0_410, %c0_411, %c468], %818 {strides = array<i32>} : memref<1x4x512xf32, #tpu.memory_space<vmem>>, vector<1x4x2xf32>,
    %819 = vector.extract_strided_slice %2 {offsets = [0, 408], sizes = [4, 2], strides = [1, 1]} : vector<4x512xf32> to vector<4x2xf32>
    %c0_412 = arith.constant 0 : index
    %c0_413 = arith.constant 0 : index
    %c198 = arith.constant 198 : index
    %820 = vector.load %arg3[%c0_412, %c0_413, %c198] : memref<1x4x512xf32, #tpu.memory_space<vmem>>, vector<1x4x2xf32>
    %821 = vector.shape_cast %820 : vector<1x4x2xf32> to vector<4x2xf32>
    %822 = vector.shape_cast %819 : vector<4x2xf32> to vector<1x4x2xf32>
    tpu.vector_store %arg3[%c0_412, %c0_413, %c198], %822 {strides = array<i32>} : memref<1x4x512xf32, #tpu.memory_space<vmem>>, vector<1x4x2xf32>,
    %823 = vector.extract_strided_slice %2 {offsets = [0, 410], sizes = [4, 2], strides = [1, 1]} : vector<4x512xf32> to vector<4x2xf32>
    %c0_414 = arith.constant 0 : index
    %c0_415 = arith.constant 0 : index
    %c214 = arith.constant 214 : index
    %824 = vector.load %arg3[%c0_414, %c0_415, %c214] : memref<1x4x512xf32, #tpu.memory_space<vmem>>, vector<1x4x2xf32>
    %825 = vector.shape_cast %824 : vector<1x4x2xf32> to vector<4x2xf32>
    %826 = vector.shape_cast %823 : vector<4x2xf32> to vector<1x4x2xf32>
    tpu.vector_store %arg3[%c0_414, %c0_415, %c214], %826 {strides = array<i32>} : memref<1x4x512xf32, #tpu.memory_space<vmem>>, vector<1x4x2xf32>,
    %827 = vector.extract_strided_slice %2 {offsets = [0, 412], sizes = [4, 2], strides = [1, 1]} : vector<4x512xf32> to vector<4x2xf32>
    %c0_416 = arith.constant 0 : index
    %c0_417 = arith.constant 0 : index
    %c454 = arith.constant 454 : index
    %828 = vector.load %arg3[%c0_416, %c0_417, %c454] : memref<1x4x512xf32, #tpu.memory_space<vmem>>, vector<1x4x2xf32>
    %829 = vector.shape_cast %828 : vector<1x4x2xf32> to vector<4x2xf32>
    %830 = vector.shape_cast %827 : vector<4x2xf32> to vector<1x4x2xf32>
    tpu.vector_store %arg3[%c0_416, %c0_417, %c454], %830 {strides = array<i32>} : memref<1x4x512xf32, #tpu.memory_space<vmem>>, vector<1x4x2xf32>,
    %831 = vector.extract_strided_slice %2 {offsets = [0, 414], sizes = [4, 2], strides = [1, 1]} : vector<4x512xf32> to vector<4x2xf32>
    %c0_418 = arith.constant 0 : index
    %c0_419 = arith.constant 0 : index
    %c470 = arith.constant 470 : index
    %832 = vector.load %arg3[%c0_418, %c0_419, %c470] : memref<1x4x512xf32, #tpu.memory_space<vmem>>, vector<1x4x2xf32>
    %833 = vector.shape_cast %832 : vector<1x4x2xf32> to vector<4x2xf32>
    %834 = vector.shape_cast %831 : vector<4x2xf32> to vector<1x4x2xf32>
    tpu.vector_store %arg3[%c0_418, %c0_419, %c470], %834 {strides = array<i32>} : memref<1x4x512xf32, #tpu.memory_space<vmem>>, vector<1x4x2xf32>,
    %835 = vector.extract_strided_slice %2 {offsets = [0, 416], sizes = [4, 2], strides = [1, 1]} : vector<4x512xf32> to vector<4x2xf32>
    %c0_420 = arith.constant 0 : index
    %c0_421 = arith.constant 0 : index
    %c200 = arith.constant 200 : index
    %836 = vector.load %arg3[%c0_420, %c0_421, %c200] : memref<1x4x512xf32, #tpu.memory_space<vmem>>, vector<1x4x2xf32>
    %837 = vector.shape_cast %836 : vector<1x4x2xf32> to vector<4x2xf32>
    %838 = vector.shape_cast %835 : vector<4x2xf32> to vector<1x4x2xf32>
    tpu.vector_store %arg3[%c0_420, %c0_421, %c200], %838 {strides = array<i32>} : memref<1x4x512xf32, #tpu.memory_space<vmem>>, vector<1x4x2xf32>,
    %839 = vector.extract_strided_slice %2 {offsets = [0, 418], sizes = [4, 2], strides = [1, 1]} : vector<4x512xf32> to vector<4x2xf32>
    %c0_422 = arith.constant 0 : index
    %c0_423 = arith.constant 0 : index
    %c216 = arith.constant 216 : index
    %840 = vector.load %arg3[%c0_422, %c0_423, %c216] : memref<1x4x512xf32, #tpu.memory_space<vmem>>, vector<1x4x2xf32>
    %841 = vector.shape_cast %840 : vector<1x4x2xf32> to vector<4x2xf32>
    %842 = vector.shape_cast %839 : vector<4x2xf32> to vector<1x4x2xf32>
    tpu.vector_store %arg3[%c0_422, %c0_423, %c216], %842 {strides = array<i32>} : memref<1x4x512xf32, #tpu.memory_space<vmem>>, vector<1x4x2xf32>,
    %843 = vector.extract_strided_slice %2 {offsets = [0, 420], sizes = [4, 2], strides = [1, 1]} : vector<4x512xf32> to vector<4x2xf32>
    %c0_424 = arith.constant 0 : index
    %c0_425 = arith.constant 0 : index
    %c456 = arith.constant 456 : index
    %844 = vector.load %arg3[%c0_424, %c0_425, %c456] : memref<1x4x512xf32, #tpu.memory_space<vmem>>, vector<1x4x2xf32>
    %845 = vector.shape_cast %844 : vector<1x4x2xf32> to vector<4x2xf32>
    %846 = vector.shape_cast %843 : vector<4x2xf32> to vector<1x4x2xf32>
    tpu.vector_store %arg3[%c0_424, %c0_425, %c456], %846 {strides = array<i32>} : memref<1x4x512xf32, #tpu.memory_space<vmem>>, vector<1x4x2xf32>,
    %847 = vector.extract_strided_slice %2 {offsets = [0, 422], sizes = [4, 2], strides = [1, 1]} : vector<4x512xf32> to vector<4x2xf32>
    %c0_426 = arith.constant 0 : index
    %c0_427 = arith.constant 0 : index
    %c472 = arith.constant 472 : index
    %848 = vector.load %arg3[%c0_426, %c0_427, %c472] : memref<1x4x512xf32, #tpu.memory_space<vmem>>, vector<1x4x2xf32>
    %849 = vector.shape_cast %848 : vector<1x4x2xf32> to vector<4x2xf32>
    %850 = vector.shape_cast %847 : vector<4x2xf32> to vector<1x4x2xf32>
    tpu.vector_store %arg3[%c0_426, %c0_427, %c472], %850 {strides = array<i32>} : memref<1x4x512xf32, #tpu.memory_space<vmem>>, vector<1x4x2xf32>,
    %851 = vector.extract_strided_slice %2 {offsets = [0, 424], sizes = [4, 2], strides = [1, 1]} : vector<4x512xf32> to vector<4x2xf32>
    %c0_428 = arith.constant 0 : index
    %c0_429 = arith.constant 0 : index
    %c202 = arith.constant 202 : index
    %852 = vector.load %arg3[%c0_428, %c0_429, %c202] : memref<1x4x512xf32, #tpu.memory_space<vmem>>, vector<1x4x2xf32>
    %853 = vector.shape_cast %852 : vector<1x4x2xf32> to vector<4x2xf32>
    %854 = vector.shape_cast %851 : vector<4x2xf32> to vector<1x4x2xf32>
    tpu.vector_store %arg3[%c0_428, %c0_429, %c202], %854 {strides = array<i32>} : memref<1x4x512xf32, #tpu.memory_space<vmem>>, vector<1x4x2xf32>,
    %855 = vector.extract_strided_slice %2 {offsets = [0, 426], sizes = [4, 2], strides = [1, 1]} : vector<4x512xf32> to vector<4x2xf32>
    %c0_430 = arith.constant 0 : index
    %c0_431 = arith.constant 0 : index
    %c218 = arith.constant 218 : index
    %856 = vector.load %arg3[%c0_430, %c0_431, %c218] : memref<1x4x512xf32, #tpu.memory_space<vmem>>, vector<1x4x2xf32>
    %857 = vector.shape_cast %856 : vector<1x4x2xf32> to vector<4x2xf32>
    %858 = vector.shape_cast %855 : vector<4x2xf32> to vector<1x4x2xf32>
    tpu.vector_store %arg3[%c0_430, %c0_431, %c218], %858 {strides = array<i32>} : memref<1x4x512xf32, #tpu.memory_space<vmem>>, vector<1x4x2xf32>,
    %859 = vector.extract_strided_slice %2 {offsets = [0, 428], sizes = [4, 2], strides = [1, 1]} : vector<4x512xf32> to vector<4x2xf32>
    %c0_432 = arith.constant 0 : index
    %c0_433 = arith.constant 0 : index
    %c458 = arith.constant 458 : index
    %860 = vector.load %arg3[%c0_432, %c0_433, %c458] : memref<1x4x512xf32, #tpu.memory_space<vmem>>, vector<1x4x2xf32>
    %861 = vector.shape_cast %860 : vector<1x4x2xf32> to vector<4x2xf32>
    %862 = vector.shape_cast %859 : vector<4x2xf32> to vector<1x4x2xf32>
    tpu.vector_store %arg3[%c0_432, %c0_433, %c458], %862 {strides = array<i32>} : memref<1x4x512xf32, #tpu.memory_space<vmem>>, vector<1x4x2xf32>,
    %863 = vector.extract_strided_slice %2 {offsets = [0, 430], sizes = [4, 2], strides = [1, 1]} : vector<4x512xf32> to vector<4x2xf32>
    %c0_434 = arith.constant 0 : index
    %c0_435 = arith.constant 0 : index
    %c474 = arith.constant 474 : index
    %864 = vector.load %arg3[%c0_434, %c0_435, %c474] : memref<1x4x512xf32, #tpu.memory_space<vmem>>, vector<1x4x2xf32>
    %865 = vector.shape_cast %864 : vector<1x4x2xf32> to vector<4x2xf32>
    %866 = vector.shape_cast %863 : vector<4x2xf32> to vector<1x4x2xf32>
    tpu.vector_store %arg3[%c0_434, %c0_435, %c474], %866 {strides = array<i32>} : memref<1x4x512xf32, #tpu.memory_space<vmem>>, vector<1x4x2xf32>,
    %867 = vector.extract_strided_slice %2 {offsets = [0, 432], sizes = [4, 2], strides = [1, 1]} : vector<4x512xf32> to vector<4x2xf32>
    %c0_436 = arith.constant 0 : index
    %c0_437 = arith.constant 0 : index
    %c204 = arith.constant 204 : index
    %868 = vector.load %arg3[%c0_436, %c0_437, %c204] : memref<1x4x512xf32, #tpu.memory_space<vmem>>, vector<1x4x2xf32>
    %869 = vector.shape_cast %868 : vector<1x4x2xf32> to vector<4x2xf32>
    %870 = vector.shape_cast %867 : vector<4x2xf32> to vector<1x4x2xf32>
    tpu.vector_store %arg3[%c0_436, %c0_437, %c204], %870 {strides = array<i32>} : memref<1x4x512xf32, #tpu.memory_space<vmem>>, vector<1x4x2xf32>,
    %871 = vector.extract_strided_slice %2 {offsets = [0, 434], sizes = [4, 2], strides = [1, 1]} : vector<4x512xf32> to vector<4x2xf32>
    %c0_438 = arith.constant 0 : index
    %c0_439 = arith.constant 0 : index
    %c220 = arith.constant 220 : index
    %872 = vector.load %arg3[%c0_438, %c0_439, %c220] : memref<1x4x512xf32, #tpu.memory_space<vmem>>, vector<1x4x2xf32>
    %873 = vector.shape_cast %872 : vector<1x4x2xf32> to vector<4x2xf32>
    %874 = vector.shape_cast %871 : vector<4x2xf32> to vector<1x4x2xf32>
    tpu.vector_store %arg3[%c0_438, %c0_439, %c220], %874 {strides = array<i32>} : memref<1x4x512xf32, #tpu.memory_space<vmem>>, vector<1x4x2xf32>,
    %875 = vector.extract_strided_slice %2 {offsets = [0, 436], sizes = [4, 2], strides = [1, 1]} : vector<4x512xf32> to vector<4x2xf32>
    %c0_440 = arith.constant 0 : index
    %c0_441 = arith.constant 0 : index
    %c460 = arith.constant 460 : index
    %876 = vector.load %arg3[%c0_440, %c0_441, %c460] : memref<1x4x512xf32, #tpu.memory_space<vmem>>, vector<1x4x2xf32>
    %877 = vector.shape_cast %876 : vector<1x4x2xf32> to vector<4x2xf32>
    %878 = vector.shape_cast %875 : vector<4x2xf32> to vector<1x4x2xf32>
    tpu.vector_store %arg3[%c0_440, %c0_441, %c460], %878 {strides = array<i32>} : memref<1x4x512xf32, #tpu.memory_space<vmem>>, vector<1x4x2xf32>,
    %879 = vector.extract_strided_slice %2 {offsets = [0, 438], sizes = [4, 2], strides = [1, 1]} : vector<4x512xf32> to vector<4x2xf32>
    %c0_442 = arith.constant 0 : index
    %c0_443 = arith.constant 0 : index
    %c476 = arith.constant 476 : index
    %880 = vector.load %arg3[%c0_442, %c0_443, %c476] : memref<1x4x512xf32, #tpu.memory_space<vmem>>, vector<1x4x2xf32>
    %881 = vector.shape_cast %880 : vector<1x4x2xf32> to vector<4x2xf32>
    %882 = vector.shape_cast %879 : vector<4x2xf32> to vector<1x4x2xf32>
    tpu.vector_store %arg3[%c0_442, %c0_443, %c476], %882 {strides = array<i32>} : memref<1x4x512xf32, #tpu.memory_space<vmem>>, vector<1x4x2xf32>,
    %883 = vector.extract_strided_slice %2 {offsets = [0, 440], sizes = [4, 2], strides = [1, 1]} : vector<4x512xf32> to vector<4x2xf32>
    %c0_444 = arith.constant 0 : index
    %c0_445 = arith.constant 0 : index
    %c206 = arith.constant 206 : index
    %884 = vector.load %arg3[%c0_444, %c0_445, %c206] : memref<1x4x512xf32, #tpu.memory_space<vmem>>, vector<1x4x2xf32>
    %885 = vector.shape_cast %884 : vector<1x4x2xf32> to vector<4x2xf32>
    %886 = vector.shape_cast %883 : vector<4x2xf32> to vector<1x4x2xf32>
    tpu.vector_store %arg3[%c0_444, %c0_445, %c206], %886 {strides = array<i32>} : memref<1x4x512xf32, #tpu.memory_space<vmem>>, vector<1x4x2xf32>,
    %887 = vector.extract_strided_slice %2 {offsets = [0, 442], sizes = [4, 2], strides = [1, 1]} : vector<4x512xf32> to vector<4x2xf32>
    %c0_446 = arith.constant 0 : index
    %c0_447 = arith.constant 0 : index
    %c222 = arith.constant 222 : index
    %888 = vector.load %arg3[%c0_446, %c0_447, %c222] : memref<1x4x512xf32, #tpu.memory_space<vmem>>, vector<1x4x2xf32>
    %889 = vector.shape_cast %888 : vector<1x4x2xf32> to vector<4x2xf32>
    %890 = vector.shape_cast %887 : vector<4x2xf32> to vector<1x4x2xf32>
    tpu.vector_store %arg3[%c0_446, %c0_447, %c222], %890 {strides = array<i32>} : memref<1x4x512xf32, #tpu.memory_space<vmem>>, vector<1x4x2xf32>,
    %891 = vector.extract_strided_slice %2 {offsets = [0, 444], sizes = [4, 2], strides = [1, 1]} : vector<4x512xf32> to vector<4x2xf32>
    %c0_448 = arith.constant 0 : index
    %c0_449 = arith.constant 0 : index
    %c462 = arith.constant 462 : index
    %892 = vector.load %arg3[%c0_448, %c0_449, %c462] : memref<1x4x512xf32, #tpu.memory_space<vmem>>, vector<1x4x2xf32>
    %893 = vector.shape_cast %892 : vector<1x4x2xf32> to vector<4x2xf32>
    %894 = vector.shape_cast %891 : vector<4x2xf32> to vector<1x4x2xf32>
    tpu.vector_store %arg3[%c0_448, %c0_449, %c462], %894 {strides = array<i32>} : memref<1x4x512xf32, #tpu.memory_space<vmem>>, vector<1x4x2xf32>,
    %895 = vector.extract_strided_slice %2 {offsets = [0, 446], sizes = [4, 2], strides = [1, 1]} : vector<4x512xf32> to vector<4x2xf32>
    %c0_450 = arith.constant 0 : index
    %c0_451 = arith.constant 0 : index
    %c478 = arith.constant 478 : index
    %896 = vector.load %arg3[%c0_450, %c0_451, %c478] : memref<1x4x512xf32, #tpu.memory_space<vmem>>, vector<1x4x2xf32>
    %897 = vector.shape_cast %896 : vector<1x4x2xf32> to vector<4x2xf32>
    %898 = vector.shape_cast %895 : vector<4x2xf32> to vector<1x4x2xf32>
    tpu.vector_store %arg3[%c0_450, %c0_451, %c478], %898 {strides = array<i32>} : memref<1x4x512xf32, #tpu.memory_space<vmem>>, vector<1x4x2xf32>,
    %899 = vector.extract_strided_slice %2 {offsets = [0, 448], sizes = [4, 2], strides = [1, 1]} : vector<4x512xf32> to vector<4x2xf32>
    %c0_452 = arith.constant 0 : index
    %c0_453 = arith.constant 0 : index
    %c224 = arith.constant 224 : index
    %900 = vector.load %arg3[%c0_452, %c0_453, %c224] : memref<1x4x512xf32, #tpu.memory_space<vmem>>, vector<1x4x2xf32>
    %901 = vector.shape_cast %900 : vector<1x4x2xf32> to vector<4x2xf32>
    %902 = vector.shape_cast %899 : vector<4x2xf32> to vector<1x4x2xf32>
    tpu.vector_store %arg3[%c0_452, %c0_453, %c224], %902 {strides = array<i32>} : memref<1x4x512xf32, #tpu.memory_space<vmem>>, vector<1x4x2xf32>,
    %903 = vector.extract_strided_slice %2 {offsets = [0, 450], sizes = [4, 2], strides = [1, 1]} : vector<4x512xf32> to vector<4x2xf32>
    %c0_454 = arith.constant 0 : index
    %c0_455 = arith.constant 0 : index
    %c240 = arith.constant 240 : index
    %904 = vector.load %arg3[%c0_454, %c0_455, %c240] : memref<1x4x512xf32, #tpu.memory_space<vmem>>, vector<1x4x2xf32>
    %905 = vector.shape_cast %904 : vector<1x4x2xf32> to vector<4x2xf32>
    %906 = vector.shape_cast %903 : vector<4x2xf32> to vector<1x4x2xf32>
    tpu.vector_store %arg3[%c0_454, %c0_455, %c240], %906 {strides = array<i32>} : memref<1x4x512xf32, #tpu.memory_space<vmem>>, vector<1x4x2xf32>,
    %907 = vector.extract_strided_slice %2 {offsets = [0, 452], sizes = [4, 2], strides = [1, 1]} : vector<4x512xf32> to vector<4x2xf32>
    %c0_456 = arith.constant 0 : index
    %c0_457 = arith.constant 0 : index
    %c480 = arith.constant 480 : index
    %908 = vector.load %arg3[%c0_456, %c0_457, %c480] : memref<1x4x512xf32, #tpu.memory_space<vmem>>, vector<1x4x2xf32>
    %909 = vector.shape_cast %908 : vector<1x4x2xf32> to vector<4x2xf32>
    %910 = vector.shape_cast %907 : vector<4x2xf32> to vector<1x4x2xf32>
    tpu.vector_store %arg3[%c0_456, %c0_457, %c480], %910 {strides = array<i32>} : memref<1x4x512xf32, #tpu.memory_space<vmem>>, vector<1x4x2xf32>,
    %911 = vector.extract_strided_slice %2 {offsets = [0, 454], sizes = [4, 2], strides = [1, 1]} : vector<4x512xf32> to vector<4x2xf32>
    %c0_458 = arith.constant 0 : index
    %c0_459 = arith.constant 0 : index
    %c496 = arith.constant 496 : index
    %912 = vector.load %arg3[%c0_458, %c0_459, %c496] : memref<1x4x512xf32, #tpu.memory_space<vmem>>, vector<1x4x2xf32>
    %913 = vector.shape_cast %912 : vector<1x4x2xf32> to vector<4x2xf32>
    %914 = vector.shape_cast %911 : vector<4x2xf32> to vector<1x4x2xf32>
    tpu.vector_store %arg3[%c0_458, %c0_459, %c496], %914 {strides = array<i32>} : memref<1x4x512xf32, #tpu.memory_space<vmem>>, vector<1x4x2xf32>,
    %915 = vector.extract_strided_slice %2 {offsets = [0, 456], sizes = [4, 2], strides = [1, 1]} : vector<4x512xf32> to vector<4x2xf32>
    %c0_460 = arith.constant 0 : index
    %c0_461 = arith.constant 0 : index
    %c226 = arith.constant 226 : index
    %916 = vector.load %arg3[%c0_460, %c0_461, %c226] : memref<1x4x512xf32, #tpu.memory_space<vmem>>, vector<1x4x2xf32>
    %917 = vector.shape_cast %916 : vector<1x4x2xf32> to vector<4x2xf32>
    %918 = vector.shape_cast %915 : vector<4x2xf32> to vector<1x4x2xf32>
    tpu.vector_store %arg3[%c0_460, %c0_461, %c226], %918 {strides = array<i32>} : memref<1x4x512xf32, #tpu.memory_space<vmem>>, vector<1x4x2xf32>,
    %919 = vector.extract_strided_slice %2 {offsets = [0, 458], sizes = [4, 2], strides = [1, 1]} : vector<4x512xf32> to vector<4x2xf32>
    %c0_462 = arith.constant 0 : index
    %c0_463 = arith.constant 0 : index
    %c242 = arith.constant 242 : index
    %920 = vector.load %arg3[%c0_462, %c0_463, %c242] : memref<1x4x512xf32, #tpu.memory_space<vmem>>, vector<1x4x2xf32>
    %921 = vector.shape_cast %920 : vector<1x4x2xf32> to vector<4x2xf32>
    %922 = vector.shape_cast %919 : vector<4x2xf32> to vector<1x4x2xf32>
    tpu.vector_store %arg3[%c0_462, %c0_463, %c242], %922 {strides = array<i32>} : memref<1x4x512xf32, #tpu.memory_space<vmem>>, vector<1x4x2xf32>,
    %923 = vector.extract_strided_slice %2 {offsets = [0, 460], sizes = [4, 2], strides = [1, 1]} : vector<4x512xf32> to vector<4x2xf32>
    %c0_464 = arith.constant 0 : index
    %c0_465 = arith.constant 0 : index
    %c482 = arith.constant 482 : index
    %924 = vector.load %arg3[%c0_464, %c0_465, %c482] : memref<1x4x512xf32, #tpu.memory_space<vmem>>, vector<1x4x2xf32>
    %925 = vector.shape_cast %924 : vector<1x4x2xf32> to vector<4x2xf32>
    %926 = vector.shape_cast %923 : vector<4x2xf32> to vector<1x4x2xf32>
    tpu.vector_store %arg3[%c0_464, %c0_465, %c482], %926 {strides = array<i32>} : memref<1x4x512xf32, #tpu.memory_space<vmem>>, vector<1x4x2xf32>,
    %927 = vector.extract_strided_slice %2 {offsets = [0, 462], sizes = [4, 2], strides = [1, 1]} : vector<4x512xf32> to vector<4x2xf32>
    %c0_466 = arith.constant 0 : index
    %c0_467 = arith.constant 0 : index
    %c498 = arith.constant 498 : index
    %928 = vector.load %arg3[%c0_466, %c0_467, %c498] : memref<1x4x512xf32, #tpu.memory_space<vmem>>, vector<1x4x2xf32>
    %929 = vector.shape_cast %928 : vector<1x4x2xf32> to vector<4x2xf32>
    %930 = vector.shape_cast %927 : vector<4x2xf32> to vector<1x4x2xf32>
    tpu.vector_store %arg3[%c0_466, %c0_467, %c498], %930 {strides = array<i32>} : memref<1x4x512xf32, #tpu.memory_space<vmem>>, vector<1x4x2xf32>,
    %931 = vector.extract_strided_slice %2 {offsets = [0, 464], sizes = [4, 2], strides = [1, 1]} : vector<4x512xf32> to vector<4x2xf32>
    %c0_468 = arith.constant 0 : index
    %c0_469 = arith.constant 0 : index
    %c228 = arith.constant 228 : index
    %932 = vector.load %arg3[%c0_468, %c0_469, %c228] : memref<1x4x512xf32, #tpu.memory_space<vmem>>, vector<1x4x2xf32>
    %933 = vector.shape_cast %932 : vector<1x4x2xf32> to vector<4x2xf32>
    %934 = vector.shape_cast %931 : vector<4x2xf32> to vector<1x4x2xf32>
    tpu.vector_store %arg3[%c0_468, %c0_469, %c228], %934 {strides = array<i32>} : memref<1x4x512xf32, #tpu.memory_space<vmem>>, vector<1x4x2xf32>,
    %935 = vector.extract_strided_slice %2 {offsets = [0, 466], sizes = [4, 2], strides = [1, 1]} : vector<4x512xf32> to vector<4x2xf32>
    %c0_470 = arith.constant 0 : index
    %c0_471 = arith.constant 0 : index
    %c244 = arith.constant 244 : index
    %936 = vector.load %arg3[%c0_470, %c0_471, %c244] : memref<1x4x512xf32, #tpu.memory_space<vmem>>, vector<1x4x2xf32>
    %937 = vector.shape_cast %936 : vector<1x4x2xf32> to vector<4x2xf32>
    %938 = vector.shape_cast %935 : vector<4x2xf32> to vector<1x4x2xf32>
    tpu.vector_store %arg3[%c0_470, %c0_471, %c244], %938 {strides = array<i32>} : memref<1x4x512xf32, #tpu.memory_space<vmem>>, vector<1x4x2xf32>,
    %939 = vector.extract_strided_slice %2 {offsets = [0, 468], sizes = [4, 2], strides = [1, 1]} : vector<4x512xf32> to vector<4x2xf32>
    %c0_472 = arith.constant 0 : index
    %c0_473 = arith.constant 0 : index
    %c484 = arith.constant 484 : index
    %940 = vector.load %arg3[%c0_472, %c0_473, %c484] : memref<1x4x512xf32, #tpu.memory_space<vmem>>, vector<1x4x2xf32>
    %941 = vector.shape_cast %940 : vector<1x4x2xf32> to vector<4x2xf32>
    %942 = vector.shape_cast %939 : vector<4x2xf32> to vector<1x4x2xf32>
    tpu.vector_store %arg3[%c0_472, %c0_473, %c484], %942 {strides = array<i32>} : memref<1x4x512xf32, #tpu.memory_space<vmem>>, vector<1x4x2xf32>,
    %943 = vector.extract_strided_slice %2 {offsets = [0, 470], sizes = [4, 2], strides = [1, 1]} : vector<4x512xf32> to vector<4x2xf32>
    %c0_474 = arith.constant 0 : index
    %c0_475 = arith.constant 0 : index
    %c500 = arith.constant 500 : index
    %944 = vector.load %arg3[%c0_474, %c0_475, %c500] : memref<1x4x512xf32, #tpu.memory_space<vmem>>, vector<1x4x2xf32>
    %945 = vector.shape_cast %944 : vector<1x4x2xf32> to vector<4x2xf32>
    %946 = vector.shape_cast %943 : vector<4x2xf32> to vector<1x4x2xf32>
    tpu.vector_store %arg3[%c0_474, %c0_475, %c500], %946 {strides = array<i32>} : memref<1x4x512xf32, #tpu.memory_space<vmem>>, vector<1x4x2xf32>,
    %947 = vector.extract_strided_slice %2 {offsets = [0, 472], sizes = [4, 2], strides = [1, 1]} : vector<4x512xf32> to vector<4x2xf32>
    %c0_476 = arith.constant 0 : index
    %c0_477 = arith.constant 0 : index
    %c230 = arith.constant 230 : index
    %948 = vector.load %arg3[%c0_476, %c0_477, %c230] : memref<1x4x512xf32, #tpu.memory_space<vmem>>, vector<1x4x2xf32>
    %949 = vector.shape_cast %948 : vector<1x4x2xf32> to vector<4x2xf32>
    %950 = vector.shape_cast %947 : vector<4x2xf32> to vector<1x4x2xf32>
    tpu.vector_store %arg3[%c0_476, %c0_477, %c230], %950 {strides = array<i32>} : memref<1x4x512xf32, #tpu.memory_space<vmem>>, vector<1x4x2xf32>,
    %951 = vector.extract_strided_slice %2 {offsets = [0, 474], sizes = [4, 2], strides = [1, 1]} : vector<4x512xf32> to vector<4x2xf32>
    %c0_478 = arith.constant 0 : index
    %c0_479 = arith.constant 0 : index
    %c246 = arith.constant 246 : index
    %952 = vector.load %arg3[%c0_478, %c0_479, %c246] : memref<1x4x512xf32, #tpu.memory_space<vmem>>, vector<1x4x2xf32>
    %953 = vector.shape_cast %952 : vector<1x4x2xf32> to vector<4x2xf32>
    %954 = vector.shape_cast %951 : vector<4x2xf32> to vector<1x4x2xf32>
    tpu.vector_store %arg3[%c0_478, %c0_479, %c246], %954 {strides = array<i32>} : memref<1x4x512xf32, #tpu.memory_space<vmem>>, vector<1x4x2xf32>,
    %955 = vector.extract_strided_slice %2 {offsets = [0, 476], sizes = [4, 2], strides = [1, 1]} : vector<4x512xf32> to vector<4x2xf32>
    %c0_480 = arith.constant 0 : index
    %c0_481 = arith.constant 0 : index
    %c486 = arith.constant 486 : index
    %956 = vector.load %arg3[%c0_480, %c0_481, %c486] : memref<1x4x512xf32, #tpu.memory_space<vmem>>, vector<1x4x2xf32>
    %957 = vector.shape_cast %956 : vector<1x4x2xf32> to vector<4x2xf32>
    %958 = vector.shape_cast %955 : vector<4x2xf32> to vector<1x4x2xf32>
    tpu.vector_store %arg3[%c0_480, %c0_481, %c486], %958 {strides = array<i32>} : memref<1x4x512xf32, #tpu.memory_space<vmem>>, vector<1x4x2xf32>,
    %959 = vector.extract_strided_slice %2 {offsets = [0, 478], sizes = [4, 2], strides = [1, 1]} : vector<4x512xf32> to vector<4x2xf32>
    %c0_482 = arith.constant 0 : index
    %c0_483 = arith.constant 0 : index
    %c502 = arith.constant 502 : index
    %960 = vector.load %arg3[%c0_482, %c0_483, %c502] : memref<1x4x512xf32, #tpu.memory_space<vmem>>, vector<1x4x2xf32>
    %961 = vector.shape_cast %960 : vector<1x4x2xf32> to vector<4x2xf32>
    %962 = vector.shape_cast %959 : vector<4x2xf32> to vector<1x4x2xf32>
    tpu.vector_store %arg3[%c0_482, %c0_483, %c502], %962 {strides = array<i32>} : memref<1x4x512xf32, #tpu.memory_space<vmem>>, vector<1x4x2xf32>,
    %963 = vector.extract_strided_slice %2 {offsets = [0, 480], sizes = [4, 2], strides = [1, 1]} : vector<4x512xf32> to vector<4x2xf32>
    %c0_484 = arith.constant 0 : index
    %c0_485 = arith.constant 0 : index
    %c232 = arith.constant 232 : index
    %964 = vector.load %arg3[%c0_484, %c0_485, %c232] : memref<1x4x512xf32, #tpu.memory_space<vmem>>, vector<1x4x2xf32>
    %965 = vector.shape_cast %964 : vector<1x4x2xf32> to vector<4x2xf32>
    %966 = vector.shape_cast %963 : vector<4x2xf32> to vector<1x4x2xf32>
    tpu.vector_store %arg3[%c0_484, %c0_485, %c232], %966 {strides = array<i32>} : memref<1x4x512xf32, #tpu.memory_space<vmem>>, vector<1x4x2xf32>,
    %967 = vector.extract_strided_slice %2 {offsets = [0, 482], sizes = [4, 2], strides = [1, 1]} : vector<4x512xf32> to vector<4x2xf32>
    %c0_486 = arith.constant 0 : index
    %c0_487 = arith.constant 0 : index
    %c248 = arith.constant 248 : index
    %968 = vector.load %arg3[%c0_486, %c0_487, %c248] : memref<1x4x512xf32, #tpu.memory_space<vmem>>, vector<1x4x2xf32>
    %969 = vector.shape_cast %968 : vector<1x4x2xf32> to vector<4x2xf32>
    %970 = vector.shape_cast %967 : vector<4x2xf32> to vector<1x4x2xf32>
    tpu.vector_store %arg3[%c0_486, %c0_487, %c248], %970 {strides = array<i32>} : memref<1x4x512xf32, #tpu.memory_space<vmem>>, vector<1x4x2xf32>,
    %971 = vector.extract_strided_slice %2 {offsets = [0, 484], sizes = [4, 2], strides = [1, 1]} : vector<4x512xf32> to vector<4x2xf32>
    %c0_488 = arith.constant 0 : index
    %c0_489 = arith.constant 0 : index
    %c488 = arith.constant 488 : index
    %972 = vector.load %arg3[%c0_488, %c0_489, %c488] : memref<1x4x512xf32, #tpu.memory_space<vmem>>, vector<1x4x2xf32>
    %973 = vector.shape_cast %972 : vector<1x4x2xf32> to vector<4x2xf32>
    %974 = vector.shape_cast %971 : vector<4x2xf32> to vector<1x4x2xf32>
    tpu.vector_store %arg3[%c0_488, %c0_489, %c488], %974 {strides = array<i32>} : memref<1x4x512xf32, #tpu.memory_space<vmem>>, vector<1x4x2xf32>,
    %975 = vector.extract_strided_slice %2 {offsets = [0, 486], sizes = [4, 2], strides = [1, 1]} : vector<4x512xf32> to vector<4x2xf32>
    %c0_490 = arith.constant 0 : index
    %c0_491 = arith.constant 0 : index
    %c504 = arith.constant 504 : index
    %976 = vector.load %arg3[%c0_490, %c0_491, %c504] : memref<1x4x512xf32, #tpu.memory_space<vmem>>, vector<1x4x2xf32>
    %977 = vector.shape_cast %976 : vector<1x4x2xf32> to vector<4x2xf32>
    %978 = vector.shape_cast %975 : vector<4x2xf32> to vector<1x4x2xf32>
    tpu.vector_store %arg3[%c0_490, %c0_491, %c504], %978 {strides = array<i32>} : memref<1x4x512xf32, #tpu.memory_space<vmem>>, vector<1x4x2xf32>,
    %979 = vector.extract_strided_slice %2 {offsets = [0, 488], sizes = [4, 2], strides = [1, 1]} : vector<4x512xf32> to vector<4x2xf32>
    %c0_492 = arith.constant 0 : index
    %c0_493 = arith.constant 0 : index
    %c234 = arith.constant 234 : index
    %980 = vector.load %arg3[%c0_492, %c0_493, %c234] : memref<1x4x512xf32, #tpu.memory_space<vmem>>, vector<1x4x2xf32>
    %981 = vector.shape_cast %980 : vector<1x4x2xf32> to vector<4x2xf32>
    %982 = vector.shape_cast %979 : vector<4x2xf32> to vector<1x4x2xf32>
    tpu.vector_store %arg3[%c0_492, %c0_493, %c234], %982 {strides = array<i32>} : memref<1x4x512xf32, #tpu.memory_space<vmem>>, vector<1x4x2xf32>,
    %983 = vector.extract_strided_slice %2 {offsets = [0, 490], sizes = [4, 2], strides = [1, 1]} : vector<4x512xf32> to vector<4x2xf32>
    %c0_494 = arith.constant 0 : index
    %c0_495 = arith.constant 0 : index
    %c250 = arith.constant 250 : index
    %984 = vector.load %arg3[%c0_494, %c0_495, %c250] : memref<1x4x512xf32, #tpu.memory_space<vmem>>, vector<1x4x2xf32>
    %985 = vector.shape_cast %984 : vector<1x4x2xf32> to vector<4x2xf32>
    %986 = vector.shape_cast %983 : vector<4x2xf32> to vector<1x4x2xf32>
    tpu.vector_store %arg3[%c0_494, %c0_495, %c250], %986 {strides = array<i32>} : memref<1x4x512xf32, #tpu.memory_space<vmem>>, vector<1x4x2xf32>,
    %987 = vector.extract_strided_slice %2 {offsets = [0, 492], sizes = [4, 2], strides = [1, 1]} : vector<4x512xf32> to vector<4x2xf32>
    %c0_496 = arith.constant 0 : index
    %c0_497 = arith.constant 0 : index
    %c490 = arith.constant 490 : index
    %988 = vector.load %arg3[%c0_496, %c0_497, %c490] : memref<1x4x512xf32, #tpu.memory_space<vmem>>, vector<1x4x2xf32>
    %989 = vector.shape_cast %988 : vector<1x4x2xf32> to vector<4x2xf32>
    %990 = vector.shape_cast %987 : vector<4x2xf32> to vector<1x4x2xf32>
    tpu.vector_store %arg3[%c0_496, %c0_497, %c490], %990 {strides = array<i32>} : memref<1x4x512xf32, #tpu.memory_space<vmem>>, vector<1x4x2xf32>,
    %991 = vector.extract_strided_slice %2 {offsets = [0, 494], sizes = [4, 2], strides = [1, 1]} : vector<4x512xf32> to vector<4x2xf32>
    %c0_498 = arith.constant 0 : index
    %c0_499 = arith.constant 0 : index
    %c506 = arith.constant 506 : index
    %992 = vector.load %arg3[%c0_498, %c0_499, %c506] : memref<1x4x512xf32, #tpu.memory_space<vmem>>, vector<1x4x2xf32>
    %993 = vector.shape_cast %992 : vector<1x4x2xf32> to vector<4x2xf32>
    %994 = vector.shape_cast %991 : vector<4x2xf32> to vector<1x4x2xf32>
    tpu.vector_store %arg3[%c0_498, %c0_499, %c506], %994 {strides = array<i32>} : memref<1x4x512xf32, #tpu.memory_space<vmem>>, vector<1x4x2xf32>,
    %995 = vector.extract_strided_slice %2 {offsets = [0, 496], sizes = [4, 2], strides = [1, 1]} : vector<4x512xf32> to vector<4x2xf32>
    %c0_500 = arith.constant 0 : index
    %c0_501 = arith.constant 0 : index
    %c236 = arith.constant 236 : index
    %996 = vector.load %arg3[%c0_500, %c0_501, %c236] : memref<1x4x512xf32, #tpu.memory_space<vmem>>, vector<1x4x2xf32>
    %997 = vector.shape_cast %996 : vector<1x4x2xf32> to vector<4x2xf32>
    %998 = vector.shape_cast %995 : vector<4x2xf32> to vector<1x4x2xf32>
    tpu.vector_store %arg3[%c0_500, %c0_501, %c236], %998 {strides = array<i32>} : memref<1x4x512xf32, #tpu.memory_space<vmem>>, vector<1x4x2xf32>,
    %999 = vector.extract_strided_slice %2 {offsets = [0, 498], sizes = [4, 2], strides = [1, 1]} : vector<4x512xf32> to vector<4x2xf32>
    %c0_502 = arith.constant 0 : index
    %c0_503 = arith.constant 0 : index
    %c252 = arith.constant 252 : index
    %1000 = vector.load %arg3[%c0_502, %c0_503, %c252] : memref<1x4x512xf32, #tpu.memory_space<vmem>>, vector<1x4x2xf32>
    %1001 = vector.shape_cast %1000 : vector<1x4x2xf32> to vector<4x2xf32>
    %1002 = vector.shape_cast %999 : vector<4x2xf32> to vector<1x4x2xf32>
    tpu.vector_store %arg3[%c0_502, %c0_503, %c252], %1002 {strides = array<i32>} : memref<1x4x512xf32, #tpu.memory_space<vmem>>, vector<1x4x2xf32>,
    %1003 = vector.extract_strided_slice %2 {offsets = [0, 500], sizes = [4, 2], strides = [1, 1]} : vector<4x512xf32> to vector<4x2xf32>
    %c0_504 = arith.constant 0 : index
    %c0_505 = arith.constant 0 : index
    %c492 = arith.constant 492 : index
    %1004 = vector.load %arg3[%c0_504, %c0_505, %c492] : memref<1x4x512xf32, #tpu.memory_space<vmem>>, vector<1x4x2xf32>
    %1005 = vector.shape_cast %1004 : vector<1x4x2xf32> to vector<4x2xf32>
    %1006 = vector.shape_cast %1003 : vector<4x2xf32> to vector<1x4x2xf32>
    tpu.vector_store %arg3[%c0_504, %c0_505, %c492], %1006 {strides = array<i32>} : memref<1x4x512xf32, #tpu.memory_space<vmem>>, vector<1x4x2xf32>,
    %1007 = vector.extract_strided_slice %2 {offsets = [0, 502], sizes = [4, 2], strides = [1, 1]} : vector<4x512xf32> to vector<4x2xf32>
    %c0_506 = arith.constant 0 : index
    %c0_507 = arith.constant 0 : index
    %c508 = arith.constant 508 : index
    %1008 = vector.load %arg3[%c0_506, %c0_507, %c508] : memref<1x4x512xf32, #tpu.memory_space<vmem>>, vector<1x4x2xf32>
    %1009 = vector.shape_cast %1008 : vector<1x4x2xf32> to vector<4x2xf32>
    %1010 = vector.shape_cast %1007 : vector<4x2xf32> to vector<1x4x2xf32>
    tpu.vector_store %arg3[%c0_506, %c0_507, %c508], %1010 {strides = array<i32>} : memref<1x4x512xf32, #tpu.memory_space<vmem>>, vector<1x4x2xf32>,
    %1011 = vector.extract_strided_slice %2 {offsets = [0, 504], sizes = [4, 2], strides = [1, 1]} : vector<4x512xf32> to vector<4x2xf32>
    %c0_508 = arith.constant 0 : index
    %c0_509 = arith.constant 0 : index
    %c238 = arith.constant 238 : index
    %1012 = vector.load %arg3[%c0_508, %c0_509, %c238] : memref<1x4x512xf32, #tpu.memory_space<vmem>>, vector<1x4x2xf32>
    %1013 = vector.shape_cast %1012 : vector<1x4x2xf32> to vector<4x2xf32>
    %1014 = vector.shape_cast %1011 : vector<4x2xf32> to vector<1x4x2xf32>
    tpu.vector_store %arg3[%c0_508, %c0_509, %c238], %1014 {strides = array<i32>} : memref<1x4x512xf32, #tpu.memory_space<vmem>>, vector<1x4x2xf32>,
    %1015 = vector.extract_strided_slice %2 {offsets = [0, 506], sizes = [4, 2], strides = [1, 1]} : vector<4x512xf32> to vector<4x2xf32>
    %c0_510 = arith.constant 0 : index
    %c0_511 = arith.constant 0 : index
    %c254 = arith.constant 254 : index
    %1016 = vector.load %arg3[%c0_510, %c0_511, %c254] : memref<1x4x512xf32, #tpu.memory_space<vmem>>, vector<1x4x2xf32>
    %1017 = vector.shape_cast %1016 : vector<1x4x2xf32> to vector<4x2xf32>
    %1018 = vector.shape_cast %1015 : vector<4x2xf32> to vector<1x4x2xf32>
    tpu.vector_store %arg3[%c0_510, %c0_511, %c254], %1018 {strides = array<i32>} : memref<1x4x512xf32, #tpu.memory_space<vmem>>, vector<1x4x2xf32>,
    %1019 = vector.extract_strided_slice %2 {offsets = [0, 508], sizes = [4, 2], strides = [1, 1]} : vector<4x512xf32> to vector<4x2xf32>
    %c0_512 = arith.constant 0 : index
    %c0_513 = arith.constant 0 : index
    %c494 = arith.constant 494 : index
    %1020 = vector.load %arg3[%c0_512, %c0_513, %c494] : memref<1x4x512xf32, #tpu.memory_space<vmem>>, vector<1x4x2xf32>
    %1021 = vector.shape_cast %1020 : vector<1x4x2xf32> to vector<4x2xf32>
    %1022 = vector.shape_cast %1019 : vector<4x2xf32> to vector<1x4x2xf32>
    tpu.vector_store %arg3[%c0_512, %c0_513, %c494], %1022 {strides = array<i32>} : memref<1x4x512xf32, #tpu.memory_space<vmem>>, vector<1x4x2xf32>,
    %1023 = vector.extract_strided_slice %2 {offsets = [0, 510], sizes = [4, 2], strides = [1, 1]} : vector<4x512xf32> to vector<4x2xf32>
    %c0_514 = arith.constant 0 : index
    %c0_515 = arith.constant 0 : index
    %c510 = arith.constant 510 : index
    %1024 = vector.load %arg3[%c0_514, %c0_515, %c510] : memref<1x4x512xf32, #tpu.memory_space<vmem>>, vector<1x4x2xf32>
    %1025 = vector.shape_cast %1024 : vector<1x4x2xf32> to vector<4x2xf32>
    %1026 = vector.shape_cast %1023 : vector<4x2xf32> to vector<1x4x2xf32>
    tpu.vector_store %arg3[%c0_514, %c0_515, %c510], %1026 {strides = array<i32>} : memref<1x4x512xf32, #tpu.memory_space<vmem>>, vector<1x4x2xf32>,
    return
  }
  func.func @transform_0(%arg0: i32, %arg1: i32) -> (i32, i32, i32, i32) {
    %c0_i32 = arith.constant 0 : i32
    %c0_i32_0 = arith.constant 0 : i32
    %c0_i32_1 = arith.constant 0 : i32
    return %arg0, %arg1, %c0_i32, %c0_i32_0 : i32, i32, i32, i32
  }
  func.func @transform_1(%arg0: i32, %arg1: i32) -> (i32, i32, i32) {
    %c0_i32 = arith.constant 0 : i32
    %c0_i32_0 = arith.constant 0 : i32
    return %arg0, %c0_i32, %arg1 : i32, i32, i32
  }
}

</mosaic_0001>

<bundles_post_ra>
// kernel: tpu_custom_call.1
= control target key start
LH: loop header
LB: loop body
LE: loop exit
PB: predicated region body
PF: predicated region fallthrough
CT: control target
= control target key end

     0   :  { %6 = vsyncpa [#allocation3], 0  ;;  %s2669_s0 = inlined_call_operand.vmem [shape: f32[2,8,512,4], index: 0, kind: input, shape index: {}]   ;;  %s2670_s1 = inlined_call_operand.hbm [shape: f32[2,4,4096], index: 1, kind: output, shape index: {}]  }
   0x1   :  { %8 = vsyncpa [#allocation3 + $0x1], 0  ;;  %s1582_s6 = smov 0   ;;  %s1584_s7 = smov 0  }
   0x2   :  { %s1586_s8 = smov 0   ;;  %s1588_s9 = smov 0  }
   0x3   :  { %s1590_s10 = smov 0   ;;  %s1592_s11 = smov 0  }
   0x4   :  { %s1594_s12 = smov 0   ;;  %s1596_s13 = smov 0  }
   0x5 LB: > { %s1263_s14 = sadd.s32 4294967295, %s1506_s13   ;;  %s1264_s15 = sadd.s32 4294967294, %s1506_s13   ;;  %s1506_s13 = sphi %s1596_s13, %s14_s13   ;;  %s1502_s12 = sphi %s1594_s12, %s2963_s12   ;;  %s1498_s11 = sphi %s1592_s11, %s2962_s11   ;;  %s1494_s10 = sphi %s1590_s10, %s2961_s10   ;;  %s1490_s9 = sphi %s1588_s9, %s2960_s9   ;;  %s1486_s8 = sphi %s1586_s8, %s2959_s8   ;;  %s1482_s7 = sphi %s1584_s7, %s2958_s7   ;;  %s1478_s6 = sphi %s1582_s6, %s2957_s6  }
   0x6   : > { %s23_s16 = sadd.s32 1, %s1498_s11  ;;  %s26_s17 = sadd.s32 1, %s1502_s12 }
   0x7   : > { %p24_p0 = scmp.ge.s32.totalorder %s23_s16, 8  ;;  %p73_p1 = scmp.ne.s32.totalorder %s1486_s8, %s1482_s7 }
   0x8   : > { %p74_p2 = scmp.eq.s32.totalorder %s1263_s14, 15  ;;  %p79_p5 = scmp.ne.s32.totalorder %s1482_s7, %s1478_s6 }
   0x9   : > { %s2965_s16 = smov (%p24_p0, %s23_s16), 0  ;;  %s2967_s17 = smov (!%p24_p0, %s26_s17), %s1502_s12 }
   0xa   : > { %s59_s18 = ssub.s32 %s1498_s11, %s2965_s16  ;;  %p1633_p3 = por %p74_p2, %p73_p1 }
   0xb   : > { %p28_p4 = scmp.ge.s32.totalorder %s2967_s17, 2  ;;  %p80_p6 = scmp.eq.s32.totalorder %s1264_s15, 15 }
   0xc   : > { %p1267_p7 = scmp.ge.s32.totalorder %s1506_s13, 1  ;;  %p110_p9 = scmp.lt.s32.totalorder %s1506_s13, 17 }
   0xd   : > { %s2969_s17 = smov (%p28_p4, %s2967_s17), 0  ;;  %p1642_p8 = por %p80_p6, %p79_p5 }
   0xe   : > { %s58_s21 = ssub.s32 %s1502_s12, %s2969_s17  ;;  %s63_s22 = sadd.s32 1, %s1486_s8 }
   0xf   : > { %s60_s23 = sor.u32 %s59_s18, %s58_s21  ;;  %p111_p10 = pnand %p1267_p7, %p110_p9 }
  0x10   : > { %p61_p11 = scmp.eq.s32.totalorder %s60_s23, 0  ;;  %p134_p12 = scmp.lt.s32.totalorder (!%p111_p10), %s1494_s10, 1  ;;  %vm336_vm0 = vcmask (!%p111_p10), 11264   ;;  %vm342_vm1 = vcmask (!%p111_p10), 142464   ;;  %vm355_vm2 = vcmask (!%p111_p10), 27664   ;;  %vm360_vm3 = vcmask (!%p111_p10), 158864  }
  0x11   : > { %114 = sbr.rel (%p111_p10) target bundleno = 656 (0x290), region = 24  ;;  %p136_p13 = scmp.lt.s32.totalorder (!%p111_p10), %s1490_s9, 7  ;;  %vm373_vm4 = vcmask (!%p111_p10), 44064   ;;  %vm378_vm5 = vcmask (!%p111_p10), 175264   ;;  %vm391_vm6 = vcmask (!%p111_p10), 60464   ;;  %vm393_vm7 = vcmask (!%p111_p10), 191664  }
  0x12   : > { %s1651_s24 = scalar_select %p61_p11, %s1486_s8, %s63_s22  }
  0x13   : > { %s2671_s5 = sand.u32 (!%p111_p10), 1, %s1482_s7   ;;  %s2697_s18 = smov (!%p111_p10), 124   ;;  %vm406_vm8 = vcmask (!%p111_p10), 76864   ;;  %vm408_vm9 = vcmask (!%p111_p10), 208064   ;;  %vm2742_vm10 = vcmask (!%p111_p10), 93264   ;;  %vm2741_vm11 = vcmask (!%p111_p10), 224464  }
  0x14   : > { %s1268_s14 = sshll.u32 (!%p111_p10), %s2671_s5, 4  ;;  %s2757_s21 = smov (!%p111_p10), 10   ;;  %vm2740_vm12 = vcmask (!%p111_p10), 109664   ;;  %vm2737_vm13 = vcmask (!%p111_p10), 240864   ;;  %vm2744_vm14 = vcmask (!%p111_p10), 126064   ;;  %vm2745_vm15 = vcmask (!%p111_p10), 257264  }
  0x15   : > { %s1731_s15 = scalar_lea.vmem (!%p111_p10), [#allocation2], %s1268_s14  ;;  %s2678_s22 = smov (!%p111_p10), 122  }
  0x16   : > { %s2748_s23 = smov (!%p111_p10), 14   ;;  %s2699_s2 = smov (!%p111_p10), 126  }
  0x17   : > { %s2674_s3 = smov (!%p111_p10), 110   ;;  %s2695_s14 = smov (!%p111_p10), 120  }
  0x18   : > { %s135_s25 = scalar_select %p134_p12, %s1494_s10, 1 }
  0x19   : > { %s137_s26 = scalar_select %p136_p13, %s1490_s9, 7 }
  0x1a   : > { %s1270_s27 = sshll.u32 %s135_s25, 9  ;;  %s2755_s25 = smov 8  }
  0x1b   : > { %s1269_s28 = sshll.u32 %s137_s26, 6  ;;  %s2693_s26 = smov 118  }
  0x1c   : > { %s140_s29 = sadd.s32 %s1270_s27, %s1269_s28  ;;  %s2703_s27 = smov 4  }
  0x1d   : > { %s1271_s30 = sshll.u32 %s140_s29, 3  ;;  %s2673_s28 = smov 116  }
  0x1e   : > { %s1660_s4 = scalar_lea.vmem %s2669_s0, %s1271_s30  ;;  %s2701_s29 = smov 2  }
  0x1f   : > { %v160_v0 = vld [vmem:[%s1660_s4 + $0x80] sm:$0xff]  ;;  %v161_v2 = vld [vmem:[%s1660_s4 + $0x88] sm:$0xff]  ;;  %v162_v4 = vld [vmem:[%s1660_s4 + $0x90] sm:$0xff]  ;;  %s2672_s30 = smov 112   ;;  %s2676_s5 = smov 104  }
  0x20   : > { %v144_v1 = vld [vmem:[%s1660_s4] sm:$0xff]  ;;  %240 = vxpose.xlu1.b32.start [1/16] (narrow) %v160_v0, 8  ;;  %v145_v3 = vld [vmem:[%s1660_s4 + $0x8] sm:$0xff]  ;;  %v146_v5 = vld [vmem:[%s1660_s4 + $0x10] sm:$0xff] }
  0x21   : > { %208 = vxpose.xlu0.b32.start [1/16] (narrow) %v144_v1, 8  ;;  %v163_v6 = vld [vmem:[%s1660_s4 + $0x98] sm:$0xff]  ;;  %v164_v8 = vld [vmem:[%s1660_s4 + $0xa0] sm:$0xff]  ;;  %v165_v10 = vld [vmem:[%s1660_s4 + $0xa8] sm:$0xff] }
  0x22   : > { %v147_v7 = vld [vmem:[%s1660_s4 + $0x18] sm:$0xff]  ;;  %v148_v9 = vld [vmem:[%s1660_s4 + $0x20] sm:$0xff]  ;;  %v149_v11 = vld [vmem:[%s1660_s4 + $0x28] sm:$0xff] }
  0x23   : > { %v166_v12 = vld [vmem:[%s1660_s4 + $0xb0] sm:$0xff]  ;;  %v167_v14 = vld [vmem:[%s1660_s4 + $0xb8] sm:$0xff]  ;;  %v168_v16 = vld [vmem:[%s1660_s4 + $0xc0] sm:$0xff] }
  0x24   : > { %241 = vxpose.xlu1.b32.cont [2/16] (narrow) %v161_v2, 8  ;;  %v150_v13 = vld [vmem:[%s1660_s4 + $0x30] sm:$0xff]  ;;  %v151_v15 = vld [vmem:[%s1660_s4 + $0x38] sm:$0xff]  ;;  %v152_v17 = vld [vmem:[%s1660_s4 + $0x40] sm:$0xff] }
  0x25   : > { %209 = vxpose.xlu0.b32.cont [2/16] (narrow) %v145_v3, 8  ;;  %v169_v18 = vld [vmem:[%s1660_s4 + $0xc8] sm:$0xff]  ;;  %v170_v20 = vld [vmem:[%s1660_s4 + $0xd0] sm:$0xff]  ;;  %v171_v22 = vld [vmem:[%s1660_s4 + $0xd8] sm:$0xff] }
  0x26   : > { %v153_v19 = vld [vmem:[%s1660_s4 + $0x48] sm:$0xff]  ;;  %v154_v21 = vld [vmem:[%s1660_s4 + $0x50] sm:$0xff]  ;;  %v155_v23 = vld [vmem:[%s1660_s4 + $0x58] sm:$0xff] }
  0x27   : > { %v172_v24 = vld [vmem:[%s1660_s4 + $0xe0] sm:$0xff]  ;;  %v173_v26 = vld [vmem:[%s1660_s4 + $0xe8] sm:$0xff]  ;;  %v174_v28 = vld [vmem:[%s1660_s4 + $0xf0] sm:$0xff] }
  0x28   : > { %242 = vxpose.xlu1.b32.cont [3/16] (narrow) %v162_v4, 8  ;;  %v156_v25 = vld [vmem:[%s1660_s4 + $0x60] sm:$0xff]  ;;  %v157_v27 = vld [vmem:[%s1660_s4 + $0x68] sm:$0xff]  ;;  %v158_v29 = vld [vmem:[%s1660_s4 + $0x70] sm:$0xff] }
  0x29   : > { %210 = vxpose.xlu0.b32.cont [3/16] (narrow) %v146_v5, 8  ;;  %v175_v30 = vld [vmem:[%s1660_s4 + $0xf8] sm:$0xff]  ;;  %v192_v32 = vld [vmem:[%s1660_s4 + $0x180] sm:$0xff]  ;;  %v193_v34 = vld [vmem:[%s1660_s4 + $0x188] sm:$0xff] }
  0x2a   : > { %v159_v31 = vld [vmem:[%s1660_s4 + $0x78] sm:$0xff]  ;;  %v176_v33 = vld [vmem:[%s1660_s4 + $0x100] sm:$0xff]  ;;  %v177_v35 = vld [vmem:[%s1660_s4 + $0x108] sm:$0xff] }
  0x2b   : > { %v194_v36 = vld [vmem:[%s1660_s4 + $0x190] sm:$0xff]  ;;  %v195_v38 = vld [vmem:[%s1660_s4 + $0x198] sm:$0xff]  ;;  %v196_v40 = vld [vmem:[%s1660_s4 + $0x1a0] sm:$0xff] }
  0x2c   : > { %243 = vxpose.xlu1.b32.cont [4/16] (narrow) %v163_v6, 8  ;;  %v178_v37 = vld [vmem:[%s1660_s4 + $0x110] sm:$0xff]  ;;  %v179_v39 = vld [vmem:[%s1660_s4 + $0x118] sm:$0xff]  ;;  %v180_v41 = vld [vmem:[%s1660_s4 + $0x120] sm:$0xff] }
  0x2d   : > { %211 = vxpose.xlu0.b32.cont [4/16] (narrow) %v147_v7, 8  ;;  %v197_v42 = vld [vmem:[%s1660_s4 + $0x1a8] sm:$0xff]  ;;  %v198_v44 = vld [vmem:[%s1660_s4 + $0x1b0] sm:$0xff]  ;;  %v199_v46 = vld [vmem:[%s1660_s4 + $0x1b8] sm:$0xff] }
  0x2e   : > { %v181_v43 = vld [vmem:[%s1660_s4 + $0x128] sm:$0xff]  ;;  %v182_v45 = vld [vmem:[%s1660_s4 + $0x130] sm:$0xff]  ;;  %v183_v47 = vld [vmem:[%s1660_s4 + $0x138] sm:$0xff] }
  0x2f   : > { %v200_v48 = vld [vmem:[%s1660_s4 + $0x1c0] sm:$0xff]  ;;  %v201_v50 = vld [vmem:[%s1660_s4 + $0x1c8] sm:$0xff]  ;;  %v202_v52 = vld [vmem:[%s1660_s4 + $0x1d0] sm:$0xff] }
  0x30   : > { %244 = vxpose.xlu1.b32.cont [5/16] (narrow) %v164_v8, 8  ;;  %v184_v49 = vld [vmem:[%s1660_s4 + $0x140] sm:$0xff]  ;;  %v185_v51 = vld [vmem:[%s1660_s4 + $0x148] sm:$0xff]  ;;  %v186_v53 = vld [vmem:[%s1660_s4 + $0x150] sm:$0xff] }
  0x31   : > { %212 = vxpose.xlu0.b32.cont [5/16] (narrow) %v148_v9, 8  ;;  %v203_v54 = vld [vmem:[%s1660_s4 + $0x1d8] sm:$0xff]  ;;  %v204_v56 = vld [vmem:[%s1660_s4 + $0x1e0] sm:$0xff]  ;;  %v205_v58 = vld [vmem:[%s1660_s4 + $0x1e8] sm:$0xff] }
  0x32   : > { %v187_v55 = vld [vmem:[%s1660_s4 + $0x158] sm:$0xff]  ;;  %v188_v57 = vld [vmem:[%s1660_s4 + $0x160] sm:$0xff]  ;;  %v189_v59 = vld [vmem:[%s1660_s4 + $0x168] sm:$0xff] }
  0x33   : > { %v206_v60 = vld [vmem:[%s1660_s4 + $0x1f0] sm:$0xff]  ;;  %v207_v62 = vld [vmem:[%s1660_s4 + $0x1f8] sm:$0xff] }
  0x34   : > { %245 = vxpose.xlu1.b32.cont [6/16] (narrow) %v165_v10, 8  ;;  %v190_v61 = vld [vmem:[%s1660_s4 + $0x170] sm:$0xff]  ;;  %v191_v63 = vld [vmem:[%s1660_s4 + $0x178] sm:$0xff]  ;;  %s2675_s4 = smov 106  }
  0x35   : > { %213 = vxpose.xlu0.b32.cont [6/16] (narrow) %v149_v11, 8 }
  0x38   : > { %246 = vxpose.xlu1.b32.cont [7/16] (narrow) %v166_v12, 8 }
  0x39   : > { %214 = vxpose.xlu0.b32.cont [7/16] (narrow) %v150_v13, 8 }
  0x3c   : > { %247 = vxpose.xlu1.b32.cont [8/16] (narrow) %v167_v14, 8 }
  0x3d   : > { %215 = vxpose.xlu0.b32.cont [8/16] (narrow) %v151_v15, 8 }
  0x40   : > { %248 = vxpose.xlu1.b32.cont [9/16] (narrow) %v168_v16, 8 }
  0x41   : > { %216 = vxpose.xlu0.b32.cont [9/16] (narrow) %v152_v17, 8 }
  0x44   : > { %249 = vxpose.xlu1.b32.cont [10/16] (narrow) %v169_v18, 8 }
  0x45   : > { %217 = vxpose.xlu0.b32.cont [10/16] (narrow) %v153_v19, 8 }
  0x48   : > { %250 = vxpose.xlu1.b32.cont [11/16] (narrow) %v170_v20, 8 }
  0x49   : > { %218 = vxpose.xlu0.b32.cont [11/16] (narrow) %v154_v21, 8 }
  0x4c   : > { %251 = vxpose.xlu1.b32.cont [12/16] (narrow) %v171_v22, 8 }
  0x4d   : > { %219 = vxpose.xlu0.b32.cont [12/16] (narrow) %v155_v23, 8 }
  0x50   : > { %252 = vxpose.xlu1.b32.cont [13/16] (narrow) %v172_v24, 8 }
  0x51   : > { %220 = vxpose.xlu0.b32.cont [13/16] (narrow) %v156_v25, 8 }
  0x54   : > { %253 = vxpose.xlu1.b32.cont [14/16] (narrow) %v173_v26, 8 }
  0x55   : > { %221 = vxpose.xlu0.b32.cont [14/16] (narrow) %v157_v27, 8 }
  0x58   : > { %254 = vxpose.xlu1.b32.cont [15/16] (narrow) %v174_v28, 8 }
  0x59   : > { %222 = vxpose.xlu0.b32.cont [15/16] (narrow) %v158_v29, 8 }
  0x5c   : > { %255 = vxpose.xlu1.b32.end [16/16] (narrow) %v175_v30, 8 }
  0x5d   : > { %223 = vxpose.xlu0.b32.end [16/16] (narrow) %v159_v31, 8 }
  0x60   : > { %304 = vxpose.xlu1.b32.start [1/16] (narrow) %v192_v32, 8 }
  0x61   : > { %272 = vxpose.xlu0.b32.start [1/16] (narrow) %v176_v33, 8 }
  0x64   : > { %305 = vxpose.xlu1.b32.cont [2/16] (narrow) %v193_v34, 8 }
  0x65   : > { %273 = vxpose.xlu0.b32.cont [2/16] (narrow) %v177_v35, 8 }
  0x68   : > { %306 = vxpose.xlu1.b32.cont [3/16] (narrow) %v194_v36, 8 }
  0x69   : > { %274 = vxpose.xlu0.b32.cont [3/16] (narrow) %v178_v37, 8 }
  0x6c   : > { %307 = vxpose.xlu1.b32.cont [4/16] (narrow) %v195_v38, 8 }
  0x6d   : > { %275 = vxpose.xlu0.b32.cont [4/16] (narrow) %v179_v39, 8 }
  0x70   : > { %308 = vxpose.xlu1.b32.cont [5/16] (narrow) %v196_v40, 8 }
  0x71   : > { %276 = vxpose.xlu0.b32.cont [5/16] (narrow) %v180_v41, 8 }
  0x74   : > { %309 = vxpose.xlu1.b32.cont [6/16] (narrow) %v197_v42, 8 }
  0x75   : > { %277 = vxpose.xlu0.b32.cont [6/16] (narrow) %v181_v43, 8 }
  0x78   : > { %310 = vxpose.xlu1.b32.cont [7/16] (narrow) %v198_v44, 8 }
  0x79   : > { %278 = vxpose.xlu0.b32.cont [7/16] (narrow) %v182_v45, 8 }
  0x7c   : > { %311 = vxpose.xlu1.b32.cont [8/16] (narrow) %v199_v46, 8 }
  0x7d   : > { %279 = vxpose.xlu0.b32.cont [8/16] (narrow) %v183_v47, 8 }
  0x80   : > { %312 = vxpose.xlu1.b32.cont [9/16] (narrow) %v200_v48, 8 }
  0x81   : > { %280 = vxpose.xlu0.b32.cont [9/16] (narrow) %v184_v49, 8 }
  0x84   : > { %313 = vxpose.xlu1.b32.cont [10/16] (narrow) %v201_v50, 8 }
  0x85   : > { %281 = vxpose.xlu0.b32.cont [10/16] (narrow) %v185_v51, 8 }
  0x88   : > { %314 = vxpose.xlu1.b32.cont [11/16] (narrow) %v202_v52, 8 }
  0x89   : > { %282 = vxpose.xlu0.b32.cont [11/16] (narrow) %v186_v53, 8 }
  0x8c   : > { %315 = vxpose.xlu1.b32.cont [12/16] (narrow) %v203_v54, 8 }
  0x8d   : > { %283 = vxpose.xlu0.b32.cont [12/16] (narrow) %v187_v55, 8 }
  0x90   : > { %316 = vxpose.xlu1.b32.cont [13/16] (narrow) %v204_v56, 8 }
  0x91   : > { %284 = vxpose.xlu0.b32.cont [13/16] (narrow) %v188_v57, 8 }
  0x94   : > { %317 = vxpose.xlu1.b32.cont [14/16] (narrow) %v205_v58, 8 }
  0x95   : > { %285 = vxpose.xlu0.b32.cont [14/16] (narrow) %v189_v59, 8 }
  0x98   : > { %318 = vxpose.xlu1.b32.cont [15/16] (narrow) %v206_v60, 8 }
  0x99   : > { %286 = vxpose.xlu0.b32.cont [15/16] (narrow) %v190_v61, 8 }
  0x9c   : > { %319 = vxpose.xlu1.b32.end [16/16] (narrow) %v207_v62, 8 }
  0x9d   : > { %287 = vxpose.xlu0.b32.end [16/16] (narrow) %v191_v63, 8 }
  0xa0   : > { %v1823_v2 = vpop.trf.xlu1 }
  0xa1   : > { %v1729_v0 = vpop.trf.xlu0 }
  0xa2   : > { %337 = vst.msk [vmem:[%s1731_s15] sm:$0xf] %vm336_vm0, %v1729_v0 }
  0xba   : > { %344 = vrot.lane.b32.xlu1 %v1729_v0, %s2697_s18  ;;  %s2734_s18 = smov 56  }
  0xbe   : > { %348 = vrot.lane.b32.xlu1 %v1729_v0, %s2757_s21 }
  0xc2   : > { %352 = vrot.lane.b32.xlu1 %v1729_v0, %s2678_s22  ;;  %s2685_s22 = smov 88  }
  0xc6   : > { %339 = vrot.lane.b32.xlu0 %v1729_v0, %s2748_s23  ;;  %357 = vrot.lane.b32.xlu1 %v1729_v0, %s2755_s25 }
  0xca   : > { %362 = vrot.lane.b32.xlu0 %v1729_v0, %s2693_s26  ;;  %366 = vrot.lane.b32.xlu1 %v1729_v0, %s2703_s27  ;;  %s2705_s26 = smov 76   ;;  %s2723_s27 = smov 50  }
  0xce   : > { %370 = vrot.lane.b32.xlu0 %v1729_v0, %s2673_s28  ;;  %375 = vrot.lane.b32.xlu1 %v1729_v0, %s2701_s29  ;;  %s2680_s28 = smov 114   ;;  %s2732_s29 = smov 54  }
  0xd2   : > { %380 = vrot.lane.b32.xlu0 %v1729_v0, %s2672_s30  ;;  %384 = vrot.lane.b32.xlu1 %v1729_v0, %s2699_s2  ;;  %s2677_s30 = smov 100   ;;  %s2706_s2 = smov 70  }
  0xd6   : > { %388 = vrot.lane.b32.xlu0 %v1729_v0, %s2674_s3  ;;  %395 = vrot.lane.b32.xlu1 %v1729_v0, %s2675_s4  ;;  %s2679_s3 = smov 98   ;;  %s2682_s4 = smov 94  }
  0xda   : > { %399 = vrot.lane.b32.xlu0 %v1729_v0, %s2695_s14  ;;  %403 = vrot.lane.b32.xlu1 %v1729_v0, %s2676_s5  ;;  %s2683_s5 = smov 108   ;;  %s2709_s14 = smov 60  }
  0xde   : > { %410 = vrot.lane.b32.xlu0 %v1729_v0, %s2677_s30  ;;  %414 = vrot.lane.b32.xlu1 %v1729_v0, %s2680_s28  ;;  %s2684_s30 = smov 92   ;;  %s2687_s28 = smov 86  }
  0xe0   : > { %v1849_v3 = vpop.trf.xlu1 }
  0xe1   : > { %v1770_v1 = vpop.trf.xlu0 }
  0xe2   : > { %418 = vrot.lane.b32.xlu0 %v1729_v0, %s2679_s3  ;;  %782 = vst.msk [vmem:[%s1731_s15 + $0x4] sm:$0xf] %vm336_vm0, %v1770_v1  ;;  %425 = vrot.lane.b32.xlu1 %v1729_v0, %s2682_s4  ;;  %s2686_s3 = smov 102   ;;  %s2688_s4 = smov 82  }
  0xe6   : > { %429 = vrot.lane.b32.xlu0 %v1729_v0, %s2683_s5  ;;  %433 = vrot.lane.b32.xlu1 %v1729_v0, %s2684_s30  ;;  %s2689_s5 = smov 96   ;;  %s2690_s30 = smov 90  }
  0xea   : > { %440 = vrot.lane.b32.xlu0 %v1729_v0, %s2685_s22  ;;  %444 = vrot.lane.b32.xlu1 %v1729_v0, %s2686_s3  ;;  %s2691_s22 = smov 84   ;;  %s2692_s3 = smov 80  }
  0xee   : > { %448 = vrot.lane.b32.xlu0 %v1729_v0, %s2687_s28  ;;  %455 = vrot.lane.b32.xlu1 %v1729_v0, %s2688_s4  ;;  %s1537_s28 = smov 78   ;;  %s2779_s4 = smov 74  }
  0xf2   : > { %459 = vrot.lane.b32.xlu0 %v1729_v0, %s2689_s5  ;;  %469 = vrot.lane.b32.xlu1 %v1729_v0, %s2690_s30  ;;  %s2778_s5 = smov 72   ;;  %s2775_s30 = smov 68  }
  0xf6   : > { %478 = vrot.lane.b32.xlu0 %v1729_v0, %s2691_s22  ;;  %485 = vrot.lane.b32.xlu1 %v1729_v0, %s2692_s3  ;;  %s2763_s22 = smov 66   ;;  %s2738_s3 = smov 62  }
  0xfa   : > { %490 = vrot.lane.b32.xlu0 %v1729_v0, %s1537_s28  ;;  %497 = vrot.lane.b32.xlu1 %v1729_v0, %s2779_s4 }
  0xfe   : > { %502 = vrot.lane.b32.xlu0 %v1729_v0, %s2778_s5  ;;  %509 = vrot.lane.b32.xlu1 %v1729_v0, %s2775_s30 }
 0x102   : > { %514 = vrot.lane.b32.xlu0 %v1729_v0, %s2763_s22  ;;  %521 = vrot.lane.b32.xlu1 %v1729_v0, %s2738_s3 }
 0x106   : > { %525 = vrot.lane.b32.xlu0 %v1729_v0, %s2705_s26  ;;  %529 = vrot.lane.b32.xlu1 %v1729_v0, %s2709_s14  ;;  %s2707_s26 = smov 64  }
 0x10a   : > { %536 = vrot.lane.b32.xlu0 %v1729_v0, %s2734_s18  ;;  %540 = vrot.lane.b32.xlu1 %v1729_v0, %s2706_s2  ;;  %s2711_s2 = smov 58  }
 0x10e   : > { %544 = vrot.lane.b32.xlu0 %v1729_v0, %s2732_s29  ;;  %551 = vrot.lane.b32.xlu1 %v1729_v0, %s2723_s27 }
 0x112   : > { %555 = vrot.lane.b32.xlu0 %v1729_v0, %s2707_s26  ;;  %560 = vrot.lane.b32.xlu1 %v1823_v2, %s2707_s26  ;;  %s2712_s26 = smov 52  }
 0x116   : > { %565 = vrot.lane.b32.xlu0 %v1823_v2, %s1537_s28  ;;  %570 = vrot.lane.b32.xlu1 %v1823_v2, %s2709_s14  ;;  %s2713_s14 = smov 48  }
 0x11a   : > { %574 = vrot.lane.b32.xlu0 %v1823_v2, %s2779_s4  ;;  %578 = vrot.lane.b32.xlu1 %v1823_v2, %s2711_s2  ;;  %s2714_s2 = smov 46  }
 0x11e   : > { %583 = vrot.lane.b32.xlu0 %v1823_v2, %s2778_s5  ;;  %588 = vrot.lane.b32.xlu1 %v1823_v2, %s2732_s29  ;;  %s2801_s29 = smov 124  }
 0x122   : > { %592 = vrot.lane.b32.xlu0 %v1823_v2, %s2775_s30  ;;  %596 = vrot.lane.b32.xlu1 %v1823_v2, %s2712_s26  ;;  %s2715_s26 = smov 42  }
 0x126   : > { %601 = vrot.lane.b32.xlu0 %v1823_v2, %s2763_s22  ;;  %606 = vrot.lane.b32.xlu1 %v1823_v2, %s2713_s14  ;;  %s2716_s14 = smov 40   ;;  %s2815_s22 = smov 92  }
 0x12a   : > { %610 = vrot.lane.b32.xlu0 %v1823_v2, %s2738_s3  ;;  %614 = vrot.lane.b32.xlu1 %v1823_v2, %s2714_s2  ;;  %s2717_s2 = smov 36   ;;  %s2803_s3 = smov 118  }
 0x12c   : > { %v345_v4 = vpop.permute.xlu1 %344 }
 0x12d   : > { %347 = vst.msk [vmem:[%s1731_s15 + $0x8] sm:$0xf] %vm336_vm0, %v345_v4 }
 0x12e   : > { %621 = vrot.lane.b32.xlu0 %v1823_v2, %s2715_s26  ;;  %625 = vrot.lane.b32.xlu1 %v1823_v2, %s2734_s18  ;;  %s2718_s26 = smov 34   ;;  %s2802_s18 = smov 120  }
 0x130   : > { %v349_v5 = vpop.permute.xlu1 %348 }
 0x131   : > { %351 = vst.msk [vmem:[%s1731_s15 + $0x8] sm:$0xf] %vm342_vm1, %v349_v5 }
 0x132   : > { %629 = vrot.lane.b32.xlu0 %v1823_v2, %s2716_s14  ;;  %636 = vrot.lane.b32.xlu1 %v1823_v2, %s2717_s2  ;;  %s2719_s14 = smov 30   ;;  %s2720_s2 = smov 44  }
 0x134   : > { %v353_v6 = vpop.permute.xlu1 %352 }
 0x136   : > { %640 = vrot.lane.b32.xlu0 %v1823_v2, %s2723_s27  ;;  %644 = vrot.lane.b32.xlu1 %v1823_v2, %s2718_s26  ;;  %s2721_s26 = smov 28   ;;  %s2726_s27 = smov 32  }
 0x138   : > { %v340_v7 = vpop.permute.xlu0 %339  ;;  %v358_v8 = vpop.permute.xlu1 %357 }
 0x139   : > { %343 = vst.msk [vmem:[%s1731_s15] sm:$0xf] %vm342_vm1, %v340_v7 }
 0x13a   : > { %356 = vst.msk [vmem:[%s1731_s15] sm:$0xf] %vm355_vm2, %v353_v6  ;;  %651 = vrot.lane.b32.xlu0 %v1823_v2, %s2719_s14  ;;  %655 = vrot.lane.b32.xlu1 %v1823_v2, %s2720_s2  ;;  %s2722_s14 = smov 24   ;;  %s2731_s2 = smov 38  }
 0x13b   : > { %361 = vst.msk [vmem:[%s1731_s15] sm:$0xf] %vm360_vm3, %v358_v8 }
 0x13c   : > { %v363_v9 = vpop.permute.xlu0 %362  ;;  %v367_v10 = vpop.permute.xlu1 %366 }
 0x13d   : > { %365 = vst.msk [vmem:[%s1731_s15 + $0x8] sm:$0xf] %vm355_vm2, %v363_v9 }
 0x13e   : > { %369 = vst.msk [vmem:[%s1731_s15 + $0x8] sm:$0xf] %vm360_vm3, %v367_v10  ;;  %659 = vrot.lane.b32.xlu0 %v1823_v2, %s2721_s26  ;;  %666 = vrot.lane.b32.xlu1 %v1823_v2, %s2722_s14  ;;  %s2730_s26 = smov 22   ;;  %s2725_s14 = smov 18  }
 0x140   : > { %v371_v11 = vpop.permute.xlu0 %370  ;;  %v376_v12 = vpop.permute.xlu1 %375 }
 0x141   : > { %374 = vst.msk [vmem:[%s1731_s15] sm:$0xf] %vm373_vm4, %v371_v11 }
 0x142   : > { %379 = vst.msk [vmem:[%s1731_s15] sm:$0xf] %vm378_vm5, %v376_v12  ;;  %670 = vrot.lane.b32.xlu0 %v1823_v2, %s2731_s2  ;;  %674 = vrot.lane.b32.xlu1 %v1823_v2, %s2730_s26  ;;  %s2800_s26 = smov 126   ;;  %s2736_s2 = smov 12  }
 0x144   : > { %v381_v13 = vpop.permute.xlu0 %380  ;;  %v385_v14 = vpop.permute.xlu1 %384 }
 0x145   : > { %383 = vst.msk [vmem:[%s1731_s15 + $0x8] sm:$0xf] %vm373_vm4, %v381_v13 }
 0x146   : > { %387 = vst.msk [vmem:[%s1731_s15 + $0x8] sm:$0xf] %vm378_vm5, %v385_v14  ;;  %681 = vrot.lane.b32.xlu0 %v1823_v2, %s2725_s14  ;;  %685 = vrot.lane.b32.xlu1 %v1823_v2, %s2726_s27  ;;  %s2727_s14 = smov 26   ;;  %s2729_s27 = smov 20  }
 0x148   : > { %v1905_v15 = vpop.permute.xlu0 %388  ;;  %v1910_v16 = vpop.permute.xlu1 %395 }
 0x149   : > { %392 = vst.msk [vmem:[%s1731_s15] sm:$0xf] %vm391_vm6, %v1905_v15  ;;  %398 = vst.msk [vmem:[%s1731_s15 + $0x8] sm:$0xf] %vm391_vm6, %v1910_v16 }
 0x14a   : > { %695 = vrot.lane.b32.xlu0 %v1823_v2, %s2727_s14  ;;  %394 = vst.msk [vmem:[%s1731_s15] sm:$0xf] %vm393_vm7, %v345_v4  ;;  %704 = vrot.lane.b32.xlu1 %v1823_v2, %s2729_s27  ;;  %s2728_s14 = smov 16   ;;  %s2799_s27 = smov 2  }
 0x14c   : > { %v400_v17 = vpop.permute.xlu0 %399  ;;  %v1923_v18 = vpop.permute.xlu1 %403 }
 0x14d   : > { %402 = vst.msk [vmem:[%s1731_s15 + $0x8] sm:$0xf] %vm393_vm7, %v400_v17 }
 0x14e   : > { %407 = vst.msk [vmem:[%s1731_s15] sm:$0xf] %vm406_vm8, %v1923_v18  ;;  %711 = vrot.lane.b32.xlu0 %v1823_v2, %s2728_s14  ;;  %716 = vrot.lane.b32.xlu1 %v1823_v2, %s2748_s23  ;;  %s2798_s14 = smov 4  }
 0x14f   : > { %409 = vst.msk [vmem:[%s1731_s15] sm:$0xf] %vm408_vm9, %v363_v9 }
 0x150   : > { %v411_v19 = vpop.permute.xlu0 %410  ;;  %v415_v20 = vpop.permute.xlu1 %414 }
 0x151   : > { %413 = vst.msk [vmem:[%s1731_s15 + $0x8] sm:$0xf] %vm406_vm8, %v411_v19 }
 0x152   : > { %417 = vst.msk [vmem:[%s1731_s15 + $0x8] sm:$0xf] %vm408_vm9, %v415_v20  ;;  %723 = vrot.lane.b32.xlu0 %v1823_v2, %s2757_s21  ;;  %728 = vrot.lane.b32.xlu1 %v1823_v2, %s2755_s25 }
 0x154   : > { %v419_v21 = vpop.permute.xlu0 %418  ;;  %v426_v22 = vpop.permute.xlu1 %425 }
 0x155   : > { %422 = vst.msk [vmem:[%s1731_s15] sm:$0xf] %vm2742_vm10, %v419_v21  ;;  %428 = vst.msk [vmem:[%s1731_s15 + $0x8] sm:$0xf] %vm2742_vm10, %v426_v22  ;;  %vm2747_vm10 = vcmask 421264  }
 0x156   : > { %424 = vst.msk [vmem:[%s1731_s15] sm:$0xf] %vm2741_vm11, %v381_v13  ;;  %735 = vrot.lane.b32.xlu0 %v1823_v2, %s2798_s14  ;;  %740 = vrot.lane.b32.xlu1 %v1823_v2, %s2799_s27 }
 0x158   : > { %v430_v23 = vpop.permute.xlu0 %429  ;;  %v434_v24 = vpop.permute.xlu1 %433 }
 0x159   : > { %432 = vst.msk [vmem:[%s1731_s15 + $0x8] sm:$0xf] %vm2741_vm11, %v430_v23  ;;  %vm2746_vm11 = vcmask 290064  }
 0x15a   : > { %437 = vst.msk [vmem:[%s1731_s15] sm:$0xf] %vm2740_vm12, %v434_v24  ;;  %747 = vrot.lane.b32.xlu0 %v1823_v2, %s2800_s26  ;;  %751 = vrot.lane.b32.xlu1 %v1823_v2, %s2736_s2  ;;  %s2743_s2 = smov 6  }
 0x15b   : > { %439 = vst.msk [vmem:[%s1731_s15] sm:$0xf] %vm2737_vm13, %v1910_v16 }
 0x15c   : > { %v441_v25 = vpop.permute.xlu0 %440  ;;  %v445_v26 = vpop.permute.xlu1 %444 }
 0x15d   : > { %443 = vst.msk [vmem:[%s1731_s15 + $0x8] sm:$0xf] %vm2740_vm12, %v441_v25  ;;  %vm2781_vm12 = vcmask 404864  }
 0x15e   : > { %447 = vst.msk [vmem:[%s1731_s15 + $0x8] sm:$0xf] %vm2737_vm13, %v445_v26  ;;  %755 = vrot.lane.b32.xlu0 %v1823_v2, %s2801_s29  ;;  %762 = vrot.lane.b32.xlu1 %v1823_v2, %s2802_s18  ;;  %vm2791_vm13 = vcmask 273664  }
 0x160   : > { %v449_v27 = vpop.permute.xlu0 %448  ;;  %v456_v28 = vpop.permute.xlu1 %455 }
 0x161   : > { %452 = vst.msk [vmem:[%s1731_s15] sm:$0xf] %vm2744_vm14, %v449_v27  ;;  %458 = vst.msk [vmem:[%s1731_s15 + $0x8] sm:$0xf] %vm2744_vm14, %v456_v28  ;;  %vm2749_vm14 = vcmask 306464  }
 0x162   : > { %766 = vrot.lane.b32.xlu0 %v1823_v2, %s2743_s2  ;;  %454 = vst.msk [vmem:[%s1731_s15] sm:$0xf] %vm2745_vm15, %v411_v19  ;;  %770 = vrot.lane.b32.xlu1 %v1823_v2, %s2803_s3  ;;  %s2804_s2 = smov 114  }
 0x164   : > { %v460_v29 = vpop.permute.xlu0 %459  ;;  %v470_v30 = vpop.permute.xlu1 %469 }
 0x165   : > { %462 = vst.msk [vmem:[%s1731_s15 + $0x8] sm:$0xf] %vm2745_vm15, %v460_v29  ;;  %vm2750_vm15 = vcmask 437664  }
 0x166   : > { %464 = vst.msk [vmem:[%s1731_s15] sm:$0xf] %vm2791_vm13, %v460_v29  ;;  %467 = vst.msk [vmem:[%s1731_s15 + $0x8] sm:$0xf] %vm2791_vm13, %v434_v24  ;;  %777 = vrot.lane.b32.xlu0 %v1823_v2, %s2804_s2  ;;  %784 = vrot.lane.b32.xlu1 %v1770_v1, %s2748_s23  ;;  %s2805_s23 = smov 122   ;;  %vm2794_vm13 = vcmask 1011664  }
 0x167   : > { %466 = vst.msk [vmem:[%s1731_s15] sm:$0xf] %vm2781_vm12, %v1905_v15  ;;  %468 = vst.msk [vmem:[%s1731_s15 + $0x8] sm:$0xf] %vm2781_vm12, %v1910_v16  ;;  %vm2786_vm12 = vcmask 929664  }
 0x168   : > { %473 = vst.msk [vmem:[%s1731_s15] sm:$0xf] %vm2746_vm11, %v470_v30  ;;  %476 = vst.msk [vmem:[%s1731_s15 + $0x8] sm:$0xf] %vm2746_vm11, %v449_v27  ;;  %v479_v31 = vpop.permute.xlu0 %478  ;;  %v486_v32 = vpop.permute.xlu1 %485  ;;  %vm2751_vm11 = vcmask 322864  }
 0x169   : > { %475 = vst.msk [vmem:[%s1731_s15] sm:$0xf] %vm2747_vm10, %v1923_v18  ;;  %477 = vst.msk [vmem:[%s1731_s15 + $0x8] sm:$0xf] %vm2747_vm10, %v411_v19  ;;  %vm2752_vm10 = vcmask 454064  }
 0x16a   : > { %482 = vst.msk [vmem:[%s1731_s15] sm:$0xf] %vm2749_vm14, %v479_v31  ;;  %488 = vst.msk [vmem:[%s1731_s15 + $0x8] sm:$0xf] %vm2749_vm14, %v486_v32  ;;  %788 = vrot.lane.b32.xlu0 %v1770_v1, %s2801_s29  ;;  %792 = vrot.lane.b32.xlu1 %v1770_v1, %s2757_s21  ;;  %vm2753_vm14 = vcmask 339264   ;;  %s2809_s21 = smov 106  }
 0x16b   : > { %484 = vst.msk [vmem:[%s1731_s15] sm:$0xf] %vm2750_vm15, %v419_v21  ;;  %489 = vst.msk [vmem:[%s1731_s15 + $0x8] sm:$0xf] %vm2750_vm15, %v426_v22  ;;  %vm2754_vm15 = vcmask 470464  }
 0x16c   : > { %v491_v33 = vpop.permute.xlu0 %490  ;;  %v498_v34 = vpop.permute.xlu1 %497 }
 0x16d   : > { %494 = vst.msk [vmem:[%s1731_s15] sm:$0xf] %vm2751_vm11, %v491_v33  ;;  %500 = vst.msk [vmem:[%s1731_s15 + $0x8] sm:$0xf] %vm2751_vm11, %v498_v34  ;;  %vm2758_vm11 = vcmask 355664  }
 0x16e   : > { %796 = vrot.lane.b32.xlu0 %v1770_v1, %s2805_s23  ;;  %496 = vst.msk [vmem:[%s1731_s15] sm:$0xf] %vm2752_vm10, %v434_v24  ;;  %800 = vrot.lane.b32.xlu1 %v1770_v1, %s2755_s25  ;;  %501 = vst.msk [vmem:[%s1731_s15 + $0x8] sm:$0xf] %vm2752_vm10, %v441_v25  ;;  %vm2756_vm10 = vcmask 486864   ;;  %s2806_s23 = smov 116  }
 0x16f   : > { %s2807_s25 = smov 112  }
 0x170   : > { %v503_v35 = vpop.permute.xlu0 %502  ;;  %v510_v36 = vpop.permute.xlu1 %509 }
 0x171   : > { %506 = vst.msk [vmem:[%s1731_s15] sm:$0xf] %vm2753_vm14, %v503_v35  ;;  %512 = vst.msk [vmem:[%s1731_s15 + $0x8] sm:$0xf] %vm2753_vm14, %v510_v36  ;;  %vm2762_vm14 = vcmask 372064  }
 0x172   : > { %804 = vrot.lane.b32.xlu0 %v1770_v1, %s2803_s3  ;;  %508 = vst.msk [vmem:[%s1731_s15] sm:$0xf] %vm2754_vm15, %v449_v27  ;;  %808 = vrot.lane.b32.xlu1 %v1770_v1, %s2798_s14  ;;  %513 = vst.msk [vmem:[%s1731_s15 + $0x8] sm:$0xf] %vm2754_vm15, %v456_v28  ;;  %vm2759_vm15 = vcmask 503264  }
 0x174   : > { %v515_v37 = vpop.permute.xlu0 %514  ;;  %v522_v38 = vpop.permute.xlu1 %521 }
 0x175   : > { %518 = vst.msk [vmem:[%s1731_s15] sm:$0xf] %vm2758_vm11, %v515_v37  ;;  %524 = vst.msk [vmem:[%s1731_s15 + $0x8] sm:$0xf] %vm2758_vm11, %v522_v38  ;;  %vm2761_vm11 = vcmask 519664  }
 0x176   : > { %812 = vrot.lane.b32.xlu0 %v1770_v1, %s2806_s23  ;;  %520 = vst.msk [vmem:[%s1731_s15] sm:$0xf] %vm2756_vm10, %v486_v32  ;;  %816 = vrot.lane.b32.xlu1 %v1770_v1, %s2799_s27  ;;  %s2808_s23 = smov 110  }
 0x178   : > { %v526_v39 = vpop.permute.xlu0 %525  ;;  %v530_v40 = vpop.permute.xlu1 %529 }
 0x179   : > { %528 = vst.msk [vmem:[%s1731_s15 + $0x8] sm:$0xf] %vm2756_vm10, %v526_v39  ;;  %vm2760_vm10 = vcmask 388464  }
 0x17a   : > { %533 = vst.msk [vmem:[%s1731_s15] sm:$0xf] %vm2762_vm14, %v530_v40  ;;  %820 = vrot.lane.b32.xlu0 %v1770_v1, %s2807_s25  ;;  %824 = vrot.lane.b32.xlu1 %v1770_v1, %s2800_s26  ;;  %s2810_s25 = smov 104  }
 0x17b   : > { %535 = vst.msk [vmem:[%s1731_s15] sm:$0xf] %vm2759_vm15, %v498_v34 }
 0x17c   : > { %v537_v41 = vpop.permute.xlu0 %536  ;;  %v541_v42 = vpop.permute.xlu1 %540 }
 0x17d   : > { %539 = vst.msk [vmem:[%s1731_s15 + $0x8] sm:$0xf] %vm2762_vm14, %v537_v41  ;;  %vm2767_vm14 = vcmask 683664  }
 0x17e   : > { %543 = vst.msk [vmem:[%s1731_s15 + $0x8] sm:$0xf] %vm2759_vm15, %v541_v42  ;;  %828 = vrot.lane.b32.xlu0 %v1770_v1, %s2808_s23  ;;  %833 = vrot.lane.b32.xlu1 %v1770_v1, %s2809_s21  ;;  %vm2766_vm15 = vcmask 536064   ;;  %s2811_s21 = smov 100   ;;  %s2812_s23 = smov 98  }
 0x180   : > { %v545_v43 = vpop.permute.xlu0 %544  ;;  %v552_v44 = vpop.permute.xlu1 %551 }
 0x181   : > { %548 = vst.msk [vmem:[%s1731_s15] sm:$0xf] %vm2760_vm10, %v545_v43  ;;  %554 = vst.msk [vmem:[%s1731_s15 + $0x8] sm:$0xf] %vm2760_vm10, %v552_v44  ;;  %vm2765_vm10 = vcmask 667264  }
 0x182   : > { %837 = vrot.lane.b32.xlu0 %v1770_v1, %s2802_s18  ;;  %550 = vst.msk [vmem:[%s1731_s15] sm:$0xf] %vm2761_vm11, %v510_v36  ;;  %841 = vrot.lane.b32.xlu1 %v1770_v1, %s2810_s25  ;;  %s2813_s25 = smov 94  }
 0x184   : > { %v556_v45 = vpop.permute.xlu0 %555  ;;  %v561_v46 = vpop.permute.xlu1 %560 }
 0x185   : > { %558 = vst.msk [vmem:[%s1731_s15 + $0x8] sm:$0xf] %vm2761_vm11, %v556_v45  ;;  %vm2768_vm11 = vcmask 552464  }
 0x186   : > { %564 = vst.msk [vmem:[%s1731_s15] sm:$0xf] %vm2766_vm15, %v561_v46  ;;  %846 = vrot.lane.b32.xlu0 %v1770_v1, %s2811_s21  ;;  %850 = vrot.lane.b32.xlu1 %v1770_v1, %s2804_s2  ;;  %s2814_s21 = smov 108  }
 0x188   : > { %v566_v47 = vpop.permute.xlu0 %565  ;;  %v571_v48 = vpop.permute.xlu1 %570 }
 0x189   : > { %569 = vst.msk [vmem:[%s1731_s15] sm:$0xf] %vm2765_vm10, %v566_v47 }
 0x18a   : > { %573 = vst.msk [vmem:[%s1731_s15 + $0x8] sm:$0xf] %vm2766_vm15, %v571_v48  ;;  %854 = vrot.lane.b32.xlu0 %v1770_v1, %s2812_s23  ;;  %859 = vrot.lane.b32.xlu1 %v1770_v1, %s2813_s25  ;;  %s2816_s23 = smov 88   ;;  %s2817_s25 = smov 102   ;;  %vm2769_vm15 = vcmask 700064  }
 0x18c   : > { %v575_v49 = vpop.permute.xlu0 %574  ;;  %v579_v50 = vpop.permute.xlu1 %578 }
 0x18d   : > { %577 = vst.msk [vmem:[%s1731_s15 + $0x8] sm:$0xf] %vm2765_vm10, %v575_v49  ;;  %vm2770_vm10 = vcmask 568864  }
 0x18e   : > { %582 = vst.msk [vmem:[%s1731_s15] sm:$0xf] %vm2768_vm11, %v579_v50  ;;  %863 = vrot.lane.b32.xlu0 %v1770_v1, %s2814_s21  ;;  %867 = vrot.lane.b32.xlu1 %v1770_v1, %s2815_s22  ;;  %s2818_s22 = smov 86   ;;  %s2819_s21 = smov 82  }
 0x190   : > { %v584_v51 = vpop.permute.xlu0 %583  ;;  %v589_v52 = vpop.permute.xlu1 %588 }
 0x191   : > { %587 = vst.msk [vmem:[%s1731_s15] sm:$0xf] %vm2767_vm14, %v584_v51 }
 0x192   : > { %591 = vst.msk [vmem:[%s1731_s15 + $0x8] sm:$0xf] %vm2768_vm11, %v589_v52  ;;  %872 = vrot.lane.b32.xlu0 %v1770_v1, %s2816_s23  ;;  %876 = vrot.lane.b32.xlu1 %v1770_v1, %s2817_s25  ;;  %s2820_s23 = smov 96   ;;  %s2821_s25 = smov 90   ;;  %vm2771_vm11 = vcmask 716464  }
 0x194   : > { %v593_v53 = vpop.permute.xlu0 %592  ;;  %v597_v54 = vpop.permute.xlu1 %596 }
 0x195   : > { %595 = vst.msk [vmem:[%s1731_s15 + $0x8] sm:$0xf] %vm2767_vm14, %v593_v53  ;;  %vm2772_vm14 = vcmask 585264  }
 0x196   : > { %600 = vst.msk [vmem:[%s1731_s15] sm:$0xf] %vm2770_vm10, %v597_v54  ;;  %880 = vrot.lane.b32.xlu0 %v1770_v1, %s2818_s22  ;;  %885 = vrot.lane.b32.xlu1 %v1770_v1, %s2819_s21  ;;  %s2822_s22 = smov 84   ;;  %s2823_s21 = smov 80  }
 0x198   : > { %v602_v55 = vpop.permute.xlu0 %601  ;;  %v607_v56 = vpop.permute.xlu1 %606 }
 0x199   : > { %605 = vst.msk [vmem:[%s1731_s15] sm:$0xf] %vm2769_vm15, %v602_v55 }
 0x19a   : > { %609 = vst.msk [vmem:[%s1731_s15 + $0x8] sm:$0xf] %vm2770_vm10, %v607_v56  ;;  %889 = vrot.lane.b32.xlu0 %v1770_v1, %s2820_s23  ;;  %897 = vrot.lane.b32.xlu1 %v1770_v1, %s2821_s25  ;;  %vm2773_vm10 = vcmask 732864   ;;  %s2824_s23 = smov 66   ;;  %s2825_s25 = smov 62  }
 0x19c   : > { %v611_v57 = vpop.permute.xlu0 %610  ;;  %v2130_v58 = vpop.permute.xlu1 %614 }
 0x19d   : > { %613 = vst.msk [vmem:[%s1731_s15 + $0x8] sm:$0xf] %vm2769_vm15, %v611_v57  ;;  %vm2774_vm15 = vcmask 601664  }
 0x19e   : > { %618 = vst.msk [vmem:[%s1731_s15] sm:$0xf] %vm2772_vm14, %v2130_v58  ;;  %904 = vrot.lane.b32.xlu0 %v1770_v1, %s2822_s22  ;;  %909 = vrot.lane.b32.xlu1 %v1770_v1, %s2823_s21  ;;  %s2826_s22 = smov 76   ;;  %s2827_s21 = smov 60  }
 0x19f   : > { %620 = vst.msk [vmem:[%s1731_s15] sm:$0xf] %vm2771_vm11, %v571_v48 }
 0x1a0   : > { %v622_v59 = vpop.permute.xlu0 %621  ;;  %v626_v60 = vpop.permute.xlu1 %625 }
 0x1a1   : > { %624 = vst.msk [vmem:[%s1731_s15 + $0x8] sm:$0xf] %vm2772_vm14, %v622_v59  ;;  %vm2776_vm14 = vcmask 749264  }
 0x1a2   : > { %628 = vst.msk [vmem:[%s1731_s15 + $0x8] sm:$0xf] %vm2771_vm11, %v626_v60  ;;  %914 = vrot.lane.b32.xlu0 %v1770_v1, %s1537_s28  ;;  %919 = vrot.lane.b32.xlu1 %v1770_v1, %s2779_s4  ;;  %vm2777_vm11 = vcmask 618064   ;;  %s2831_s4 = smov 50  }
 0x1a4   : > { %v630_v61 = vpop.permute.xlu0 %629  ;;  %v637_v62 = vpop.permute.xlu1 %636 }
 0x1a5   : > { %633 = vst.msk [vmem:[%s1731_s15] sm:$0xf] %vm2774_vm15, %v630_v61  ;;  %639 = vst.msk [vmem:[%s1731_s15 + $0x8] sm:$0xf] %vm2774_vm15, %v637_v62  ;;  %vm2782_vm15 = vcmask 765664  }
 0x1a6   : > { %924 = vrot.lane.b32.xlu0 %v1770_v1, %s2778_s5  ;;  %635 = vst.msk [vmem:[%s1731_s15] sm:$0xf] %vm2773_vm10, %v589_v52  ;;  %929 = vrot.lane.b32.xlu1 %v1770_v1, %s2775_s30  ;;  %s2828_s30 = smov 56   ;;  %s2830_s5 = smov 54  }
 0x1a8   : > { %v641_v63 = vpop.permute.xlu0 %640  ;;  %v645_v0 = vpop.permute.xlu1 %644 }
 0x1a9   : > { %643 = vst.msk [vmem:[%s1731_s15 + $0x8] sm:$0xf] %vm2773_vm10, %v641_v63  ;;  %vm2780_vm10 = vcmask 634464  }
 0x1aa   : > { %648 = vst.msk [vmem:[%s1731_s15] sm:$0xf] %vm2777_vm11, %v645_v0  ;;  %934 = vrot.lane.b32.xlu0 %v1770_v1, %s2824_s23  ;;  %939 = vrot.lane.b32.xlu1 %v1770_v1, %s2825_s25 }
 0x1ab   : > { %650 = vst.msk [vmem:[%s1731_s15] sm:$0xf] %vm2776_vm14, %v607_v56 }
 0x1ac   : > { %v652_v4 = vpop.permute.xlu0 %651  ;;  %v656_v5 = vpop.permute.xlu1 %655 }
 0x1ad   : > { %654 = vst.msk [vmem:[%s1731_s15 + $0x8] sm:$0xf] %vm2777_vm11, %v652_v4  ;;  %vm2784_vm11 = vcmask 782064  }
 0x1ae   : > { %658 = vst.msk [vmem:[%s1731_s15 + $0x8] sm:$0xf] %vm2776_vm14, %v656_v5  ;;  %943 = vrot.lane.b32.xlu0 %v1770_v1, %s2826_s22  ;;  %947 = vrot.lane.b32.xlu1 %v1770_v1, %s2827_s21  ;;  %s2829_s22 = smov 70   ;;  %vm2783_vm14 = vcmask 650864  }
 0x1b0   : > { %v660_v6 = vpop.permute.xlu0 %659  ;;  %v667_v7 = vpop.permute.xlu1 %666 }
 0x1b1   : > { %663 = vst.msk [vmem:[%s1731_s15] sm:$0xf] %vm2780_vm10, %v660_v6  ;;  %669 = vst.msk [vmem:[%s1731_s15 + $0x8] sm:$0xf] %vm2780_vm10, %v667_v7  ;;  %vm2785_vm10 = vcmask 798464  }
 0x1b2   : > { %952 = vrot.lane.b32.xlu0 %v1770_v1, %s2828_s30  ;;  %665 = vst.msk [vmem:[%s1731_s15] sm:$0xf] %vm2782_vm15, %v622_v59  ;;  %956 = vrot.lane.b32.xlu1 %v1770_v1, %s2829_s22  ;;  %s2832_s22 = smov 64  }
 0x1b4   : > { %v671_v8 = vpop.permute.xlu0 %670  ;;  %v675_v9 = vpop.permute.xlu1 %674 }
 0x1b5   : > { %673 = vst.msk [vmem:[%s1731_s15 + $0x8] sm:$0xf] %vm2782_vm15, %v671_v8  ;;  %vm2787_vm15 = vcmask 814864  }
 0x1b6   : > { %678 = vst.msk [vmem:[%s1731_s15] sm:$0xf] %vm2783_vm14, %v675_v9  ;;  %960 = vrot.lane.b32.xlu0 %v1770_v1, %s2830_s5  ;;  %965 = vrot.lane.b32.xlu1 %v1770_v1, %s2831_s4 }
 0x1b7   : > { %680 = vst.msk [vmem:[%s1731_s15] sm:$0xf] %vm2784_vm11, %v637_v62 }
 0x1b8   : > { %v682_v10 = vpop.permute.xlu0 %681  ;;  %v686_v11 = vpop.permute.xlu1 %685 }
 0x1b9   : > { %684 = vst.msk [vmem:[%s1731_s15 + $0x8] sm:$0xf] %vm2783_vm14, %v682_v10  ;;  %vm2788_vm14 = vcmask 946064  }
 0x1ba   : > { %688 = vst.msk [vmem:[%s1731_s15 + $0x8] sm:$0xf] %vm2784_vm11, %v686_v11  ;;  %969 = vrot.lane.b32.xlu0 %v1770_v1, %s2832_s22  ;;  %974 = vrot.lane.b32.xlu1 %v1849_v3, %s2832_s22  ;;  %vm2789_vm11 = vcmask 831264   ;;  %s2834_s22 = smov 58  }
 0x1bb   : > { %690 = vst.msk [vmem:[%s1731_s15] sm:$0xf] %vm2785_vm10, %v686_v11  ;;  %693 = vst.msk [vmem:[%s1731_s15 + $0x8] sm:$0xf] %vm2785_vm10, %v660_v6  ;;  %vm2790_vm10 = vcmask 962464  }
 0x1bc   : > { %692 = vst.msk [vmem:[%s1731_s15] sm:$0xf] %vm2786_vm12, %v2130_v58  ;;  %694 = vst.msk [vmem:[%s1731_s15 + $0x8] sm:$0xf] %vm2786_vm12, %v622_v59  ;;  %v696_v12 = vpop.permute.xlu0 %695  ;;  %v705_v1 = vpop.permute.xlu1 %704  ;;  %vm719_vm12 = vcmask 847664  }
 0x1bd   : > { %699 = vst.msk [vmem:[%s1731_s15] sm:$0xf] %vm2787_vm15, %v696_v12  ;;  %702 = vst.msk [vmem:[%s1731_s15 + $0x8] sm:$0xf] %vm2787_vm15, %v675_v9  ;;  %vm721_vm15 = vcmask 978864  }
 0x1be   : > { %701 = vst.msk [vmem:[%s1731_s15] sm:$0xf] %vm2788_vm14, %v630_v61  ;;  %703 = vst.msk [vmem:[%s1731_s15 + $0x8] sm:$0xf] %vm2788_vm14, %v637_v62  ;;  %982 = vrot.lane.b32.xlu0 %v1849_v3, %s2827_s21  ;;  %978 = vrot.lane.b32.xlu1 %v1849_v3, %s1537_s28  ;;  %s2833_s21 = smov 74   ;;  %vm2793_vm14 = vcmask 864064  }
 0x1bf   : > { %708 = vst.msk [vmem:[%s1731_s15] sm:$0xf] %vm2789_vm11, %v705_v1  ;;  %s2835_s28 = smov 72  }
 0x1c0   : > { %v712_v13 = vpop.permute.xlu0 %711  ;;  %710 = vst.msk [vmem:[%s1731_s15] sm:$0xf] %vm2790_vm10, %v645_v0  ;;  %v717_v14 = vpop.permute.xlu1 %716 }
 0x1c1   : > { %714 = vst.msk [vmem:[%s1731_s15 + $0x8] sm:$0xf] %vm2789_vm11, %v712_v13  ;;  %vm2792_vm11 = vcmask 995264  }
 0x1c2   : > { %720 = vst.msk [vmem:[%s1731_s15] sm:$0xf] %vm719_vm12, %v717_v14  ;;  %986 = vrot.lane.b32.xlu0 %v1849_v3, %s2833_s21  ;;  %990 = vrot.lane.b32.xlu1 %v1849_v3, %s2834_s22  ;;  %s2836_s21 = smov 68   ;;  %s2838_s22 = smov 48  }
 0x1c3   : > { %715 = vst.msk [vmem:[%s1731_s15 + $0x8] sm:$0xf] %vm2790_vm10, %v652_v4  ;;  %vm2795_vm10 = vcmask 880464  }
 0x1c4   : > { %722 = vst.msk [vmem:[%s1731_s15] sm:$0xf] %vm721_vm15, %v660_v6  ;;  %v724_v15 = vpop.permute.xlu0 %723  ;;  %v729_v16 = vpop.permute.xlu1 %728 }
 0x1c5   : > { %726 = vst.msk [vmem:[%s1731_s15 + $0x8] sm:$0xf] %vm719_vm12, %v724_v15 }
 0x1c6   : > { %732 = vst.msk [vmem:[%s1731_s15] sm:$0xf] %vm2793_vm14, %v729_v16  ;;  %998 = vrot.lane.b32.xlu0 %v1849_v3, %s2830_s5  ;;  %994 = vrot.lane.b32.xlu1 %v1849_v3, %s2835_s28  ;;  %s2837_s5 = smov 52   ;;  %s2839_s28 = smov 46  }
 0x1c7   : > { %727 = vst.msk [vmem:[%s1731_s15 + $0x8] sm:$0xf] %vm721_vm15, %v667_v7 }
 0x1c8   : > { %734 = vst.msk [vmem:[%s1731_s15] sm:$0xf] %vm2792_vm11, %v675_v9  ;;  %v736_v17 = vpop.permute.xlu0 %735  ;;  %v741_v18 = vpop.permute.xlu1 %740 }
 0x1c9   : > { %738 = vst.msk [vmem:[%s1731_s15 + $0x8] sm:$0xf] %vm2793_vm14, %v736_v17  ;;  %vm760_vm14 = vcmask 1028064  }
 0x1ca   : > { %744 = vst.msk [vmem:[%s1731_s15] sm:$0xf] %vm2795_vm10, %v741_v18  ;;  %1002 = vrot.lane.b32.xlu0 %v1849_v3, %s2836_s21  ;;  %1006 = vrot.lane.b32.xlu1 %v1849_v3, %s2837_s5  ;;  %s2842_s21 = smov 36   ;;  %s2844_s5 = smov 30  }
 0x1cb   : > { %739 = vst.msk [vmem:[%s1731_s15 + $0x8] sm:$0xf] %vm2792_vm11, %v682_v10  ;;  %vm758_vm11 = vcmask 896864  }
 0x1cc   : > { %746 = vst.msk [vmem:[%s1731_s15] sm:$0xf] %vm2794_vm13, %v712_v13  ;;  %v748_v19 = vpop.permute.xlu0 %747  ;;  %v752_v20 = vpop.permute.xlu1 %751 }
 0x1cd   : > { %750 = vst.msk [vmem:[%s1731_s15 + $0x8] sm:$0xf] %vm2795_vm10, %v748_v19  ;;  %vm775_vm10 = vcmask 1044464  }
 0x1ce   : > { %754 = vst.msk [vmem:[%s1731_s15 + $0x8] sm:$0xf] %vm2794_vm13, %v752_v20  ;;  %1014 = vrot.lane.b32.xlu0 %v1849_v3, %s2838_s22  ;;  %1010 = vrot.lane.b32.xlu1 %v1849_v3, %s2824_s23  ;;  %vm773_vm13 = vcmask 913264   ;;  %s2840_s23 = smov 42   ;;  %s2845_s22 = smov 44  }
 0x1d0   : > { %v756_v21 = vpop.permute.xlu0 %755  ;;  %v763_v22 = vpop.permute.xlu1 %762 }
 0x1d1   : > { %759 = vst.msk [vmem:[%s1731_s15] sm:$0xf] %vm758_vm11, %v756_v21  ;;  %765 = vst.msk [vmem:[%s1731_s15 + $0x8] sm:$0xf] %vm758_vm11, %v763_v22 }
 0x1d2   : > { %1018 = vrot.lane.b32.xlu0 %v1849_v3, %s2825_s25  ;;  %761 = vst.msk [vmem:[%s1731_s15] sm:$0xf] %vm760_vm14, %v724_v15  ;;  %1022 = vrot.lane.b32.xlu1 %v1849_v3, %s2839_s28  ;;  %s2841_s25 = smov 40   ;;  %s2847_s28 = smov 24  }
 0x1d4   : > { %v767_v23 = vpop.permute.xlu0 %766  ;;  %v771_v24 = vpop.permute.xlu1 %770 }
 0x1d5   : > { %769 = vst.msk [vmem:[%s1731_s15 + $0x8] sm:$0xf] %vm760_vm14, %v767_v23 }
 0x1d6   : > { %774 = vst.msk [vmem:[%s1731_s15] sm:$0xf] %vm773_vm13, %v771_v24  ;;  %1027 = vrot.lane.b32.xlu0 %v1849_v3, %s2840_s23  ;;  %1031 = vrot.lane.b32.xlu1 %v1849_v3, %s2828_s30  ;;  %s2843_s30 = smov 34   ;;  %s2848_s23 = smov 38  }
 0x1d7   : > { %776 = vst.msk [vmem:[%s1731_s15] sm:$0xf] %vm775_vm10, %v736_v17 }
 0x1d8   : > { %v778_v25 = vpop.permute.xlu0 %777  ;;  %v785_v26 = vpop.permute.xlu1 %784 }
 0x1d9   : > { %780 = vst.msk [vmem:[%s1731_s15 + $0x8] sm:$0xf] %vm773_vm13, %v778_v25 }
 0x1da   : > { %781 = vst.msk [vmem:[%s1731_s15 + $0x8] sm:$0xf] %vm775_vm10, %v1823_v2  ;;  %1035 = vrot.lane.b32.xlu0 %v1849_v3, %s2841_s25  ;;  %1040 = vrot.lane.b32.xlu1 %v1849_v3, %s2842_s21  ;;  %s2849_s25 = smov 22   ;;  %s2850_s21 = smov 18  }
 0x1db   : > { %787 = vst.msk [vmem:[%s1731_s15 + $0x4] sm:$0xf] %vm342_vm1, %v785_v26 }
 0x1dc   : > { %v789_v27 = vpop.permute.xlu0 %788  ;;  %v793_v28 = vpop.permute.xlu1 %792 }
 0x1dd   : > { %791 = vst.msk [vmem:[%s1731_s15 + $0xc] sm:$0xf] %vm336_vm0, %v789_v27  ;;  %vm2858_vm0 = vcmask 93264  }
 0x1de   : > { %795 = vst.msk [vmem:[%s1731_s15 + $0xc] sm:$0xf] %vm342_vm1, %v793_v28  ;;  %1044 = vrot.lane.b32.xlu0 %v1849_v3, %s2831_s4  ;;  %1048 = vrot.lane.b32.xlu1 %v1849_v3, %s2843_s30  ;;  %s2846_s4 = smov 28   ;;  %s2851_s30 = smov 32   ;;  %vm2859_vm1 = vcmask 224464  }
 0x1e0   : > { %v797_v2 = vpop.permute.xlu0 %796  ;;  %v801_v29 = vpop.permute.xlu1 %800 }
 0x1e1   : > { %799 = vst.msk [vmem:[%s1731_s15 + $0x4] sm:$0xf] %vm355_vm2, %v797_v2 }
 0x1e2   : > { %803 = vst.msk [vmem:[%s1731_s15 + $0x4] sm:$0xf] %vm360_vm3, %v801_v29  ;;  %1053 = vrot.lane.b32.xlu0 %v1849_v3, %s2844_s5  ;;  %1057 = vrot.lane.b32.xlu1 %v1849_v3, %s2845_s22  ;;  %s2852_s5 = smov 26   ;;  %s2853_s22 = smov 20  }
 0x1e4   : > { %v805_v30 = vpop.permute.xlu0 %804  ;;  %v809_v31 = vpop.permute.xlu1 %808 }
 0x1e5   : > { %807 = vst.msk [vmem:[%s1731_s15 + $0xc] sm:$0xf] %vm355_vm2, %v805_v30  ;;  %vm2860_vm2 = vmmov %vm2858_vm0 }
 0x1e6   : > { %811 = vst.msk [vmem:[%s1731_s15 + $0xc] sm:$0xf] %vm360_vm3, %v809_v31  ;;  %1061 = vrot.lane.b32.xlu0 %v1849_v3, %s2846_s4  ;;  %1066 = vrot.lane.b32.xlu1 %v1849_v3, %s2847_s28  ;;  %s2854_s4 = smov 16   ;;  %s2855_s28 = smov 14   ;;  %vm2861_vm3 = vmmov %vm2859_vm1 }
 0x1e8   : > { %v813_v32 = vpop.permute.xlu0 %812  ;;  %v817_v33 = vpop.permute.xlu1 %816 }
 0x1e9   : > { %815 = vst.msk [vmem:[%s1731_s15 + $0x4] sm:$0xf] %vm373_vm4, %v813_v32 }
 0x1ea   : > { %819 = vst.msk [vmem:[%s1731_s15 + $0x4] sm:$0xf] %vm378_vm5, %v817_v33  ;;  %1070 = vrot.lane.b32.xlu0 %v1849_v3, %s2848_s23  ;;  %1074 = vrot.lane.b32.xlu1 %v1849_v3, %s2849_s25  ;;  %s2856_s23 = smov 10   ;;  %s2857_s25 = smov 8  }
 0x1ec   : > { %v821_v34 = vpop.permute.xlu0 %820  ;;  %v825_v35 = vpop.permute.xlu1 %824 }
 0x1ed   : > { %823 = vst.msk [vmem:[%s1731_s15 + $0xc] sm:$0xf] %vm373_vm4, %v821_v34  ;;  %vm2862_vm4 = vcmask 109664  }
 0x1ee   : > { %827 = vst.msk [vmem:[%s1731_s15 + $0xc] sm:$0xf] %vm378_vm5, %v825_v35  ;;  %1079 = vrot.lane.b32.xlu0 %v1849_v3, %s2850_s21  ;;  %1083 = vrot.lane.b32.xlu1 %v1849_v3, %s2851_s30  ;;  %vm2863_vm5 = vcmask 240864   ;;  %s2864_s21 = smov 12   ;;  %s2956_s30 = sand.u32 1, %s1482_s7  }
 0x1f0   : > { %v829_v36 = vpop.permute.xlu0 %828  ;;  %v834_v37 = vpop.permute.xlu1 %833 }
 0x1f1   : > { %831 = vst.msk [vmem:[%s1731_s15 + $0x4] sm:$0xf] %vm391_vm6, %v829_v36  ;;  %836 = vst.msk [vmem:[%s1731_s15 + $0xc] sm:$0xf] %vm391_vm6, %v834_v37 }
 0x1f2   : > { %832 = vst.msk [vmem:[%s1731_s15 + $0x4] sm:$0xf] %vm393_vm7, %v789_v27  ;;  %1091 = vrot.lane.b32.xlu0 %v1849_v3, %s2852_s5  ;;  %1098 = vrot.lane.b32.xlu1 %v1849_v3, %s2853_s22  ;;  %vm2865_vm6 = vmmov %vm2862_vm4  ;;  %s1165_s5 = scalar_lea.sflag [#allocation3], %s2956_s30 }
 0x1f4   : > { %v838_v38 = vpop.permute.xlu0 %837  ;;  %v842_v39 = vpop.permute.xlu1 %841 }
 0x1f5   : > { %840 = vst.msk [vmem:[%s1731_s15 + $0xc] sm:$0xf] %vm393_vm7, %v838_v38  ;;  %vm2866_vm7 = vmmov %vm2863_vm5 }
 0x1f6   : > { %844 = vst.msk [vmem:[%s1731_s15 + $0x4] sm:$0xf] %vm406_vm8, %v842_v39  ;;  %1103 = vrot.lane.b32.xlu0 %v1849_v3, %s2854_s4  ;;  %1108 = vrot.lane.b32.xlu1 %v1849_v3, %s2855_s28  ;;  %s1571_s4 = smov [#allocation2]  }
 0x1f7   : > { %845 = vst.msk [vmem:[%s1731_s15 + $0x4] sm:$0xf] %vm408_vm9, %v805_v30  ;;  %s1416_s28 = sshll.u32 %s1571_s4, 4  ;;  %s1417_s28 = int_to_ptr.vmem [resolvable:$false] %s1416_s28 }
 0x1f8   : > { %v847_v40 = vpop.permute.xlu0 %846  ;;  %v851_v41 = vpop.permute.xlu1 %850 }
 0x1f9   : > { %849 = vst.msk [vmem:[%s1731_s15 + $0xc] sm:$0xf] %vm406_vm8, %v847_v40  ;;  %vm2867_vm8 = vcmask 126064  }
 0x1fa   : > { %853 = vst.msk [vmem:[%s1731_s15 + $0xc] sm:$0xf] %vm408_vm9, %v851_v41  ;;  %1113 = vrot.lane.b32.xlu0 %v1849_v3, %s2856_s23  ;;  %1118 = vrot.lane.b32.xlu1 %v1849_v3, %s2857_s25  ;;  %vm2868_vm9 = vcmask 257264   ;;  %s1418_s23 = scalar_lea.vmem %s1417_s28, 512 }
 0x1fc   : > { %v855_v42 = vpop.permute.xlu0 %854  ;;  %v860_v43 = vpop.permute.xlu1 %859 }
 0x1fd   : > { %857 = vst.msk [vmem:[%s1731_s15 + $0x4] sm:$0xf] %vm2858_vm0, %v855_v42  ;;  %vm2869_vm0 = vmmov %vm2867_vm8 }
 0x1fe   : > { %858 = vst.msk [vmem:[%s1731_s15 + $0x4] sm:$0xf] %vm2859_vm1, %v821_v34  ;;  %1123 = vrot.lane.b32.xlu0 %v1849_v3, %s2798_s14  ;;  %1128 = vrot.lane.b32.xlu1 %v1849_v3, %s2799_s27  ;;  %vm2871_vm1 = vmmov %vm2868_vm9  ;;  %s1274_s27 = sshll.u32 %s1494_s10, 5 }
 0x1ff   : > { %862 = vst.msk [vmem:[%s1731_s15 + $0xc] sm:$0xf] %vm2860_vm2, %v860_v43  ;;  %vm2872_vm2 = vcmask 273664  }
 0x200   : > { %v864_v44 = vpop.permute.xlu0 %863  ;;  %v868_v45 = vpop.permute.xlu1 %867 }
 0x201   : > { %866 = vst.msk [vmem:[%s1731_s15 + $0xc] sm:$0xf] %vm2861_vm3, %v864_v44  ;;  %vm2873_vm3 = vmmov %vm2872_vm2 }
 0x202   : > { %870 = vst.msk [vmem:[%s1731_s15 + $0x4] sm:$0xf] %vm2862_vm4, %v868_v45  ;;  %1133 = vrot.lane.b32.xlu0 %v1849_v3, %s2800_s26  ;;  %1137 = vrot.lane.b32.xlu1 %v1849_v3, %s2864_s21  ;;  %s2870_s26 = smov 6   ;;  %vm2874_vm4 = vcmask 404864  }
 0x203   : > { %871 = vst.msk [vmem:[%s1731_s15 + $0x4] sm:$0xf] %vm2863_vm5, %v834_v37  ;;  %vm2875_vm5 = vmmov %vm2874_vm4 }
 0x204   : > { %v873_v46 = vpop.permute.xlu0 %872  ;;  %v877_v47 = vpop.permute.xlu1 %876 }
 0x205   : > { %875 = vst.msk [vmem:[%s1731_s15 + $0xc] sm:$0xf] %vm2865_vm6, %v873_v46  ;;  %vm2876_vm6 = vcmask 290064  }
 0x206   : > { %879 = vst.msk [vmem:[%s1731_s15 + $0xc] sm:$0xf] %vm2866_vm7, %v877_v47  ;;  %1141 = vrot.lane.b32.xlu0 %v1849_v3, %s2801_s29  ;;  %1146 = vrot.lane.b32.xlu1 %v1849_v3, %s2802_s18  ;;  %vm2877_vm7 = vmmov %vm2876_vm6  ;;  %s1273_s18 = sshll.u32 %s1490_s9, 2  ;;  %s1181_s9 = sshll.u32 %s1731_s15, 4  ;;  %s2611_s9 = int_to_ptr.vmem [resolvable:$true] %s1181_s9 }
 0x207   : > { %s1177_s29 = sadd.s32 %s1274_s27, %s1273_s18  ;;  %s1412_s22 = scalar_lea.vmem %s2611_s9, 256 }
 0x208   : > { %v881_v48 = vpop.permute.xlu0 %880  ;;  %v886_v49 = vpop.permute.xlu1 %885  ;;  %p1413_p0 = scmp.ne.s32.totalorder %s2611_s9, %s1412_s22  ;;  %p1419_p4 = scmp.lt.s32.totalorder %s2611_s9, %s1417_s28 }
 0x209   : > { %883 = vst.msk [vmem:[%s1731_s15 + $0x4] sm:$0xf] %vm2867_vm8, %v881_v48  ;;  %vm2878_vm8 = vcmask 421264   ;;  %p1420_p5 = scmp.lt.s32.totalorder %s1418_s23, %s1412_s22 }
 0x20a   : > { %884 = vst.msk [vmem:[%s1731_s15 + $0x4] sm:$0xf] %vm2868_vm9, %v847_v40  ;;  %1150 = vrot.lane.b32.xlu0 %v1849_v3, %s2870_s26  ;;  %1154 = vrot.lane.b32.xlu1 %v1849_v3, %s2803_s3  ;;  %vm2879_vm9 = vmmov %vm2878_vm8  ;;  %p1414_p1 = pnand %p1413_p0, %p1633_p3 }
 0x20b   : > { %888 = vst.msk [vmem:[%s1731_s15 + $0xc] sm:$0xf] %vm2869_vm0, %v886_v49  ;;  %vm2880_vm0 = vcmask 306464   ;;  %p1421_p6 = por %p1420_p5, %p1419_p4 }
 0x20c   : > { %v890_v50 = vpop.permute.xlu0 %889  ;;  %v898_v51 = vpop.permute.xlu1 %897  ;;  %p1415_p2 = pneg %p1414_p1 }
 0x20d   : > { %892 = vst.msk [vmem:[%s1731_s15 + $0xc] sm:$0xf] %vm2871_vm1, %v890_v50  ;;  %vm2881_vm1 = vcmask 437664  }
 0x20e   : > { %893 = vst.msk [vmem:[%s1731_s15 + $0x4] sm:$0xf] %vm2872_vm2, %v890_v50  ;;  %1159 = vrot.lane.b32.xlu0 %v1849_v3, %s2804_s2  ;;  %vm2882_vm2 = vmmov %vm2880_vm0  ;;  %s1275_s2 = sshll.u32 %s1177_s29, 6  ;;  %p1422_p7 = pnand %p1421_p6, %p1415_p2 }
 0x20f   : > { %895 = vst.msk [vmem:[%s1731_s15 + $0xc] sm:$0xf] %vm2873_vm3, %v868_v45  ;;  %vm2883_vm3 = vmmov %vm2881_vm1  ;;  %s2609_s14 = scalar_lea.hbm %s2670_s1, %s1275_s2 }
 0x210   : > { %894 = vst.msk [vmem:[%s1731_s15 + $0x4] sm:$0xf] %vm2874_vm4, %v829_v36  ;;  %v905_v52 = vpop.permute.xlu0 %904  ;;  %v910_v53 = vpop.permute.xlu1 %909  ;;  %vm2884_vm4 = vcmask 322864  }
 0x211   : > { %896 = vst.msk [vmem:[%s1731_s15 + $0xc] sm:$0xf] %vm2875_vm5, %v834_v37  ;;  %vm2885_vm5 = vcmask 454064  }
 0x212   : > { %900 = vst.msk [vmem:[%s1731_s15 + $0x4] sm:$0xf] %vm2876_vm6, %v898_v51  ;;  %vm2886_vm6 = vmmov %vm2884_vm4 }
 0x213   : > { %902 = vst.msk [vmem:[%s1731_s15 + $0xc] sm:$0xf] %vm2877_vm7, %v881_v48  ;;  %vm2887_vm7 = vmmov %vm2885_vm5 }
 0x214   : > { %901 = vst.msk [vmem:[%s1731_s15 + $0x4] sm:$0xf] %vm2878_vm8, %v842_v39  ;;  %v915_v54 = vpop.permute.xlu0 %914  ;;  %v920_v55 = vpop.permute.xlu1 %919  ;;  %vm2888_vm8 = vcmask 339264  }
 0x215   : > { %903 = vst.msk [vmem:[%s1731_s15 + $0xc] sm:$0xf] %vm2879_vm9, %v847_v40  ;;  %vm2889_vm9 = vcmask 470464  }
 0x216   : > { %907 = vst.msk [vmem:[%s1731_s15 + $0x4] sm:$0xf] %vm2880_vm0, %v905_v52  ;;  %vm2890_vm0 = vmmov %vm2888_vm8 }
 0x217   : > { %908 = vst.msk [vmem:[%s1731_s15 + $0x4] sm:$0xf] %vm2881_vm1, %v855_v42  ;;  %vm2891_vm1 = vmmov %vm2889_vm9 }
 0x218   : > { %912 = vst.msk [vmem:[%s1731_s15 + $0xc] sm:$0xf] %vm2882_vm2, %v910_v53  ;;  %v925_v56 = vpop.permute.xlu0 %924  ;;  %v930_v57 = vpop.permute.xlu1 %929  ;;  %vm2892_vm2 = vcmask 355664  }
 0x219   : > { %913 = vst.msk [vmem:[%s1731_s15 + $0xc] sm:$0xf] %vm2883_vm3, %v860_v43  ;;  %vm2893_vm3 = vcmask 486864  }
 0x21a   : > { %917 = vst.msk [vmem:[%s1731_s15 + $0x4] sm:$0xf] %vm2884_vm4, %v915_v54  ;;  %vm2894_vm4 = vmmov %vm2892_vm2 }
 0x21b   : > { %918 = vst.msk [vmem:[%s1731_s15 + $0x4] sm:$0xf] %vm2885_vm5, %v868_v45  ;;  %vm2895_vm5 = vmmov %vm2893_vm3 }
 0x21c   : > { %922 = vst.msk [vmem:[%s1731_s15 + $0xc] sm:$0xf] %vm2886_vm6, %v920_v55  ;;  %v935_v58 = vpop.permute.xlu0 %934  ;;  %v940_v59 = vpop.permute.xlu1 %939  ;;  %vm2896_vm6 = vcmask 372064  }
 0x21d   : > { %923 = vst.msk [vmem:[%s1731_s15 + $0xc] sm:$0xf] %vm2887_vm7, %v873_v46  ;;  %vm2897_vm7 = vcmask 503264  }
 0x21e   : > { %927 = vst.msk [vmem:[%s1731_s15 + $0x4] sm:$0xf] %vm2888_vm8, %v925_v56  ;;  %vm2898_vm8 = vmmov %vm2896_vm6 }
 0x21f   : > { %928 = vst.msk [vmem:[%s1731_s15 + $0x4] sm:$0xf] %vm2889_vm9, %v881_v48  ;;  %vm2899_vm9 = vmmov %vm2897_vm7 }
 0x220   : > { %932 = vst.msk [vmem:[%s1731_s15 + $0xc] sm:$0xf] %vm2890_vm0, %v930_v57  ;;  %v944_v60 = vpop.permute.xlu0 %943  ;;  %v948_v61 = vpop.permute.xlu1 %947  ;;  %vm2900_vm0 = vcmask 388464  }
 0x221   : > { %933 = vst.msk [vmem:[%s1731_s15 + $0xc] sm:$0xf] %vm2891_vm1, %v886_v49  ;;  %vm2901_vm1 = vcmask 519664  }
 0x222   : > { %937 = vst.msk [vmem:[%s1731_s15 + $0x4] sm:$0xf] %vm2892_vm2, %v935_v58  ;;  %vm2902_vm2 = vmmov %vm2900_vm0 }
 0x223   : > { %938 = vst.msk [vmem:[%s1731_s15 + $0x4] sm:$0xf] %vm2893_vm3, %v910_v53  ;;  %vm2903_vm3 = vmmov %vm2901_vm1 }
 0x224   : > { %942 = vst.msk [vmem:[%s1731_s15 + $0xc] sm:$0xf] %vm2894_vm4, %v940_v59  ;;  %v953_v62 = vpop.permute.xlu0 %952  ;;  %v957_v63 = vpop.permute.xlu1 %956  ;;  %vm2904_vm4 = vcmask 536064  }
 0x225   : > { %946 = vst.msk [vmem:[%s1731_s15 + $0xc] sm:$0xf] %vm2895_vm5, %v944_v60  ;;  %vm2905_vm5 = vmmov %vm2904_vm4 }
 0x226   : > { %950 = vst.msk [vmem:[%s1731_s15 + $0x4] sm:$0xf] %vm2896_vm6, %v948_v61  ;;  %vm2906_vm6 = vcmask 667264  }
 0x227   : > { %951 = vst.msk [vmem:[%s1731_s15 + $0x4] sm:$0xf] %vm2897_vm7, %v920_v55  ;;  %vm2907_vm7 = vmmov %vm2906_vm6 }
 0x228   : > { %955 = vst.msk [vmem:[%s1731_s15 + $0xc] sm:$0xf] %vm2898_vm8, %v953_v62  ;;  %v961_v0 = vpop.permute.xlu0 %960  ;;  %v966_v4 = vpop.permute.xlu1 %965  ;;  %vm2908_vm8 = vcmask 552464  }
 0x229   : > { %959 = vst.msk [vmem:[%s1731_s15 + $0xc] sm:$0xf] %vm2899_vm9, %v957_v63  ;;  %vm2909_vm9 = vmmov %vm2908_vm8 }
 0x22a   : > { %963 = vst.msk [vmem:[%s1731_s15 + $0x4] sm:$0xf] %vm2900_vm0, %v961_v0  ;;  %vm2910_vm0 = vcmask 683664  }
 0x22b   : > { %964 = vst.msk [vmem:[%s1731_s15 + $0x4] sm:$0xf] %vm2901_vm1, %v930_v57  ;;  %vm2911_vm1 = vmmov %vm2910_vm0 }
 0x22c   : > { %968 = vst.msk [vmem:[%s1731_s15 + $0xc] sm:$0xf] %vm2902_vm2, %v966_v4  ;;  %v970_v5 = vpop.permute.xlu0 %969  ;;  %v975_v6 = vpop.permute.xlu1 %974  ;;  %vm2912_vm2 = vcmask 568864  }
 0x22d   : > { %972 = vst.msk [vmem:[%s1731_s15 + $0xc] sm:$0xf] %vm2903_vm3, %v970_v5  ;;  %vm2913_vm3 = vmmov %vm2912_vm2 }
 0x22e   : > { %977 = vst.msk [vmem:[%s1731_s15 + $0x4] sm:$0xf] %vm2904_vm4, %v975_v6  ;;  %vm2914_vm4 = vcmask 700064  }
 0x230   : > { %v983_v7 = vpop.permute.xlu0 %982  ;;  %v979_v8 = vpop.permute.xlu1 %978 }
 0x231   : > { %985 = vst.msk [vmem:[%s1731_s15 + $0xc] sm:$0xf] %vm2905_vm5, %v983_v7  ;;  %vm2915_vm5 = vmmov %vm2914_vm4 }
 0x232   : > { %981 = vst.msk [vmem:[%s1731_s15 + $0x4] sm:$0xf] %vm2906_vm6, %v979_v8  ;;  %vm2916_vm6 = vcmask 585264  }
 0x234   : > { %v987_v9 = vpop.permute.xlu0 %986  ;;  %v991_v10 = vpop.permute.xlu1 %990 }
 0x235   : > { %989 = vst.msk [vmem:[%s1731_s15 + $0xc] sm:$0xf] %vm2907_vm7, %v987_v9  ;;  %vm2917_vm7 = vcmask 716464  }
 0x236   : > { %993 = vst.msk [vmem:[%s1731_s15 + $0x4] sm:$0xf] %vm2908_vm8, %v991_v10  ;;  %vm2918_vm8 = vmmov %vm2916_vm6 }
 0x238   : > { %v999_v11 = vpop.permute.xlu0 %998  ;;  %v995_v12 = vpop.permute.xlu1 %994 }
 0x239   : > { %1001 = vst.msk [vmem:[%s1731_s15 + $0xc] sm:$0xf] %vm2909_vm9, %v999_v11  ;;  %vm2919_vm9 = vmmov %vm2917_vm7 }
 0x23a   : > { %997 = vst.msk [vmem:[%s1731_s15 + $0x4] sm:$0xf] %vm2910_vm0, %v995_v12  ;;  %vm2920_vm0 = vcmask 601664  }
 0x23c   : > { %v1003_v1 = vpop.permute.xlu0 %1002  ;;  %v1007_v13 = vpop.permute.xlu1 %1006 }
 0x23d   : > { %1005 = vst.msk [vmem:[%s1731_s15 + $0xc] sm:$0xf] %vm2911_vm1, %v1003_v1  ;;  %vm2921_vm1 = vcmask 732864  }
 0x23e   : > { %1009 = vst.msk [vmem:[%s1731_s15 + $0x4] sm:$0xf] %vm2912_vm2, %v1007_v13  ;;  %vm2922_vm2 = vmmov %vm2920_vm0 }
 0x240   : > { %v1015_v14 = vpop.permute.xlu0 %1014  ;;  %v1011_v15 = vpop.permute.xlu1 %1010 }
 0x241   : > { %1017 = vst.msk [vmem:[%s1731_s15 + $0xc] sm:$0xf] %vm2913_vm3, %v1015_v14  ;;  %vm2923_vm3 = vmmov %vm2921_vm1 }
 0x242   : > { %1013 = vst.msk [vmem:[%s1731_s15 + $0x4] sm:$0xf] %vm2914_vm4, %v1011_v15  ;;  %vm2924_vm4 = vcmask 618064  }
 0x244   : > { %v1019_v16 = vpop.permute.xlu0 %1018  ;;  %v1023_v17 = vpop.permute.xlu1 %1022 }
 0x245   : > { %1021 = vst.msk [vmem:[%s1731_s15 + $0xc] sm:$0xf] %vm2915_vm5, %v1019_v16  ;;  %vm2925_vm5 = vcmask 749264  }
 0x246   : > { %1025 = vst.msk [vmem:[%s1731_s15 + $0x4] sm:$0xf] %vm2916_vm6, %v1023_v17  ;;  %vm2926_vm6 = vmmov %vm2924_vm4 }
 0x247   : > { %1026 = vst.msk [vmem:[%s1731_s15 + $0x4] sm:$0xf] %vm2917_vm7, %v983_v7  ;;  %vm2927_vm7 = vmmov %vm2925_vm5 }
 0x248   : > { %v1028_v18 = vpop.permute.xlu0 %1027  ;;  %v1032_v19 = vpop.permute.xlu1 %1031 }
 0x249   : > { %1030 = vst.msk [vmem:[%s1731_s15 + $0xc] sm:$0xf] %vm2918_vm8, %v1028_v18  ;;  %vm2928_vm8 = vcmask 634464  }
 0x24a   : > { %1034 = vst.msk [vmem:[%s1731_s15 + $0xc] sm:$0xf] %vm2919_vm9, %v1032_v19  ;;  %vm2929_vm9 = vcmask 765664  }
 0x24c   : > { %v1036_v20 = vpop.permute.xlu0 %1035  ;;  %v1041_v21 = vpop.permute.xlu1 %1040 }
 0x24d   : > { %1038 = vst.msk [vmem:[%s1731_s15 + $0x4] sm:$0xf] %vm2920_vm0, %v1036_v20  ;;  %vm2930_vm0 = vmmov %vm2928_vm8 }
 0x24e   : > { %1039 = vst.msk [vmem:[%s1731_s15 + $0x4] sm:$0xf] %vm2921_vm1, %v999_v11  ;;  %vm2931_vm1 = vmmov %vm2929_vm9 }
 0x24f   : > { %1043 = vst.msk [vmem:[%s1731_s15 + $0xc] sm:$0xf] %vm2922_vm2, %v1041_v21  ;;  %vm2932_vm2 = vcmask 650864  }
 0x250   : > { %v1045_v22 = vpop.permute.xlu0 %1044  ;;  %v1049_v23 = vpop.permute.xlu1 %1048 }
 0x251   : > { %1047 = vst.msk [vmem:[%s1731_s15 + $0xc] sm:$0xf] %vm2923_vm3, %v1045_v22  ;;  %vm2933_vm3 = vcmask 782064  }
 0x252   : > { %1051 = vst.msk [vmem:[%s1731_s15 + $0x4] sm:$0xf] %vm2924_vm4, %v1049_v23  ;;  %vm2934_vm4 = vmmov %vm2932_vm2 }
 0x253   : > { %1052 = vst.msk [vmem:[%s1731_s15 + $0x4] sm:$0xf] %vm2925_vm5, %v1015_v14  ;;  %vm2935_vm5 = vmmov %vm2933_vm3 }
 0x254   : > { %v1054_v24 = vpop.permute.xlu0 %1053  ;;  %v1058_v25 = vpop.permute.xlu1 %1057 }
 0x255   : > { %1056 = vst.msk [vmem:[%s1731_s15 + $0xc] sm:$0xf] %vm2926_vm6, %v1054_v24  ;;  %vm2936_vm6 = vcmask 798464  }
 0x256   : > { %1060 = vst.msk [vmem:[%s1731_s15 + $0xc] sm:$0xf] %vm2927_vm7, %v1058_v25  ;;  %vm2937_vm7 = vmmov %vm2936_vm6 }
 0x258   : > { %v1062_v26 = vpop.permute.xlu0 %1061  ;;  %v1067_v27 = vpop.permute.xlu1 %1066 }
 0x259   : > { %1064 = vst.msk [vmem:[%s1731_s15 + $0x4] sm:$0xf] %vm2928_vm8, %v1062_v26  ;;  %vm2938_vm8 = vcmask 929664  }
 0x25a   : > { %1065 = vst.msk [vmem:[%s1731_s15 + $0x4] sm:$0xf] %vm2929_vm9, %v1028_v18  ;;  %vm2939_vm9 = vmmov %vm2938_vm8 }
 0x25b   : > { %1069 = vst.msk [vmem:[%s1731_s15 + $0xc] sm:$0xf] %vm2930_vm0, %v1067_v27  ;;  %vm2940_vm0 = vcmask 814864  }
 0x25c   : > { %v1071_v28 = vpop.permute.xlu0 %1070  ;;  %v1075_v2 = vpop.permute.xlu1 %1074 }
 0x25d   : > { %1073 = vst.msk [vmem:[%s1731_s15 + $0xc] sm:$0xf] %vm2931_vm1, %v1071_v28  ;;  %vm2941_vm1 = vmmov %vm2940_vm0 }
 0x25e   : > { %1077 = vst.msk [vmem:[%s1731_s15 + $0x4] sm:$0xf] %vm2932_vm2, %v1075_v2  ;;  %vm2942_vm2 = vcmask 946064  }
 0x25f   : > { %1078 = vst.msk [vmem:[%s1731_s15 + $0x4] sm:$0xf] %vm2933_vm3, %v1041_v21  ;;  %vm2943_vm3 = vmmov %vm2942_vm2 }
 0x260   : > { %v1080_v29 = vpop.permute.xlu0 %1079  ;;  %v1084_v30 = vpop.permute.xlu1 %1083 }
 0x261   : > { %1082 = vst.msk [vmem:[%s1731_s15 + $0xc] sm:$0xf] %vm2934_vm4, %v1080_v29  ;;  %vm2944_vm4 = vcmask 831264  }
 0x262   : > { %1086 = vst.msk [vmem:[%s1731_s15 + $0xc] sm:$0xf] %vm2935_vm5, %v1084_v30  ;;  %vm2945_vm5 = vcmask 962464  }
 0x263   : > { %1087 = vst.msk [vmem:[%s1731_s15 + $0x4] sm:$0xf] %vm2936_vm6, %v1084_v30  ;;  %vm2946_vm6 = vmmov %vm2944_vm4 }
 0x264   : > { %1089 = vst.msk [vmem:[%s1731_s15 + $0xc] sm:$0xf] %vm2937_vm7, %v1062_v26  ;;  %v1092_v31 = vpop.permute.xlu0 %1091  ;;  %v1099_v32 = vpop.permute.xlu1 %1098  ;;  %vm2947_vm7 = vmmov %vm2945_vm5 }
 0x265   : > { %1088 = vst.msk [vmem:[%s1731_s15 + $0x4] sm:$0xf] %vm2938_vm8, %v1023_v17  ;;  %vm2948_vm8 = vcmask 864064  }
 0x266   : > { %1090 = vst.msk [vmem:[%s1731_s15 + $0xc] sm:$0xf] %vm2939_vm9, %v1028_v18  ;;  %vm2949_vm9 = vcmask 995264  }
 0x267   : > { %1096 = vst.msk [vmem:[%s1731_s15 + $0xc] sm:$0xf] %vm2940_vm0, %v1075_v2  ;;  %vm2950_vm0 = vmmov %vm2948_vm8 }
 0x268   : > { %1094 = vst.msk [vmem:[%s1731_s15 + $0x4] sm:$0xf] %vm2941_vm1, %v1092_v31  ;;  %v1104_v33 = vpop.permute.xlu0 %1103  ;;  %v1109_v34 = vpop.permute.xlu1 %1108  ;;  %vm2951_vm1 = vmmov %vm2949_vm9 }
 0x269   : > { %1095 = vst.msk [vmem:[%s1731_s15 + $0x4] sm:$0xf] %vm2942_vm2, %v1036_v20  ;;  %vm2952_vm2 = vcmask 880464  }
 0x26a   : > { %1097 = vst.msk [vmem:[%s1731_s15 + $0xc] sm:$0xf] %vm2943_vm3, %v1041_v21 }
 0x26b   : > { %1101 = vst.msk [vmem:[%s1731_s15 + $0x4] sm:$0xf] %vm2944_vm4, %v1099_v32 }
 0x26c   : > { %1102 = vst.msk [vmem:[%s1731_s15 + $0x4] sm:$0xf] %vm2945_vm5, %v1049_v23  ;;  %v1114_v35 = vpop.permute.xlu0 %1113  ;;  %v1119_v36 = vpop.permute.xlu1 %1118 }
 0x26d   : > { %1106 = vst.msk [vmem:[%s1731_s15 + $0xc] sm:$0xf] %vm2946_vm6, %v1104_v33 }
 0x26e   : > { %1107 = vst.msk [vmem:[%s1731_s15 + $0xc] sm:$0xf] %vm2947_vm7, %v1054_v24 }
 0x26f   : > { %1111 = vst.msk [vmem:[%s1731_s15 + $0x4] sm:$0xf] %vm719_vm12, %v1109_v34  ;;  %1116 = vst.msk [vmem:[%s1731_s15 + $0xc] sm:$0xf] %vm719_vm12, %v1114_v35  ;;  %vm2953_vm12 = vcmask 1011664  }
 0x270   : > { %1112 = vst.msk [vmem:[%s1731_s15 + $0x4] sm:$0xf] %vm721_vm15, %v1062_v26  ;;  %1117 = vst.msk [vmem:[%s1731_s15 + $0xc] sm:$0xf] %vm721_vm15, %v1067_v27  ;;  %v1124_v37 = vpop.permute.xlu0 %1123  ;;  %v1129_v38 = vpop.permute.xlu1 %1128 }
 0x271   : > { %1121 = vst.msk [vmem:[%s1731_s15 + $0x4] sm:$0xf] %vm2948_vm8, %v1119_v36  ;;  %vm2954_vm15 = vmmov %vm2952_vm2 }
 0x272   : > { %1122 = vst.msk [vmem:[%s1731_s15 + $0x4] sm:$0xf] %vm2949_vm9, %v1075_v2  ;;  %vm2955_vm3 = vmmov %vm2953_vm12 }
 0x273   : > { %1126 = vst.msk [vmem:[%s1731_s15 + $0xc] sm:$0xf] %vm2950_vm0, %v1124_v37 }
 0x274   : > { %1127 = vst.msk [vmem:[%s1731_s15 + $0xc] sm:$0xf] %vm2951_vm1, %v1080_v29  ;;  %v1134_v39 = vpop.permute.xlu0 %1133  ;;  %v1138_v40 = vpop.permute.xlu1 %1137 }
 0x275   : > { %1131 = vst.msk [vmem:[%s1731_s15 + $0x4] sm:$0xf] %vm2952_vm2, %v1129_v38 }
 0x276   : > { %1132 = vst.msk [vmem:[%s1731_s15 + $0x4] sm:$0xf] %vm2953_vm12, %v1104_v33 }
 0x277   : > { %1136 = vst.msk [vmem:[%s1731_s15 + $0xc] sm:$0xf] %vm2954_vm15, %v1134_v39 }
 0x278   : > { %1140 = vst.msk [vmem:[%s1731_s15 + $0xc] sm:$0xf] %vm2955_vm3, %v1138_v40  ;;  %v1142_v41 = vpop.permute.xlu0 %1141  ;;  %v1147_v42 = vpop.permute.xlu1 %1146 }
 0x279   : > { %1144 = vst.msk [vmem:[%s1731_s15 + $0x4] sm:$0xf] %vm758_vm11, %v1142_v41  ;;  %1149 = vst.msk [vmem:[%s1731_s15 + $0xc] sm:$0xf] %vm758_vm11, %v1147_v42 }
 0x27a   : > { %1145 = vst.msk [vmem:[%s1731_s15 + $0x4] sm:$0xf] %vm760_vm14, %v1114_v35 }
 0x27c   : > { %v1151_v43 = vpop.permute.xlu0 %1150  ;;  %v1155_v44 = vpop.permute.xlu1 %1154 }
 0x27d   : > { %1153 = vst.msk [vmem:[%s1731_s15 + $0xc] sm:$0xf] %vm760_vm14, %v1151_v43 }
 0x27e   : > { %1157 = vst.msk [vmem:[%s1731_s15 + $0x4] sm:$0xf] %vm773_vm13, %v1155_v44 }
 0x27f   : > { %1158 = vst.msk [vmem:[%s1731_s15 + $0x4] sm:$0xf] %vm775_vm10, %v1124_v37 }
 0x280   : > { %v1160_v45 = vpop.permute.xlu0 %1159 }
 0x281   : > { %1162 = vst.msk [vmem:[%s1731_s15 + $0xc] sm:$0xf] %vm773_vm13, %v1160_v45 }
 0x282   : > { %1163 = vst.msk [vmem:[%s1731_s15 + $0xc] sm:$0xf] %vm775_vm10, %v1849_v3 }
 0x283   : > { %1425 = shalt.err (!%p1422_p7)
}
 0x284   : > { %s1426_s15 = scalar_lea.hbm %s2609_s14, 256  ;;  %s1430_s26 = scalar_lea.hbm %s2670_s1, 4096 }
 0x285   : > { %p1427_p9 = scmp.ne.s32.totalorder %s2609_s14, %s1426_s15  ;;  %p1431_p12 = scmp.lt.u32.totalorder %s2609_s14, %s2670_s1 }
 0x286   : > { %p1432_p13 = scmp.lt.u32.totalorder %s1430_s26, %s1426_s15  ;;  %p1434_p1 = scmp.lt.u32.totalorder %s1426_s15, %s2609_s14 }
 0x287   : > { %p1428_p10 = pnand %p1427_p9, %p1633_p3 }
 0x288   : > { %p1433_p0 = por %p1432_p13, %p1431_p12 }
 0x289   : > { %p1429_p11 = pneg %p1428_p10 }
 0x28a   : > { %p1435_p2 = por %p1434_p1, %p1433_p0 }
 0x28c   : > { %p1436_p4 = pnand %p1435_p2, %p1429_p11 }
 0x28e   : > { %1439 = shalt.err (!%p1436_p4)
}
 0x28f   : > { %1278 = dma.vmem_to_hbm [thread:$0]  (%p1633_p3), %s2611_s9, 256, %s2609_s14, %s1165_s5  }
 0x290 PF: > { %p1284_p5 = scmp.ge.s32.totalorder %s1506_s13, 2  ;;  %s1193_s29 = sand.u32 1, %s1478_s6  }
 0x291   : > { %s1194_s2 = scalar_lea.sflag [#allocation3], %s1193_s29 }
 0x292   : > { %p1281_p6 = pnand %p1284_p5, %p1642_p8 }
 0x294   : > { %1473 = dma.done.wait (!%p1281_p6), %s1194_s2, 256  }
 0x295   : > { %1475 = vsyncadd (!%p1281_p6), %s1194_s2, 4294967040  ;;  %s14_s13 = sadd.s32 1, %s1506_s13   ;;  %s2957_s6 = smov %s1482_s7 }
 0x296   : > { %p11_p7 = scmp.ge.s32.totalorder %s14_s13, 18   ;;  %s2958_s7 = smov %s1486_s8 }
 0x297   : > { %s2959_s8 = smov %s1651_s24  ;;  %s2960_s9 = smov %s1498_s11 }
 0x298   : > { %s2961_s10 = smov %s1502_s12  ;;  %s2962_s11 = smov %s2965_s16 }
 0x299   : > { %s2963_s12 = smov %s2969_s17  ;;  %13 = sbr.rel (!%p11_p7) target bundleno = 5 (0x5), region = 59 }
 0x2a0   :  { %1199 = vsyncpa [#allocation3], 1 }
 0x2a1   :  { %1201 = vsyncpa [#allocation3 + $0x1], 1 }

</bundles_post_ra>
